<compile_context>
chip_gen: v7x
topology: tpu7x:2x2x1
jax: 0.10.0
libtpu: 0.0.40
codegen_flags: <defaults>
</compile_context>

<pallas_src>
import jax
import jax.numpy as jnp
from jax import lax
from jax.experimental import pallas as pl
from jax.experimental.pallas import tpu as pltpu


def _bottleneck_kernel(x_ref, res_ref,
                       w1_ref, b1_ref, w2_ref, b2_ref, w3_ref, b3_ref,
                       out_ref):
    """One (batch, row-tile) program of the fused bottleneck.

    x_ref   : (H, W, Cin)   bf16  full image for this batch element (resident)
    res_ref : (TH, Wo, 4C)  f32   pre-cropped residual tile
    w*_ref  : bf16 conv weights with BN scale folded in
    b*_ref  : f32 per-channel BN shifts
    out_ref : (TH, Wo, 4C)  f32
    """
    H, W, Cin = x_ref.shape
    TH, Wo, C4 = out_ref.shape
    C = w1_ref.shape[1]

    r = pl.program_id(1)
    row0 = r * TH                              # first input row for this tile

    # Input window with a 2-row halo: output rows [row0, row0+TH) need input
    # rows [row0, row0+TH+2).  Dynamic slice on a leading dim = cheap addressing.
    x_tile = x_ref[pl.ds(row0, TH + 2)]        # (TH+2, W, Cin) bf16

    # ---- conv1 (1x1) + folded bn1 + relu ----------------------------------
    h1 = jnp.dot(x_tile.reshape((TH + 2) * W, Cin), w1_ref[...],
                 preferred_element_type=jnp.float32)
    h1 = jnp.maximum(h1 + b1_ref[...], 0.0)                    # f32 elementwise
    h1 = h1.astype(jnp.bfloat16).reshape(TH + 2, W, C)

    # ---- conv2 (3x3, pad=0, stride=1) + folded bn2 + relu -----------------
    # Only 3 column-shifted copies (one per kw); kh taps are row slices of the
    # flattened copies; accumulator starts from the first tap.
    h1_cols = [h1[:, kw:kw + Wo, :].reshape((TH + 2) * Wo, C) for kw in range(3)]
    acc = None
    for kh in range(3):
        for kw in range(3):
            patch = h1_cols[kw][kh * Wo:(kh + TH) * Wo]        # (TH*Wo, C) bf16
            part = jnp.dot(patch, w2_ref[kh, kw],
                           preferred_element_type=jnp.float32)
            acc = part if acc is None else acc + part
    h2 = jnp.maximum(acc + b2_ref[...], 0.0).astype(jnp.bfloat16)

    # ---- conv3 (1x1) + folded bn3 -----------------------------------------
    h3 = jnp.dot(h2, w3_ref[...], preferred_element_type=jnp.float32)
    h3 = (h3 + b3_ref[...]).reshape(TH, Wo, C4)

    # ---- residual add + relu (residual arrives pre-cropped, f32) ----------
    out_ref[...] = jnp.maximum(h3 + res_ref[...], 0.0)


def bottleneck_nop(x, fparams, *, row_tile=None):
    """Fused bottleneck forward. x: (N, H, W, Cin) f32 NHWC."""
    N, H, W, Cin = x.shape
    C = fparams["w1"].shape[1]
    C4 = 4 * C
    assert Cin == C4, "residual add requires in_channels == 4*channels"
    Ho, Wo = H - 2, W - 2

    if row_tile is None:
        # Largest divisor of Ho (capped) -> a few row tiles; at real ResNet
        # shapes pick the largest tile whose (row_tile+2)-row window fits VMEM.
        row_tile = max(d for d in range(1, min(Ho, 8) + 1) if Ho % d == 0)
    assert Ho % row_tile == 0
    n_row_tiles = Ho // row_tile

    x_bf16 = x.astype(jnp.bfloat16)             # conv-path operands in bf16
    residual = x[:, 1:H - 1, 1:W - 1, :]        # f32 residual, cropped in the
                                                # wrapper so its BlockSpec tiles
                                                # it directly (no in-kernel crop)

    grid = (N, n_row_tiles)
    in_specs = [
        # Full per-batch image; block index ignores r -> stays resident.
        pl.BlockSpec((None, H, W, Cin), lambda b, r: (b, 0, 0, 0)),
        # Residual tile aligned with the output tile.
        pl.BlockSpec((None, row_tile, Wo, C4), lambda b, r: (b, r, 0, 0)),
        # Folded weights / biases: whole-array blocks, fetched once and kept.
        pl.BlockSpec((Cin, C), lambda b, r: (0, 0)),
        pl.BlockSpec((1, C), lambda b, r: (0, 0)),
        pl.BlockSpec((3, 3, C, C), lambda b, r: (0, 0, 0, 0)),
        pl.BlockSpec((1, C), lambda b, r: (0, 0)),
        pl.BlockSpec((C, C4), lambda b, r: (0, 0)),
        pl.BlockSpec((1, C4), lambda b, r: (0, 0)),
    ]
    out_specs = pl.BlockSpec((None, row_tile, Wo, C4), lambda b, r: (b, r, 0, 0))

    return pl.pallas_call(
        _bottleneck_kernel,
        grid=grid,
        in_specs=in_specs,
        out_specs=out_specs,
        out_shape=jax.ShapeDtypeStruct((N, Ho, Wo, C4), jnp.float32),
        compiler_params=pltpu.CompilerParams(
            dimension_semantics=("parallel", "parallel"),
            vmem_limit_bytes=48 * 1024 * 1024,
        ),
    )(x_bf16, residual,
      fparams["w1"], fparams["b1"],
      fparams["w2"], fparams["b2"],
      fparams["w3"], fparams["b3"])


def make_params(key, in_channels, channels, eps=1e-5):
    ks = jax.random.split(key, 6)

    def bn(k, c):
        kk = jax.random.split(k, 4)
        gamma = 1.0 + 0.1 * jax.random.normal(kk[0], (c,), jnp.float32)
        beta = 0.1 * jax.random.normal(kk[1], (c,), jnp.float32)
        mean = 0.1 * jax.random.normal(kk[2], (c,), jnp.float32)
        var = jnp.abs(jax.random.normal(kk[3], (c,), jnp.float32)) + 0.5
        scale = gamma / jnp.sqrt(var + eps)
        shift = beta - mean * scale
        return scale.reshape(1, c), shift.reshape(1, c)

    w1 = 0.1 * jax.random.normal(ks[0], (in_channels, channels), jnp.float32)
    w2 = 0.1 * jax.random.normal(ks[1], (3, 3, channels, channels), jnp.float32)
    w3 = 0.1 * jax.random.normal(ks[2], (channels, 4 * channels), jnp.float32)
    s1, b1 = bn(ks[3], channels)
    s2, b2 = bn(ks[4], channels)
    s3, b3 = bn(ks[5], 4 * channels)
    return dict(w1=w1, w2=w2, w3=w3, s1=s1, b1=b1, s2=s2, b2=b2, s3=s3, b3=b3)


def fold_bn_params(p):
    """Fold eval-mode BN scale into conv weights (done once at param prep);
    the kernel then only adds the per-channel shift after each matmul."""
    return dict(
        w1=(p["w1"] * p["s1"]).astype(jnp.bfloat16),
        w2=(p["w2"] * p["s2"].reshape(1, 1, 1, -1)).astype(jnp.bfloat16),
        w3=(p["w3"] * p["s3"]).astype(jnp.bfloat16),
        b1=p["b1"], b2=p["b2"], b3=p["b3"],
    )


def reference(x, fp):
    """Plain-JAX reference using the same folded bf16 weights / bf16 conv inputs."""
    Cin, C = fp["w1"].shape
    dn = ("NHWC", "HWIO", "NHWC")
    hp = lax.Precision.HIGHEST
    xb = x.astype(jnp.bfloat16).astype(jnp.float32)
    w1 = fp["w1"].astype(jnp.float32).reshape(1, 1, Cin, C)
    w2 = fp["w2"].astype(jnp.float32)
    w3 = fp["w3"].astype(jnp.float32).reshape(1, 1, C, 4 * C)

    h1 = lax.conv_general_dilated(xb, w1, (1, 1), "VALID",
                                  dimension_numbers=dn, precision=hp)
    h1 = jnp.maximum(h1 + fp["b1"].reshape(-1), 0.0)
    h1 = h1.astype(jnp.bfloat16).astype(jnp.float32)

    h2 = lax.conv_general_dilated(h1, w2, (1, 1), "VALID",
                                  dimension_numbers=dn, precision=hp)
    h2 = jnp.maximum(h2 + fp["b2"].reshape(-1), 0.0)
    h2 = h2.astype(jnp.bfloat16).astype(jnp.float32)

    h3 = lax.conv_general_dilated(h2, w3, (1, 1), "VALID",
                                  dimension_numbers=dn, precision=hp)
    h3 = h3 + fp["b3"].reshape(-1)
    return jnp.maximum(h3 + x[:, 1:-1, 1:-1, :], 0.0)


if __name__ == "__main__":
    key = jax.random.PRNGKey(0)
    kx, kp = jax.random.split(key)

    # Small demo shapes consistent with the module.  The real ResAdjust blocks
    # use channels in {128, 256, 512} (4C in {512, 1024, 2048}); we use C=32 so
    # Cin = 4C = 128 keeps every matmul minor dim and the output store
    # lane-dense while staying tiny.
    N, H, W = 2, 16, 16
    channels = 32
    in_channels = 4 * channels   # residual add requires Cin == 4C (downsample=None)

    x = jax.random.normal(kx, (N, H, W, in_channels), jnp.float32)
    params = make_params(kp, in_channels, channels)
    fparams = fold_bn_params(params)          # BN folded once at param-prep time

    out = bottleneck_nop(x, fparams)
    out = jax.block_until_ready(out)

    ref = reference(x, fparams)
    assert out.shape == (N, H - 2, W - 2, 4 * channels)
    assert jnp.allclose(out, ref, rtol=2e-2, atol=2e-2), \
        "Pallas kernel mismatch vs reference"

    print("KERNEL_OK")
</pallas_src>

<mosaic_0001>
module attributes {stable_mosaic.version = 11 : i64} {
  func.func @_bottleneck_kernel(%arg0: i32, %arg1: i32, %arg2: memref<1x16x16x128xbf16, #tpu.memory_space<vmem>>, %arg3: memref<1x7x14x128xf32, #tpu.memory_space<vmem>>, %arg4: memref<128x32xbf16, #tpu.memory_space<vmem>>, %arg5: memref<1x32xf32, #tpu.memory_space<vmem>>, %arg6: memref<3x3x32x32xbf16, #tpu.memory_space<vmem>>, %arg7: memref<1x32xf32, #tpu.memory_space<vmem>>, %arg8: memref<32x128xbf16, #tpu.memory_space<vmem>>, %arg9: memref<1x128xf32, #tpu.memory_space<vmem>>, %arg10: memref<1x7x14x128xf32, #tpu.memory_space<vmem>>) attributes {dimension_semantics = [#tpu.dimension_semantics<parallel>, #tpu.dimension_semantics<parallel>], iteration_bounds = array<i64: 2, 2>, scalar_prefetch = 0 : i64, scratch_operands = 0 : i64, tpu.core_type = #tpu.core_type<tc>, window_params = [{transform_indices = @transform_0, window_bounds = array<i64: 1, 16, 16, 128>}, {transform_indices = @transform_1, window_bounds = array<i64: 1, 7, 14, 128>}, {pipeline_mode = #tpu.pipeline_mode<synchronous>, transform_indices = @transform_2, window_bounds = array<i64: 128, 32>}, {pipeline_mode = #tpu.pipeline_mode<synchronous>, transform_indices = @transform_3, window_bounds = array<i64: 1, 32>}, {pipeline_mode = #tpu.pipeline_mode<synchronous>, transform_indices = @transform_4, window_bounds = array<i64: 3, 3, 32, 32>}, {pipeline_mode = #tpu.pipeline_mode<synchronous>, transform_indices = @transform_5, window_bounds = array<i64: 1, 32>}, {pipeline_mode = #tpu.pipeline_mode<synchronous>, transform_indices = @transform_6, window_bounds = array<i64: 32, 128>}, {pipeline_mode = #tpu.pipeline_mode<synchronous>, transform_indices = @transform_7, window_bounds = array<i64: 1, 128>}, {transform_indices = @transform_8, window_bounds = array<i64: 1, 7, 14, 128>}]} {
    %c7_i32 = arith.constant 7 : i32
    %0 = arith.muli %arg1, %c7_i32 : i32
    %c0 = arith.constant 0 : index
    %1 = arith.index_cast %0 : i32 to index
    %c0_0 = arith.constant 0 : index
    %c0_1 = arith.constant 0 : index
    %2 = vector.load %arg2[%c0, %1, %c0_0, %c0_1] : memref<1x16x16x128xbf16, #tpu.memory_space<vmem>>, vector<1x9x16x128xbf16>
    %3 = vector.shape_cast %2 : vector<1x9x16x128xbf16> to vector<9x16x128xbf16>
    %4 = vector.shape_cast %3 : vector<9x16x128xbf16> to vector<144x128xbf16>
    %c0_2 = arith.constant 0 : index
    %c0_3 = arith.constant 0 : index
    %5 = vector.load %arg4[%c0_2, %c0_3] : memref<128x32xbf16, #tpu.memory_space<vmem>>, vector<128x32xbf16>
    %cst = arith.constant dense<0.000000e+00> : vector<144x32xf32>
    %6 = tpu.matmul %4, %5, %cst {dimension_numbers = #tpu.dot_dimension_numbers<[1], [0], [0], [1], [0, 0, 1, 1], [], []>} : vector<144x128xbf16>, vector<128x32xbf16>, vector<144x32xf32> -> vector<144x32xf32>
    %c0_4 = arith.constant 0 : index
    %c0_5 = arith.constant 0 : index
    %7 = vector.load %arg5[%c0_4, %c0_5] : memref<1x32xf32, #tpu.memory_space<vmem>>, vector<1x32xf32>
    %8 = vector.broadcast %7 : vector<1x32xf32> to vector<144x32xf32>
    %9 = arith.addf %6, %8 : vector<144x32xf32>
    %cst_6 = arith.constant 0.000000e+00 : f32
    %10 = vector.broadcast %cst_6 : f32 to vector<144x32xf32>
    %11 = arith.maximumf %9, %10 : vector<144x32xf32>
    %12 = arith.truncf %11 : vector<144x32xf32> to vector<144x32xbf16>
    %13 = vector.shape_cast %12 : vector<144x32xbf16> to vector<9x16x32xbf16>
    %14 = vector.extract_strided_slice %13 {offsets = [0, 0, 0], sizes = [9, 14, 32], strides = [1, 1, 1]} : vector<9x16x32xbf16> to vector<9x14x32xbf16>
    %15 = vector.shape_cast %14 : vector<9x14x32xbf16> to vector<126x32xbf16>
    %16 = vector.extract_strided_slice %13 {offsets = [0, 1, 0], sizes = [9, 14, 32], strides = [1, 1, 1]} : vector<9x16x32xbf16> to vector<9x14x32xbf16>
    %17 = vector.shape_cast %16 : vector<9x14x32xbf16> to vector<126x32xbf16>
    %18 = vector.extract_strided_slice %13 {offsets = [0, 2, 0], sizes = [9, 14, 32], strides = [1, 1, 1]} : vector<9x16x32xbf16> to vector<9x14x32xbf16>
    %19 = vector.shape_cast %18 : vector<9x14x32xbf16> to vector<126x32xbf16>
    %20 = vector.extract_strided_slice %15 {offsets = [0, 0], sizes = [98, 32], strides = [1, 1]} : vector<126x32xbf16> to vector<98x32xbf16>
    %c0_7 = arith.constant 0 : index
    %c0_8 = arith.constant 0 : index
    %c0_9 = arith.constant 0 : index
    %c0_10 = arith.constant 0 : index
    %21 = vector.load %arg6[%c0_7, %c0_8, %c0_9, %c0_10] : memref<3x3x32x32xbf16, #tpu.memory_space<vmem>>, vector<1x1x32x32xbf16>
    %22 = vector.shape_cast %21 : vector<1x1x32x32xbf16> to vector<32x32xbf16>
    %cst_11 = arith.constant dense<0.000000e+00> : vector<98x32xf32>
    %23 = tpu.matmul %20, %22, %cst_11 {dimension_numbers = #tpu.dot_dimension_numbers<[1], [0], [0], [1], [0, 0, 1, 1], [], []>} : vector<98x32xbf16>, vector<32x32xbf16>, vector<98x32xf32> -> vector<98x32xf32>
    %24 = vector.extract_strided_slice %17 {offsets = [0, 0], sizes = [98, 32], strides = [1, 1]} : vector<126x32xbf16> to vector<98x32xbf16>
    %c0_12 = arith.constant 0 : index
    %c1 = arith.constant 1 : index
    %c0_13 = arith.constant 0 : index
    %c0_14 = arith.constant 0 : index
    %25 = vector.load %arg6[%c0_12, %c1, %c0_13, %c0_14] : memref<3x3x32x32xbf16, #tpu.memory_space<vmem>>, vector<1x1x32x32xbf16>
    %26 = vector.shape_cast %25 : vector<1x1x32x32xbf16> to vector<32x32xbf16>
    %cst_15 = arith.constant dense<0.000000e+00> : vector<98x32xf32>
    %27 = tpu.matmul %24, %26, %cst_15 {dimension_numbers = #tpu.dot_dimension_numbers<[1], [0], [0], [1], [0, 0, 1, 1], [], []>} : vector<98x32xbf16>, vector<32x32xbf16>, vector<98x32xf32> -> vector<98x32xf32>
    %28 = arith.addf %23, %27 : vector<98x32xf32>
    %29 = vector.extract_strided_slice %19 {offsets = [0, 0], sizes = [98, 32], strides = [1, 1]} : vector<126x32xbf16> to vector<98x32xbf16>
    %c0_16 = arith.constant 0 : index
    %c2 = arith.constant 2 : index
    %c0_17 = arith.constant 0 : index
    %c0_18 = arith.constant 0 : index
    %30 = vector.load %arg6[%c0_16, %c2, %c0_17, %c0_18] : memref<3x3x32x32xbf16, #tpu.memory_space<vmem>>, vector<1x1x32x32xbf16>
    %31 = vector.shape_cast %30 : vector<1x1x32x32xbf16> to vector<32x32xbf16>
    %cst_19 = arith.constant dense<0.000000e+00> : vector<98x32xf32>
    %32 = tpu.matmul %29, %31, %cst_19 {dimension_numbers = #tpu.dot_dimension_numbers<[1], [0], [0], [1], [0, 0, 1, 1], [], []>} : vector<98x32xbf16>, vector<32x32xbf16>, vector<98x32xf32> -> vector<98x32xf32>
    %33 = arith.addf %28, %32 : vector<98x32xf32>
    %34 = vector.extract_strided_slice %15 {offsets = [14, 0], sizes = [98, 32], strides = [1, 1]} : vector<126x32xbf16> to vector<98x32xbf16>
    %c1_20 = arith.constant 1 : index
    %c0_21 = arith.constant 0 : index
    %c0_22 = arith.constant 0 : index
    %c0_23 = arith.constant 0 : index
    %35 = vector.load %arg6[%c1_20, %c0_21, %c0_22, %c0_23] : memref<3x3x32x32xbf16, #tpu.memory_space<vmem>>, vector<1x1x32x32xbf16>
    %36 = vector.shape_cast %35 : vector<1x1x32x32xbf16> to vector<32x32xbf16>
    %cst_24 = arith.constant dense<0.000000e+00> : vector<98x32xf32>
    %37 = tpu.matmul %34, %36, %cst_24 {dimension_numbers = #tpu.dot_dimension_numbers<[1], [0], [0], [1], [0, 0, 1, 1], [], []>} : vector<98x32xbf16>, vector<32x32xbf16>, vector<98x32xf32> -> vector<98x32xf32>
    %38 = arith.addf %33, %37 : vector<98x32xf32>
    %39 = vector.extract_strided_slice %17 {offsets = [14, 0], sizes = [98, 32], strides = [1, 1]} : vector<126x32xbf16> to vector<98x32xbf16>
    %c1_25 = arith.constant 1 : index
    %c1_26 = arith.constant 1 : index
    %c0_27 = arith.constant 0 : index
    %c0_28 = arith.constant 0 : index
    %40 = vector.load %arg6[%c1_25, %c1_26, %c0_27, %c0_28] : memref<3x3x32x32xbf16, #tpu.memory_space<vmem>>, vector<1x1x32x32xbf16>
    %41 = vector.shape_cast %40 : vector<1x1x32x32xbf16> to vector<32x32xbf16>
    %cst_29 = arith.constant dense<0.000000e+00> : vector<98x32xf32>
    %42 = tpu.matmul %39, %41, %cst_29 {dimension_numbers = #tpu.dot_dimension_numbers<[1], [0], [0], [1], [0, 0, 1, 1], [], []>} : vector<98x32xbf16>, vector<32x32xbf16>, vector<98x32xf32> -> vector<98x32xf32>
    %43 = arith.addf %38, %42 : vector<98x32xf32>
    %44 = vector.extract_strided_slice %19 {offsets = [14, 0], sizes = [98, 32], strides = [1, 1]} : vector<126x32xbf16> to vector<98x32xbf16>
    %c1_30 = arith.constant 1 : index
    %c2_31 = arith.constant 2 : index
    %c0_32 = arith.constant 0 : index
    %c0_33 = arith.constant 0 : index
    %45 = vector.load %arg6[%c1_30, %c2_31, %c0_32, %c0_33] : memref<3x3x32x32xbf16, #tpu.memory_space<vmem>>, vector<1x1x32x32xbf16>
    %46 = vector.shape_cast %45 : vector<1x1x32x32xbf16> to vector<32x32xbf16>
    %cst_34 = arith.constant dense<0.000000e+00> : vector<98x32xf32>
    %47 = tpu.matmul %44, %46, %cst_34 {dimension_numbers = #tpu.dot_dimension_numbers<[1], [0], [0], [1], [0, 0, 1, 1], [], []>} : vector<98x32xbf16>, vector<32x32xbf16>, vector<98x32xf32> -> vector<98x32xf32>
    %48 = arith.addf %43, %47 : vector<98x32xf32>
    %49 = vector.extract_strided_slice %15 {offsets = [28, 0], sizes = [98, 32], strides = [1, 1]} : vector<126x32xbf16> to vector<98x32xbf16>
    %c2_35 = arith.constant 2 : index
    %c0_36 = arith.constant 0 : index
    %c0_37 = arith.constant 0 : index
    %c0_38 = arith.constant 0 : index
    %50 = vector.load %arg6[%c2_35, %c0_36, %c0_37, %c0_38] : memref<3x3x32x32xbf16, #tpu.memory_space<vmem>>, vector<1x1x32x32xbf16>
    %51 = vector.shape_cast %50 : vector<1x1x32x32xbf16> to vector<32x32xbf16>
    %cst_39 = arith.constant dense<0.000000e+00> : vector<98x32xf32>
    %52 = tpu.matmul %49, %51, %cst_39 {dimension_numbers = #tpu.dot_dimension_numbers<[1], [0], [0], [1], [0, 0, 1, 1], [], []>} : vector<98x32xbf16>, vector<32x32xbf16>, vector<98x32xf32> -> vector<98x32xf32>
    %53 = arith.addf %48, %52 : vector<98x32xf32>
    %54 = vector.extract_strided_slice %17 {offsets = [28, 0], sizes = [98, 32], strides = [1, 1]} : vector<126x32xbf16> to vector<98x32xbf16>
    %c2_40 = arith.constant 2 : index
    %c1_41 = arith.constant 1 : index
    %c0_42 = arith.constant 0 : index
    %c0_43 = arith.constant 0 : index
    %55 = vector.load %arg6[%c2_40, %c1_41, %c0_42, %c0_43] : memref<3x3x32x32xbf16, #tpu.memory_space<vmem>>, vector<1x1x32x32xbf16>
    %56 = vector.shape_cast %55 : vector<1x1x32x32xbf16> to vector<32x32xbf16>
    %cst_44 = arith.constant dense<0.000000e+00> : vector<98x32xf32>
    %57 = tpu.matmul %54, %56, %cst_44 {dimension_numbers = #tpu.dot_dimension_numbers<[1], [0], [0], [1], [0, 0, 1, 1], [], []>} : vector<98x32xbf16>, vector<32x32xbf16>, vector<98x32xf32> -> vector<98x32xf32>
    %58 = arith.addf %53, %57 : vector<98x32xf32>
    %59 = vector.extract_strided_slice %19 {offsets = [28, 0], sizes = [98, 32], strides = [1, 1]} : vector<126x32xbf16> to vector<98x32xbf16>
    %c2_45 = arith.constant 2 : index
    %c2_46 = arith.constant 2 : index
    %c0_47 = arith.constant 0 : index
    %c0_48 = arith.constant 0 : index
    %60 = vector.load %arg6[%c2_45, %c2_46, %c0_47, %c0_48] : memref<3x3x32x32xbf16, #tpu.memory_space<vmem>>, vector<1x1x32x32xbf16>
    %61 = vector.shape_cast %60 : vector<1x1x32x32xbf16> to vector<32x32xbf16>
    %cst_49 = arith.constant dense<0.000000e+00> : vector<98x32xf32>
    %62 = tpu.matmul %59, %61, %cst_49 {dimension_numbers = #tpu.dot_dimension_numbers<[1], [0], [0], [1], [0, 0, 1, 1], [], []>} : vector<98x32xbf16>, vector<32x32xbf16>, vector<98x32xf32> -> vector<98x32xf32>
    %63 = arith.addf %58, %62 : vector<98x32xf32>
    %c0_50 = arith.constant 0 : index
    %c0_51 = arith.constant 0 : index
    %64 = vector.load %arg7[%c0_50, %c0_51] : memref<1x32xf32, #tpu.memory_space<vmem>>, vector<1x32xf32>
    %65 = vector.broadcast %64 : vector<1x32xf32> to vector<98x32xf32>
    %66 = arith.addf %63, %65 : vector<98x32xf32>
    %cst_52 = arith.constant 0.000000e+00 : f32
    %67 = vector.broadcast %cst_52 : f32 to vector<98x32xf32>
    %68 = arith.maximumf %66, %67 : vector<98x32xf32>
    %69 = arith.truncf %68 : vector<98x32xf32> to vector<98x32xbf16>
    %c0_53 = arith.constant 0 : index
    %c0_54 = arith.constant 0 : index
    %70 = vector.load %arg8[%c0_53, %c0_54] : memref<32x128xbf16, #tpu.memory_space<vmem>>, vector<32x128xbf16>
    %cst_55 = arith.constant dense<0.000000e+00> : vector<98x128xf32>
    %71 = tpu.matmul %69, %70, %cst_55 {dimension_numbers = #tpu.dot_dimension_numbers<[1], [0], [0], [1], [0, 0, 1, 1], [], []>} : vector<98x32xbf16>, vector<32x128xbf16>, vector<98x128xf32> -> vector<98x128xf32>
    %c0_56 = arith.constant 0 : index
    %c0_57 = arith.constant 0 : index
    %72 = vector.load %arg9[%c0_56, %c0_57] : memref<1x128xf32, #tpu.memory_space<vmem>>, vector<1x128xf32>
    %73 = vector.broadcast %72 : vector<1x128xf32> to vector<98x128xf32>
    %74 = arith.addf %71, %73 : vector<98x128xf32>
    %75 = vector.shape_cast %74 : vector<98x128xf32> to vector<7x14x128xf32>
    %c0_58 = arith.constant 0 : index
    %c0_59 = arith.constant 0 : index
    %c0_60 = arith.constant 0 : index
    %c0_61 = arith.constant 0 : index
    %76 = vector.load %arg3[%c0_58, %c0_59, %c0_60, %c0_61] : memref<1x7x14x128xf32, #tpu.memory_space<vmem>>, vector<1x7x14x128xf32>
    %77 = vector.shape_cast %76 : vector<1x7x14x128xf32> to vector<7x14x128xf32>
    %78 = arith.addf %75, %77 : vector<7x14x128xf32>
    %cst_62 = arith.constant 0.000000e+00 : f32
    %79 = vector.broadcast %cst_62 : f32 to vector<7x14x128xf32>
    %80 = arith.maximumf %78, %79 : vector<7x14x128xf32>
    %c0_63 = arith.constant 0 : index
    %c0_64 = arith.constant 0 : index
    %c0_65 = arith.constant 0 : index
    %c0_66 = arith.constant 0 : index
    %81 = vector.load %arg10[%c0_63, %c0_64, %c0_65, %c0_66] : memref<1x7x14x128xf32, #tpu.memory_space<vmem>>, vector<1x7x14x128xf32>
    %82 = vector.shape_cast %81 : vector<1x7x14x128xf32> to vector<7x14x128xf32>
    %83 = vector.shape_cast %80 : vector<7x14x128xf32> to vector<1x7x14x128xf32>
    tpu.vector_store %arg10[%c0_63, %c0_64, %c0_65, %c0_66], %83 {strides = array<i32>} : memref<1x7x14x128xf32, #tpu.memory_space<vmem>>, vector<1x7x14x128xf32>,
    return
  }
  func.func @transform_0(%arg0: i32, %arg1: i32) -> (i32, i32, i32, i32) {
    %c0_i32 = arith.constant 0 : i32
    %c0_i32_0 = arith.constant 0 : i32
    %c0_i32_1 = arith.constant 0 : i32
    %c0_i32_2 = arith.constant 0 : i32
    return %arg0, %c0_i32, %c0_i32_0, %c0_i32_1 : i32, i32, i32, i32
  }
  func.func @transform_1(%arg0: i32, %arg1: i32) -> (i32, i32, i32, i32) {
    %c0_i32 = arith.constant 0 : i32
    %c0_i32_0 = arith.constant 0 : i32
    %c0_i32_1 = arith.constant 0 : i32
    return %arg0, %arg1, %c0_i32, %c0_i32_0 : i32, i32, i32, i32
  }
  func.func @transform_2(%arg0: i32, %arg1: i32) -> (i32, i32) {
    %c0_i32 = arith.constant 0 : i32
    %c0_i32_0 = arith.constant 0 : i32
    %c0_i32_1 = arith.constant 0 : i32
    return %c0_i32, %c0_i32_0 : i32, i32
  }
  func.func @transform_3(%arg0: i32, %arg1: i32) -> (i32, i32) {
    %c0_i32 = arith.constant 0 : i32
    %c0_i32_0 = arith.constant 0 : i32
    %c0_i32_1 = arith.constant 0 : i32
    return %c0_i32, %c0_i32_0 : i32, i32
  }
  func.func @transform_4(%arg0: i32, %arg1: i32) -> (i32, i32, i32, i32) {
    %c0_i32 = arith.constant 0 : i32
    %c0_i32_0 = arith.constant 0 : i32
    %c0_i32_1 = arith.constant 0 : i32
    %c0_i32_2 = arith.constant 0 : i32
    %c0_i32_3 = arith.constant 0 : i32
    return %c0_i32, %c0_i32_0, %c0_i32_1, %c0_i32_2 : i32, i32, i32, i32
  }
  func.func @transform_5(%arg0: i32, %arg1: i32) -> (i32, i32) {
    %c0_i32 = arith.constant 0 : i32
    %c0_i32_0 = arith.constant 0 : i32
    %c0_i32_1 = arith.constant 0 : i32
    return %c0_i32, %c0_i32_0 : i32, i32
  }
  func.func @transform_6(%arg0: i32, %arg1: i32) -> (i32, i32) {
    %c0_i32 = arith.constant 0 : i32
    %c0_i32_0 = arith.constant 0 : i32
    %c0_i32_1 = arith.constant 0 : i32
    return %c0_i32, %c0_i32_0 : i32, i32
  }
  func.func @transform_7(%arg0: i32, %arg1: i32) -> (i32, i32) {
    %c0_i32 = arith.constant 0 : i32
    %c0_i32_0 = arith.constant 0 : i32
    %c0_i32_1 = arith.constant 0 : i32
    return %c0_i32, %c0_i32_0 : i32, i32
  }
  func.func @transform_8(%arg0: i32, %arg1: i32) -> (i32, i32, i32, i32) {
    %c0_i32 = arith.constant 0 : i32
    %c0_i32_0 = arith.constant 0 : i32
    %c0_i32_1 = arith.constant 0 : i32
    return %arg0, %arg1, %c0_i32, %c0_i32_0 : i32, i32, i32, i32
  }
}

</mosaic_0001>

<bundles_post_ra>
// kernel: tpu_custom_call.1
= control target key start
LH: loop header
LB: loop body
LE: loop exit
PB: predicated region body
PF: predicated region fallthrough
CT: control target
= control target key end

     0   :  { %s7045_s27 = smov 0   ;;  %s7047_s28 = smov 0   ;;  %s9822_s0 = inlined_call_operand.vmem [shape: bf16[2,16,16,128], index: 0, kind: input, shape index: {}]   ;;  %s9823_s1 = inlined_call_operand.vmem [shape: f32[2,14,14,128], index: 1, kind: input, shape index: {}]   ;;  %s9824_s2 = inlined_call_operand.vmem [shape: bf16[128,32], index: 2, kind: input, shape index: {}]   ;;  %s9825_s3 = inlined_call_operand.vmem [shape: f32[1,32], index: 3, kind: input, shape index: {}]   ;;  %s9826_s4 = inlined_call_operand.vmem [shape: bf16[3,3,32,32], index: 4, kind: input, shape index: {}]   ;;  %s9827_s5 = inlined_call_operand.vmem [shape: f32[1,32], index: 5, kind: input, shape index: {}]   ;;  %s9828_s6 = inlined_call_operand.vmem [shape: bf16[32,128], index: 6, kind: input, shape index: {}]   ;;  %s9829_s7 = inlined_call_operand.vmem [shape: f32[1,128], index: 7, kind: input, shape index: {}]   ;;  %s9830_s8 = inlined_call_operand.vmem [shape: f32[2,14,14,128], index: 8, kind: output, shape index: {}]  }
   0x1   :  { %s7049_s29 = smov 0   ;;  %s7051_s30 = smov 0  }
   0x2   :  { %s7053_s9 = smov 0  }
   0x3 LB: > { %s27_s10 = sadd.s32 1, %s6986_s29  ;;  %s30_s11 = sadd.s32 1, %s6990_s30  ;;  %s6994_s9 = sphi %s7053_s9, %s18_s9   ;;  %s6990_s30 = sphi %s7051_s30, %s10205_s30   ;;  %s6986_s29 = sphi %s7049_s29, %s10204_s29   ;;  %s6982_s28 = sphi %s7047_s28, %s10203_s28   ;;  %s6978_s27 = sphi %s7045_s27, %s10202_s27  }
   0x4   : > { %p28_p0 = scmp.ge.s32.totalorder %s27_s10, 2  ;;  %p6133_p1 = scmp.ge.s32.totalorder %s6994_s9, 1 }
   0x5   : > { %p294_p2 = scmp.lt.s32.totalorder %s6994_s9, 5 }
   0x6   : > { %s10207_s10 = smov (%p28_p0, %s27_s10), 0  ;;  %s10209_s11 = smov (!%p28_p0, %s30_s11), %s6990_s30 }
   0x7   : > { %p295_p3 = pnand %p6133_p1, %p294_p2  ;;  %p32_p4 = scmp.ge.s32.totalorder %s10209_s11, 2 }
   0x9   : > { %s10211_s11 = smov (%p32_p4, %s10209_s11), 0  ;;  %298 = sbr.rel (%p295_p3) target bundleno = 1083 (0x43b), region = 52 }
  0x10   : > { %v6904_v0 = vld [vmem:[%s9824_s2] sm:$0xff]   ;;  %v9831_v1 = vmov 0.0   ;;  %v6905_v2 = vld [vmem:[%s9824_s2 + $0x8] sm:$0xff]   ;;  %vm6997_vm0 = vmmov 0   ;;  %p343_p5 = scmp.lt.s32.totalorder %s6982_s28, 1  ;;  %s6375_s16 = smul.u32 56, %s6978_s27  ;;  %v663_v22 = vlaneseq }
  0x11   : > { %6483 = vmatprep.subr.bf16.mxu0 %v9831_v1  ;;  %6855 = vmatprep.subr.bf16.mxu1 %v9831_v1  ;;  %v6906_v3 = vld [vmem:[%s9824_s2 + $0x10] sm:$0xff]   ;;  %v6907_v4 = vld [vmem:[%s9824_s2 + $0x18] sm:$0xff]   ;;  %v6908_v5 = vld [vmem:[%s9824_s2 + $0x20] sm:$0xff]   ;;  %vm1100_vm1 = vsmask.f32 256  ;;  %s348_s20 = smul.u32 7, %s6978_s27 }
  0x12   : > { %6484 = vmatpush3.bf16.msra.mxu0 %v6904_v0  ;;  %6499 = vmatprep.mubr.msk.bf16.mxu0 %vm6997_vm0, %v9831_v1  ;;  %s10213_s28 = smov (!%p343_p5, %s6982_s28), 1  ;;  %v6909_v6 = vld [vmem:[%s9824_s2 + $0x28] sm:$0xff]   ;;  %v6910_v7 = vld [vmem:[%s9824_s2 + $0x30] sm:$0xff]   ;;  %v6911_v8 = vld [vmem:[%s9824_s2 + $0x38] sm:$0xff]   ;;  %vm1101_vm2 = vsmask.f32 1284 }
  0x13   : > { %6485 = vmatprep.subr.bf16.mxu0 %v9831_v1  ;;  %6543 = vmatprep.mubr.msk.bf16.mxu1 %vm6997_vm0, %v9831_v1  ;;  %s6374_s19 = sshll.u32 %s10213_s28, 7  ;;  %v6921_v18 = vld [vmem:[%s9826_s4 + $0x10] sm:$0xff]   ;;  %v6922_v19 = vld [vmem:[%s9826_s4 + $0x18] sm:$0xff]   ;;  %v6998_v20 = vmov 1966171168   ;;  %vm1102_vm3 = vmor %vm1100_vm1, %vm1101_vm2  ;;  %v7167_v28 = vshrl.u32 %v663_v22, 7 }
  0x14   : > { %s347_s22 = scalar_lea.vmem %s9822_s0, %s6374_s19  ;;  %6857 = vmatpush3.bf16.msra.mxu1 %v6921_v18  ;;  %v661_v21 = vunpack.c.l.s4 %v6998_v20  ;;  %v7164_v23 = vld [vmem:[%s9825_s3] ss:$0 sm:$0xff]  ;;  %vm1103_vm4 = vsmask.f32 2312  ;;  %vm1105_vm6 = vsmask.f32 3340 }
  0x15   : > { %s7101_s23 = scalar_lea.vmem %s347_s22, %s6375_s16  ;;  %6856 = vmatprep.subr.bf16.mxu1 %v9831_v1  ;;  %9955 = vst [vmem:[#allocation2_spill] sm:$0xff] %v7167_v28  ;;  %vm1104_vm5 = vmor %vm1102_vm3, %vm1103_vm4  ;;  %vm1107_vm8 = vsmask.f32 4368  ;;  %vm1109_vm10 = vsmask.f32 5396  ;;  %vm1957_vm1 = vcmask 261120  }
  0x16   : > { %6486 = vmatpush3.bf16.msra.mxu0 %v6905_v2  ;;  %v6912_v9 = vld [vmem:[%s7101_s23] sm:$0xff]   ;;  %v6913_v10 = vld [vmem:[%s7101_s23 + $0x8] sm:$0xff]   ;;  %v6914_v11 = vld [vmem:[%s7101_s23 + $0x10] sm:$0xff]   ;;  %v662_v27 = vunpack.c.0.s8 %v661_v21  ;;  %vm1111_vm12 = vsmask.f32 6424  ;;  %p351_p6 = scmp.lt.s32.totalorder %s348_s20, 13 }
  0x17   : > { %6487 = vmatprep.subr.bf16.mxu0 %v9831_v1  ;;  %v6915_v12 = vld [vmem:[%s7101_s23 + $0x18] sm:$0xff]   ;;  %v6916_v13 = vld [vmem:[%s7101_s23 + $0x20] sm:$0xff]   ;;  %v6917_v14 = vld [vmem:[%s7101_s23 + $0x28] sm:$0xff]   ;;  %vm1113_vm14 = vsmask.f32 7452  ;;  %s6859_s21 = smul.u32 28, %s10213_s28 }
  0x18   : > { %v6918_v15 = vld [vmem:[%s7101_s23 + $0x30] sm:$0xff]   ;;  %v6919_v16 = vld [vmem:[%s7101_s23 + $0x38] sm:$0xff]   ;;  %v6920_v17 = vld [vmem:[%s7101_s23 + $0x40] sm:$0xff]   ;;  %6858 = vmatpush3.bf16.msra.mxu1 %v6922_v19  ;;  %v7171_v34 = vsub.s32 %v662_v27, %v7167_v28  ;;  %s10215_s20 = smov (!%p351_p6, %s348_s20), 13 }
  0x19   : > { %6567 = vmatprep.subr.bf16.mxu1 %v9831_v1  ;;  %vm1106_vm7 = vmor %vm1104_vm5, %vm1105_vm6  ;;  %s6136_s22 = sshll.u32 %s10215_s20, 1 }
  0x1a   : > { %6488 = vmatpush3.bf16.msra.mxu0 %v6906_v3  ;;  %vm1108_vm9 = vmor %vm1106_vm7, %vm1107_vm8  ;;  %s9466_s23 = sadd.s32 %s6859_s21, %s6136_s22 }
  0x1b   : > { %6489 = vmatprep.subr.bf16.mxu0 %v9831_v1  ;;  %vm1110_vm11 = vmor %vm1108_vm9, %vm1109_vm10  ;;  %s6137_s24 = sshll.u32 %s9466_s23, 3 }
  0x1c   : > { %vm1112_vm13 = vmor %vm1110_vm11, %vm1111_vm12  ;;  %s9474_s12 = scalar_lea.vmem %s9823_s1, %s6137_s24  ;;  %s9665_s15 = scalar_lea.vmem %s9830_s8, %s6137_s24 }
  0x1d   : > { %vm7200_vm15 = vmor %vm1112_vm13, %vm1113_vm14 }
  0x1e   : > { %6490 = vmatpush3.bf16.msra.mxu0 %v6907_v4 }
  0x1f   : > { %6491 = vmatprep.subr.bf16.mxu0 %v9831_v1 }
  0x22   : > { %6492 = vmatpush3.bf16.msra.mxu0 %v6908_v5 }
  0x23   : > { %6493 = vmatprep.subr.bf16.mxu0 %v9831_v1 }
  0x26   : > { %6494 = vmatpush3.bf16.msra.mxu0 %v6909_v6 }
  0x27   : > { %6495 = vmatprep.subr.bf16.mxu0 %v9831_v1 }
  0x2a   : > { %6496 = vmatpush3.bf16.msra.mxu0 %v6910_v7 }
  0x2b   : > { %6497 = vmatprep.subr.bf16.mxu0 %v9831_v1 }
  0x2e   : > { %6498 = vmatpush3.bf16.msra.mxu0 %v6911_v8 }
  0x2f   : > { %6535 = vmatprep.subr.bf16.mxu0 %v9831_v1 }
  0x31   : > { %6500 = vmatmul.mubr.bf16.vlgmr.msra.gmra.mrb[0].mxu0 %v6912_v9 }
  0x32   : > { %6503 = vmatprep.mubr.msk.bf16.mxu0 %vm6997_vm0, %v9831_v1  ;;  %6536 = vmatpush3.bf16.msra.mxu0 %v6921_v18 }
  0x33   : > { %6537 = vmatprep.subr.bf16.mxu0 %v9831_v1 }
  0x36   : > { %6538 = vmatpush3.bf16.msra.mxu0 %v6922_v19 }
  0x37   : > { %6599 = vmatprep.subr.bf16.mxu0 %v9831_v1 }
  0x39   : > { %6504 = vmatmul.mubr.bf16.gmra.mrb[4].mxu0 %v6913_v10 }
  0x3a   : > { %6507 = vmatprep.mubr.msk.bf16.mxu0 %vm6997_vm0, %v9831_v1 }
  0x41   : > { %6508 = vmatmul.mubr.bf16.gmra.mrb[8].mxu0 %v6914_v11 }
  0x42   : > { %6511 = vmatprep.mubr.msk.bf16.mxu0 %vm6997_vm0, %v9831_v1 }
  0x49   : > { %6512 = vmatmul.mubr.bf16.gmra.mrb[12].mxu0 %v6915_v12 }
  0x4a   : > { %6515 = vmatprep.mubr.msk.bf16.mxu0 %vm6997_vm0, %v9831_v1 }
  0x51   : > { %6516 = vmatmul.mubr.bf16.gmra.mrb[16].mxu0 %v6916_v13 }
  0x52   : > { %6519 = vmatprep.mubr.msk.bf16.mxu0 %vm6997_vm0, %v9831_v1 }
  0x59   : > { %6520 = vmatmul.mubr.bf16.gmra.mrb[20].mxu0 %v6917_v14 }
  0x5a   : > { %6523 = vmatprep.mubr.msk.bf16.mxu0 %vm6997_vm0, %v9831_v1 }
  0x61   : > { %6524 = vmatmul.mubr.bf16.gmra.mrb[24].mxu0 %v6918_v15 }
  0x62   : > { %6527 = vmatprep.mubr.msk.bf16.mxu0 %vm6997_vm0, %v9831_v1 }
  0x69   : > { %6528 = vmatmul.mubr.bf16.gmra.mrb[28].mxu0 %v6919_v16 }
  0x6a   : > { %6531 = vmatprep.mubr.msk.bf16.mxu0 %vm6997_vm0, %v9831_v1 }
  0x71   : > { %6532 = vmatmul.mubr.bf16.gmra.mrb[32].mxu0 %v6920_v17 }
  0x72   : > { %6539 = vmatprep.mubr.msk.bf16.mxu0 %vm6997_vm0, %v9831_v1 }
 0x104   : > { %v552_v24 = vpop.f32.mrb[0].mxu0 }
 0x105   : > { %v553_v25 = vadd.f32 %v7164_v23, %v552_v24  ;;  %v6501_v26 = vpop.f32.mrb[1].mxu0 }
 0x106   : > { %v555_v29 = vpop.f32.mrb[2].mxu0 }
 0x107   : > { %v556_v30 = vadd.f32 %v7164_v23, %v555_v29  ;;  %v6502_v31 = vpop.f32.mrb[3].mxu0  ;;  %v623_v32 = vmax.f32 %v553_v25, 0.0 }
 0x109   : > { %v624_v33 = vmax.f32 %v556_v30, 0.0 }
 0x10b   : > { %v641_v35 = vpack.c.bf16 %v624_v33, %v623_v32  ;;  %v6160_v36 = vpack.c.bf16 %v624_v33, %v624_v33 }
 0x10c   : > { %v560_v37 = vpop.f32.mrb[4].mxu0 }
 0x10d   : > { %v666_v38 = vrot.slane %v641_v35, %v7171_v34  ;;  %v673_v39 = vrot.slane %v6160_v36, %v7171_v34  ;;  %v6505_v40 = vpop.f32.mrb[5].mxu0  ;;  %v561_v49 = vadd.f32 %v7164_v23, %v560_v37 }
 0x10e   : > { %v563_v41 = vpop.f32.mrb[6].mxu0 }
 0x10f   : > { %v674_v42 = vcombine.high %v666_v38, %v666_v38  ;;  %v675_v43 = vcombine.high %v673_v39, %v673_v39  ;;  %v682_v44 = vrot.slane %v666_v38, %v7171_v34  ;;  %v6506_v45 = vpop.f32.mrb[7].mxu0  ;;  %v7177_v46 = vrot.slane %v673_v39, %v7171_v34 }
 0x110   : > { %v564_v50 = vadd.f32 %v7164_v23, %v563_v41  ;;  %v625_v3 = vmax.f32 %v561_v49, 0.0 }
 0x111   : > { %v7180_v47 = vrot.slane %v674_v42, %v7171_v34  ;;  %v7182_v48 = vcombine.high %v682_v44, %v682_v44  ;;  %v7187_v51 = vrot.slane %v675_v43, %v7171_v34  ;;  %v7195_v53 = vcombine.high %v7177_v46, %v7177_v46 }
 0x112   : > { %v1145_v56 = vshll.u32 %v7177_v46, 16  ;;  %v1116_v0 = vshrl.u32 %v682_v44, 16  ;;  %v1148_v2 = vshrl.u32 %v7177_v46, 16  ;;  %v626_v4 = vmax.f32 %v564_v50, 0.0 }
 0x113   : > { %v7191_v52 = vcombine.high %v7180_v47, %v7180_v47  ;;  %v1121_v54 = vshll.u32 %v7180_v47, 16  ;;  %v1124_v55 = vshrl.u32 %v7180_v47, 16  ;;  %v1129_v59 = vshll.u32 %v7182_v48, 16 }
 0x114   : > { %v568_v57 = vpop.f32.mrb[8].mxu0  ;;  %v1132_v60 = vshrl.u32 %v7182_v48, 16  ;;  %v1153_v8 = vshll.u32 %v7187_v51, 16  ;;  %v1156_v9 = vshrl.u32 %v7187_v51, 16  ;;  %v2067_v13 = vcombine.low %v682_v44, %v7180_v47 }
 0x115   : > { %v1137_v61 = vshll.u32 %v7191_v52, 16  ;;  %v1140_v62 = vshrl.u32 %v7191_v52, 16  ;;  %v6509_v63 = vpop.f32.mrb[9].mxu0  ;;  %v1123_v11 = vsel %vm7200_vm15, %v1116_v0, %v1121_v54  ;;  %v6245_v14 = vcombine.high %v682_v44, %v7180_v47 }
 0x116   : > { %v571_v5 = vpop.f32.mrb[10].mxu0  ;;  %v1131_v15 = vsel %vm7200_vm15, %v1124_v55, %v1129_v59  ;;  %v1161_v16 = vshll.u32 %v7195_v53, 16  ;;  %v2069_v17 = vcombine.low %v7177_v46, %v7187_v51  ;;  %v7227_v19 = vrot.slane %v2067_v13, %v7171_v34 }
 0x117   : > { %v1139_v6 = vsel %vm7200_vm15, %v1132_v60, %v1137_v61  ;;  %v1147_v7 = vsel %vm7200_vm15, %v1140_v62, %v1145_v56  ;;  %v6510_v10 = vpop.f32.mrb[11].mxu0  ;;  %v7230_v20 = vrot.slane %v6245_v14, %v7171_v34  ;;  %v642_v21 = vpack.c.bf16 %v626_v4, %v625_v3 }
 0x118   : > { %v1638_v12 = vcombine.low %v1139_v6, %v1147_v7  ;;  %v6161_v22 = vpack.c.bf16 %v626_v4, %v626_v4  ;;  %v7234_v24 = vcombine.high %v7187_v51, %v7187_v51  ;;  %v569_v25 = vadd.f32 %v7164_v23, %v568_v57 }
 0x119   : > { %v572_v26 = vadd.f32 %v7164_v23, %v571_v5  ;;  %v1155_v27 = vsel %vm7200_vm15, %v1148_v2, %v1153_v8  ;;  %v1637_v29 = vcombine.low %v1123_v11, %v1131_v15  ;;  %v714_v31 = vrot.slane %v642_v21, %v7171_v34 }
 0x11a   : > { %v721_v33 = vrot.slane %v6161_v22, %v7171_v34  ;;  %v627_v35 = vmax.f32 %v569_v25, 0.0  ;;  %v1163_v39 = vsel %vm7200_vm15, %v1156_v9, %v1161_v16  ;;  %v1654_v43 = vrot.slane %v1638_v12, %v7171_v34 }
 0x11b   : > { %v628_v36 = vmax.f32 %v572_v26, 0.0  ;;  %v722_v40 = vcombine.high %v714_v31, %v714_v31  ;;  %v7248_v41 = vrot.slane %v714_v31, %v7171_v34  ;;  %v1169_v44 = vshll.u32 %v7234_v24, 16 }
 0x11c   : > { %v576_v32 = vpop.f32.mrb[12].mxu0  ;;  %v1164_v54 = vshrl.u32 %v7195_v53, 16  ;;  %v1647_v55 = vrot.slane %v1637_v29, %v7171_v34  ;;  %v1639_v59 = vcombine.low %v1155_v27, %v1163_v39  ;;  %v723_v60 = vcombine.high %v721_v33, %v721_v33 }
 0x11d   : > { %v577_v37 = vadd.f32 %v7164_v23, %v576_v32  ;;  %v6513_v38 = vpop.f32.mrb[13].mxu0  ;;  %v643_v45 = vpack.c.bf16 %v628_v36, %v627_v35  ;;  %v7256_v56 = vrot.slane %v722_v40, %v7171_v34  ;;  %v6162_v57 = vpack.c.bf16 %v628_v36, %v628_v36 }
 0x11e   : > { %v579_v42 = vpop.f32.mrb[14].mxu0  ;;  %v2070_v61 = vcombine.low %v7195_v53, %v7248_v41  ;;  %v1173_v63 = vshrl.u32 %v7248_v41, 16  ;;  %v1669_v3 = vcombine.low %v1647_v55, %v1654_v43  ;;  %v1171_v4 = vsel %vm7200_vm15, %v1164_v54, %v1169_v44 }
 0x11f   : > { %v580_v49 = vadd.f32 %v7164_v23, %v579_v42  ;;  %v6514_v50 = vpop.f32.mrb[15].mxu0  ;;  %v629_v62 = vmax.f32 %v577_v37, 0.0  ;;  %v1178_v0 = vshll.u32 %v7256_v56, 16  ;;  %v762_v5 = vrot.slane %v643_v45, %v7171_v34 }
 0x120   : > { %v769_v7 = vrot.slane %v6162_v57, %v7171_v34  ;;  %v7271_v11 = vrot.slane %v2069_v17, %v7171_v34  ;;  %v7277_v15 = vrot.slane %v721_v33, %v7171_v34  ;;  %v7280_v16 = vrot.slane %v723_v60, %v7171_v34 }
 0x121   : > { %v630_v2 = vmax.f32 %v580_v49, 0.0  ;;  %v7267_v6 = vsel %vm7200_vm15, %v1173_v63, %v1178_v0  ;;  %v1661_v25 = vrot.slane %v1639_v59, %v7171_v34  ;;  %v770_v32 = vcombine.high %v762_v5, %v762_v5 }
 0x122   : > { %v1640_v13 = vcombine.low %v1171_v4, %v7267_v6  ;;  %9958 = vst [vmem:[#allocation3_spill] sm:$0xff] %v7277_v15  ;;  %9959 = vst [vmem:[#allocation4_spill] sm:$0xff] %v7280_v16  ;;  %v771_v33 = vcombine.high %v769_v7, %v769_v7  ;;  %v7289_v35 = vrot.slane %v762_v5, %v7171_v34 }
 0x123   : > { %v644_v8 = vpack.c.bf16 %v630_v2, %v629_v62  ;;  %v6163_v9 = vpack.c.bf16 %v630_v2, %v630_v2  ;;  %v7292_v36 = vrot.slane %v769_v7, %v7171_v34  ;;  %v7296_v40 = vcombine.high %v7256_v56, %v7256_v56  ;;  %v6923_v62 = vld [vmem:[%s9826_s4 + $0x20] sm:$0xff]  }
 0x124   : > { %v584_v10 = vpop.f32.mrb[16].mxu0  ;;  %v1668_v31 = vrot.slane %v1640_v13, %v7171_v34  ;;  %v7300_v42 = vcombine.high %v7248_v41, %v7248_v41  ;;  %v7304_v43 = vcombine.high %v7277_v15, %v7277_v15  ;;  %v7307_v44 = vrot.slane %v2070_v61, %v7171_v34 }
 0x125   : > { %v6517_v14 = vpop.f32.mrb[17].mxu0  ;;  %v810_v21 = vrot.slane %v644_v8, %v7171_v34  ;;  %v817_v17 = vrot.slane %v6163_v9, %v7171_v34  ;;  %v585_v26 = vadd.f32 %v7164_v23, %v584_v10  ;;  %9960 = vst [vmem:[#allocation5_spill] sm:$0xff] %v7292_v36  ;;  %9961 = vst [vmem:[#allocation6_spill] sm:$0xff] %v7296_v40  ;;  %v1230_v0 = vshrl.u32 %v7289_v35, 16 }
 0x126   : > { %v587_v22 = vpop.f32.mrb[18].mxu0  ;;  %v1670_v39 = vcombine.low %v1661_v25, %v1668_v31  ;;  %v1677_v45 = vrot.slane %v1669_v3, %v7171_v34  ;;  %v7312_v57 = vrot.slane %v770_v32, %v7171_v34  ;;  %v7315_v59 = vrot.slane %v771_v33, %v7171_v34 }
 0x127   : > { %v588_v27 = vadd.f32 %v7164_v23, %v587_v22  ;;  %v6518_v29 = vpop.f32.mrb[19].mxu0  ;;  %v631_v37 = vmax.f32 %v585_v26, 0.0  ;;  %v818_v49 = vcombine.high %v810_v21, %v810_v21  ;;  %v819_v50 = vcombine.high %v817_v17, %v817_v17 }
 0x128   : > { %v1684_v55 = vrot.slane %v1670_v39, %v7171_v34  ;;  %9962 = vst [vmem:[#allocation7_spill] sm:$0xff] %v7312_v57  ;;  %v7319_v60 = vcombine.high %v7289_v35, %v7289_v35  ;;  %v7323_v61 = vcombine.high %v7292_v36, %v7292_v36  ;;  %v1194_v5 = vshll.u32 %v7296_v40, 16 }
 0x129   : > { %v632_v38 = vmax.f32 %v588_v27, 0.0  ;;  %v7332_v7 = vrot.slane %v810_v21, %v7171_v34  ;;  %v7335_v8 = vrot.slane %v817_v17, %v7171_v34  ;;  %v7339_v10 = vcombine.high %v7280_v16, %v7280_v16  ;;  %v6924_v27 = vld [vmem:[%s9826_s4 + $0x28] sm:$0xff]  }
 0x12a   : > { %9963 = vst [vmem:[#allocation8_spill] sm:$0xff] %v7323_v61  ;;  %v1685_v2 = vcombine.low %v1677_v45, %v1684_v55  ;;  %v1197_v13 = vshrl.u32 %v7296_v40, 16  ;;  %v7343_v14 = vrot.slane %v818_v49, %v7171_v34  ;;  %v7346_v22 = vrot.slane %v819_v50, %v7171_v34 }
 0x12b   : > { %v645_v54 = vpack.c.bf16 %v632_v38, %v631_v37  ;;  %9964 = vst [vmem:[#allocation9_spill] sm:$0xff] %v7332_v7  ;;  %9965 = vst [vmem:[#allocation10_spill] sm:$0xff] %v7335_v8  ;;  %v1189_v25 = vshrl.u32 %v7300_v42, 16  ;;  %v1202_v17 = vshll.u32 %v7277_v15, 16  ;;  %v6164_v26 = vpack.c.bf16 %v632_v38, %v632_v38 }
 0x12c   : > { %v592_v63 = vpop.f32.mrb[20].mxu0  ;;  %9966 = vst [vmem:[#allocation11_spill] sm:$0xff] %v7339_v10  ;;  %9967 = vst [vmem:[#allocation12_spill] sm:$0xff] %v7343_v14  ;;  %6540 = vmatmul.mubr.msk.bf16.vlgmr.msra.gmra.mrb[36].mxu0 %vm1957_vm1, %v1685_v2  ;;  %v1181_v31 = vshrl.u32 %v7256_v56, 16  ;;  %v1186_v32 = vshll.u32 %v7300_v42, 16  ;;  %v1205_v49 = vshrl.u32 %v7277_v15, 16 }
 0x12d   : > { %v593_v3 = vadd.f32 %v7164_v23, %v592_v63  ;;  %v6521_v4 = vpop.f32.mrb[21].mxu0  ;;  %9968 = vst [vmem:[#allocation13_spill] sm:$0xff] %v7346_v22  ;;  %6600 = vmatpush3.bf16.msra.mxu0 %v6923_v62  ;;  %6603 = vmatprep.mubr.msk.bf16.mxu0 %vm6997_vm0, %v9831_v1  ;;  %v858_v33 = vrot.slane %v645_v54, %v7171_v34  ;;  %v1210_v50 = vshll.u32 %v7280_v16, 16  ;;  %v1213_v55 = vshrl.u32 %v7280_v16, 16 }
 0x12e   : > { %v595_v9 = vpop.f32.mrb[22].mxu0  ;;  %6601 = vmatprep.subr.bf16.mxu0 %v9831_v1  ;;  %v7363_v38 = vsel %vm7200_vm15, %v1189_v25, %v1194_v5  ;;  %v7367_v39 = vsel %vm7200_vm15, %v1197_v13, %v1202_v17  ;;  %v1218_v54 = vshll.u32 %v7304_v43, 16  ;;  %v1221_v62 = vshrl.u32 %v7304_v43, 16 }
 0x12f   : > { %v6522_v21 = vpop.f32.mrb[23].mxu0  ;;  %v596_v29 = vadd.f32 %v7164_v23, %v595_v9  ;;  %v633_v37 = vmax.f32 %v593_v3, 0.0  ;;  %v1226_v63 = vshll.u32 %v7339_v10, 16  ;;  %v1235_v2 = vshll.u32 %v7312_v57, 16 }
 0x130   : > { %v865_v3 = vrot.slane %v6164_v26, %v7171_v34  ;;  %v7379_v5 = vsel %vm7200_vm15, %v1181_v31, %v1186_v32  ;;  %v1238_v9 = vshrl.u32 %v7312_v57, 16  ;;  %v7384_v25 = vsel %vm7200_vm15, %v1205_v49, %v1210_v50 }
 0x131   : > { %v634_v45 = vmax.f32 %v596_v29, 0.0  ;;  %6602 = vmatpush3.bf16.msra.mxu0 %v6924_v27  ;;  %v7388_v17 = vsel %vm7200_vm15, %v1221_v62, %v1226_v63  ;;  %v1243_v26 = vshll.u32 %v7319_v60, 16  ;;  %v7394_v29 = vsel %vm7200_vm15, %v1213_v55, %v1218_v54 }
 0x132   : > { %6663 = vmatprep.subr.bf16.mxu0 %v9831_v1  ;;  %v7398_v31 = vsel %vm7200_vm15, %v1230_v0, %v1235_v2  ;;  %v1686_v32 = vcombine.low %v7379_v5, %v7363_v38  ;;  %v1688_v50 = vcombine.low %v7394_v29, %v7388_v17  ;;  %v7416_v62 = vcombine.high %v7332_v7, %v7332_v7 }
 0x133   : > { %v646_v4 = vpack.c.bf16 %v634_v45, %v633_v37  ;;  %v6165_v21 = vpack.c.bf16 %v634_v45, %v634_v45  ;;  %v1687_v37 = vcombine.low %v7367_v39, %v7384_v25  ;;  %v7406_v49 = vsel %vm7200_vm15, %v1238_v9, %v1243_v26 }
 0x134   : > { %v600_v13 = vpop.f32.mrb[24].mxu0  ;;  %9969 = vst [vmem:[#allocation14_spill] sm:$0xff] %v7406_v49  ;;  %9970 = vst [vmem:[#allocation15_spill] sm:$0xff] %v7416_v62  ;;  %v866_v63 = vcombine.high %v858_v33, %v858_v33  ;;  %v867_v2 = vcombine.high %v865_v3, %v865_v3  ;;  %v1689_v26 = vcombine.low %v7398_v31, %v7406_v49 }
 0x135   : > { %v6525_v27 = vpop.f32.mrb[25].mxu0  ;;  %v7422_v9 = vrot.slane %v6165_v21, %v7171_v34  ;;  %v1696_v30 = vrot.slane %v1686_v32, %v7171_v34  ;;  %v1703_v0 = vrot.slane %v1687_v37, %v7171_v34  ;;  %v7434_v1 = vrot.slane %v858_v33, %v7171_v34 }
 0x136   : > { %v603_v45 = vpop.f32.mrb[26].mxu0  ;;  %v7419_v27 = vrot.slane %v646_v4, %v7171_v34  ;;  %v7437_v4 = vrot.slane %v865_v3, %v7171_v34  ;;  %v1710_v21 = vrot.slane %v1688_v50, %v7171_v34  ;;  %v7441_v18 = vrot.slane %v1689_v26, %v7171_v34 }
 0x137   : > { %v6526_v54 = vpop.f32.mrb[27].mxu0  ;;  %9972 = vst [vmem:[#allocation17_spill] sm:$0xff] %v7434_v1  ;;  %v1718_v32 = vcombine.low %v1696_v30, %v1703_v0  ;;  %v7446_v12 = vrot.slane %v866_v63, %v7171_v34  ;;  %v7449_v55 = vrot.slane %v867_v2, %v7171_v34  ;;  %v2503_v3 = vcombine.low %v7187_v51, %v7195_v53 }
 0x138   : > { %v7430_v54 = vcombine.high %v7335_v8, %v7335_v8  ;;  %9973 = vst [vmem:[#allocation18_spill] sm:$0xff] %v7437_v4  ;;  %9974 = vst [vmem:[#allocation19_spill] sm:$0xff] %v7441_v18  ;;  %v914_v30 = vcombine.high %v7419_v27, %v7419_v27  ;;  %v915_v0 = vcombine.high %v7422_v9, %v7422_v9 }
 0x139   : > { %9975 = vst [vmem:[#allocation20_spill] sm:$0xff] %v7446_v12  ;;  %9976 = vst [vmem:[#allocation21_spill] sm:$0xff] %v7449_v55  ;;  %v1719_v63 = vcombine.low %v1710_v21, %v7441_v18  ;;  %v2504_v2 = vcombine.low %v7234_v24, %v7256_v56  ;;  %v1726_v37 = vrot.slane %v1718_v32, %v7171_v34 }
 0x13a   : > { %9971 = vst [vmem:[#allocation16_spill] sm:$0xff] %v7430_v54  ;;  %v9977_v51 = vcombine.low %v7180_v47, %v7182_v48  ;;  %v9978_v33 = vcombine.low %v7191_v52, %v7177_v46  ;;  %v2525_v49 = vrot.slane %v2503_v3, %v7171_v34  ;;  %v601_v32 = vadd.f32 %v7164_v23, %v600_v13  ;;  %v6925_v48 = vld [vmem:[%s9826_s4] sm:$0xff]  }
 0x13b   : > { %v1733_v21 = vrot.slane %v1719_v63, %v7171_v34  ;;  %v2532_v24 = vrot.slane %v2504_v2, %v7171_v34  ;;  %v6262_v46 = vcombine.high %v7248_v41, %v7256_v56  ;;  %v2551_v52 = vcombine.low %v7277_v15, %v7280_v16 }
 0x13c   : > { %v7455_v50 = vpop.f32.mrb[28].mxu0  ;;  %v2511_v53 = vrot.slane %v9977_v51, %v7171_v34  ;;  %v2518_v28 = vrot.slane %v9978_v33, %v7171_v34  ;;  %v6263_v33 = vcombine.high %v7277_v15, %v7280_v16  ;;  %v635_v13 = vmax.f32 %v601_v32, 0.0 }
 0x13d   : > { %v6529_v26 = vpop.f32.mrb[29].mxu0  ;;  %v1734_v3 = vcombine.low %v1726_v37, %v1733_v21  ;;  %v2534_v63 = vcombine.low %v2525_v49, %v2532_v24  ;;  %v7499_v51 = vrot.slane %v2551_v52, %v7171_v34  ;;  %v1292_v16 = vshll.u32 %v7343_v14, 16 }
 0x13e   : > { %v7474_v10 = vpop.f32.mrb[30].mxu0  ;;  %v604_v26 = vadd.f32 %v7164_v23, %v603_v45  ;;  %v2533_v47 = vcombine.low %v2511_v53, %v2518_v28  ;;  %v7491_v28 = vrot.slane %v7419_v27, %v7171_v34  ;;  %v7496_v45 = vrot.slane %v6262_v46, %v7171_v34 }
 0x13f   : > { %v6530_v40 = vpop.f32.mrb[31].mxu0  ;;  %9981 = vst [vmem:[#allocation24_spill] sm:$0xff] %v7499_v51  ;;  %6544 = vmatmul.mubr.msk.bf16.vlgmr.msra.gmra.mrb[0].mxu1 %vm1957_vm1, %v1734_v3  ;;  %v2548_v49 = vrot.slane %v2534_v63, %v7171_v34  ;;  %v2574_v27 = vrot.slane %v6263_v33, %v7171_v34  ;;  %v7514_v46 = vcombine.high %v7434_v1, %v7434_v1  ;;  %v9983_v33 = vmov 0.0   ;;  %v6926_v3 = vld [vmem:[%s9826_s4 + $0x8] sm:$0xff]  }
 0x140   : > { %v636_v2 = vmax.f32 %v604_v26, 0.0  ;;  %9979 = vst [vmem:[#allocation22_spill] sm:$0xff] %v7491_v28  ;;  %v2553_v40 = vcombine.low %v7312_v57, %v7319_v60  ;;  %9980 = vst [vmem:[#allocation23_spill] sm:$0xff] %v7496_v45  ;;  %v2541_v37 = vrot.slane %v2533_v47, %v7171_v34  ;;  %6568 = vmatpush3.bf16.msra.mxu1 %v6925_v48  ;;  %6547 = vmatprep.mubr.msk.bf16.mxu1 %vm6997_vm0, %v9983_v33 }
 0x141   : > { %v2582_v32 = vcombine.low %v7496_v45, %v7499_v51  ;;  %v2948_v26 = vcombine.low %v7248_v41, %v7256_v56  ;;  %v7518_v47 = vrot.slane %v7422_v9, %v7171_v34  ;;  %v7530_v41 = vcombine.high %v7437_v4, %v7437_v4  ;;  %6569 = vmatprep.subr.bf16.mxu1 %v9983_v33 }
 0x142   : > { %v647_v53 = vpack.c.bf16 %v636_v2, %v635_v13  ;;  %v6166_v21 = vpack.c.bf16 %v636_v2, %v636_v2  ;;  %v7506_v24 = vrot.slane %v2553_v40, %v7171_v34  ;;  %v2549_v48 = vcombine.low %v2541_v37, %v2548_v49  ;;  %v6927_v2 = vld [vmem:[%s9826_s4 + $0x40] sm:$0xff]  }
 0x143   : > { %9984 = vst [vmem:[#allocation26_spill] sm:$0xff] %v7530_v41  ;;  %v7537_v13 = vrot.slane %v2948_v26, %v7171_v34  ;;  %v7545_v37 = vrot.slane %v914_v30, %v7171_v34  ;;  %v7548_v49 = vrot.slane %v915_v0, %v7171_v34  ;;  %v7567_v26 = vcombine.high %v7518_v47, %v7518_v47 }
 0x144   : > { %9982 = vst [vmem:[#allocation25_spill] sm:$0xff] %v7506_v24  ;;  %v7521_v52 = vrot.slane %v647_v53, %v7171_v34  ;;  %v7533_v63 = vrot.slane %v6166_v21, %v7171_v34  ;;  %v2583_v9 = vcombine.low %v2574_v27, %v7506_v24  ;;  %6604 = vmatmul.mubr.msk.bf16.vlgmr.msra.gmra.mrb[40].mxu0 %vm1957_vm1, %v2549_v48  ;;  %v1278_v45 = vshrl.u32 %v7323_v61, 16 }
 0x145   : > { %9985 = vst [vmem:[#allocation27_spill] sm:$0xff] %v7537_v13  ;;  %9986 = vst [vmem:[#allocation28_spill] sm:$0xff] %v7545_v37  ;;  %v7553_v53 = vcombine.high %v7312_v57, %v7312_v57  ;;  %v7557_v21 = vcombine.high %v7491_v28, %v7491_v28  ;;  %6607 = vmatprep.mubr.msk.bf16.mxu0 %vm6997_vm0, %v9983_v33  ;;  %v2590_v27 = vrot.slane %v2582_v32, %v7171_v34 }
 0x146   : > { %9987 = vst [vmem:[#allocation29_spill] sm:$0xff] %v7548_v49  ;;  %v2597_v30 = vrot.slane %v2583_v9, %v7171_v34  ;;  %9989 = vst [vmem:[#allocation31_spill] sm:$0xff] %v7567_v26  ;;  %v9990_v48 = vcombine.low %v7267_v6, %v7379_v5  ;;  %v9991_v24 = vcombine.low %v7363_v38, %v7367_v39  ;;  %6570 = vmatpush3.bf16.msra.mxu1 %v6926_v3  ;;  %v6929_v38 = vld [vmem:[%s9826_s4 + $0x48] sm:$0xff]  }
 0x147   : > { %9988 = vst [vmem:[#allocation30_spill] sm:$0xff] %v7557_v21  ;;  %v7588_v6 = vcombine.high %v7343_v14, %v7343_v14  ;;  %6631 = vmatprep.subr.bf16.mxu1 %v9983_v33  ;;  %6664 = vmatpush3.bf16.msra.mxu0 %v6927_v2  ;;  %v7596_v39 = vcombine.high %v7315_v59, %v7315_v59  ;;  %v1246_v5 = vshrl.u32 %v7319_v60, 16  ;;  %v1254_v3 = vshrl.u32 %v7553_v53, 16 }
 0x148   : > { %v7573_v40 = vrot.slane %v9990_v48, %v7171_v34  ;;  %v7579_v32 = vrot.slane %v9991_v24, %v7171_v34  ;;  %v2598_v13 = vcombine.low %v2590_v27, %v2597_v30  ;;  %v1251_v24 = vshll.u32 %v7553_v53, 16  ;;  %6665 = vmatprep.subr.bf16.mxu0 %v9983_v33 }
 0x149   : > { %9992 = vst [vmem:[#allocation32_spill] sm:$0xff] %v7588_v6  ;;  %v1259_v27 = vshll.u32 %v7292_v36, 16  ;;  %v1262_v2 = vshrl.u32 %v7292_v36, 16  ;;  %v1267_v30 = vshll.u32 %v7315_v59, 16  ;;  %v1270_v48 = vshrl.u32 %v7315_v59, 16 }
 0x14a   : > { %v7608_v0 = vsel %vm7200_vm15, %v1246_v5, %v1251_v24  ;;  %v1275_v60 = vshll.u32 %v7323_v61, 16  ;;  %v1283_v9 = vshll.u32 %v7596_v39, 16  ;;  %v1295_v15 = vshrl.u32 %v7343_v14, 16 }
 0x14b   : > { %v7615_v51 = vsel %vm7200_vm15, %v1254_v3, %v1259_v27  ;;  %v7619_v57 = vsel %vm7200_vm15, %v1262_v2, %v1267_v30  ;;  %6666 = vmatpush3.bf16.msra.mxu0 %v6929_v38  ;;  %v1300_v3 = vshll.u32 %v7416_v62, 16  ;;  %v1303_v27 = vshrl.u32 %v7416_v62, 16 }
 0x14c   : > { %6608 = vmatmul.mubr.msk.bf16.gmra.mrb[44].mxu0 %vm1957_vm1, %v2598_v13  ;;  %v7626_v5 = vsel %vm7200_vm15, %v1270_v48, %v1275_v60  ;;  %v7630_v24 = vsel %vm7200_vm15, %v1278_v45, %v1283_v9  ;;  %6727 = vmatprep.subr.bf16.mxu0 %v9983_v33  ;;  %v9994_v2 = vshrl.u32 %v7332_v7, 16  ;;  %v1308_v13 = vshll.u32 %v7588_v6, 16 }
 0x14d   : > { %9993 = vst [vmem:[#allocation33_spill] sm:$0xff] %v7626_v5  ;;  %v1735_v30 = vcombine.low %v7608_v0, %v7615_v51  ;;  %v1736_v45 = vcombine.low %v7619_v57, %v7626_v5  ;;  %6611 = vmatprep.mubr.msk.bf16.mxu0 %vm6997_vm0, %v9983_v33  ;;  %v7650_v9 = vsel %vm7200_vm15, %v1295_v15, %v1300_v3 }
 0x14e   : > { %v7639_v38 = vsel %vm7200_vm15, %v9994_v2, %v1292_v16  ;;  %v609_v16 = vadd.f32 %v7164_v23, %v7455_v50  ;;  %v612_v60 = vadd.f32 %v7164_v23, %v7474_v10  ;;  %v7658_v2 = vpop.f32.mrb[32].mxu0  ;;  %v7662_v62 = vsel %vm7200_vm15, %v1303_v27, %v1308_v13 }
 0x14f   : > { %9995 = vst [vmem:[#allocation34_spill] sm:$0xff] %v7639_v38  ;;  %v1737_v48 = vcombine.low %v7630_v24, %v7639_v38  ;;  %9996 = vst [vmem:[#allocation35_spill] sm:$0xff] %v7658_v2  ;;  %v7665_v5 = vrot.slane %v1735_v30, %v7171_v34  ;;  %v7668_v15 = vrot.slane %v1736_v45, %v7171_v34  ;;  %v6533_v38 = vpop.f32.mrb[33].mxu0 }
 0x150   : > { %9997 = vst [vmem:[#allocation36_spill] sm:$0xff] %v7662_v62  ;;  %v2599_v3 = vcombine.low %v7553_v53, %v7292_v36  ;;  %v1738_v50 = vcombine.low %v7650_v9, %v7662_v62  ;;  %v637_v10 = vmax.f32 %v609_v16, 0.0  ;;  %v7677_v2 = vmax.f32 %v612_v60, 0.0  ;;  %v7679_v27 = vpop.f32.mrb[34].mxu0 }
 0x151   : > { %9998 = vst [vmem:[#allocation37_spill] sm:$0xff] %v7665_v5  ;;  %9999 = vst [vmem:[#allocation38_spill] sm:$0xff] %v7668_v15  ;;  %v7675_v23 = vrot.slane %v1737_v48, %v7171_v34  ;;  %v7683_v13 = vrot.slane %v7521_v52, %v7171_v34  ;;  %v2600_v53 = vcombine.low %v7315_v59, %v7323_v61  ;;  %v6534_v45 = vpop.f32.mrb[35].mxu0  ;;  %v1349_v61 = vshll.u32 %v7446_v12, 16 }
 0x152   : > { %10001 = vst [vmem:[#allocation40_spill] sm:$0xff] %v7679_v27  ;;  %v2601_v38 = vcombine.low %v7596_v39, %v7343_v14  ;;  %v7692_v48 = vrot.slane %v1738_v50, %v7171_v34  ;;  %v1767_v16 = vcombine.low %v7665_v5, %v7668_v15  ;;  %v648_v27 = vpack.c.bf16 %v7677_v2, %v637_v10 }
 0x153   : > { %10000 = vst [vmem:[#allocation39_spill] sm:$0xff] %v7675_v23  ;;  %10002 = vst [vmem:[#allocation41_spill] sm:$0xff] %v7683_v13  ;;  %v10004_v30 = vcombine.low %v7384_v25, %v7394_v29  ;;  %v7707_v39 = vrot.slane %v7533_v63, %v7171_v34  ;;  %v6264_v50 = vcombine.high %v7332_v7, %v7343_v14  ;;  %v1373_v7 = vshll.u32 %v7437_v4, 16 }
 0x154   : > { %10003 = vst [vmem:[#allocation42_spill] sm:$0xff] %v7692_v48  ;;  %v7712_v45 = vrot.slane %v2599_v3, %v7171_v34  ;;  %v10007_v10 = vcombine.high %v7521_v52, %v7521_v52  ;;  %v1768_v29 = vcombine.low %v7675_v23, %v7692_v48  ;;  %v10009_v15 = vcombine.high %v7533_v63, %v7533_v63 }
 0x155   : > { %v7703_v18 = vrot.slane %v10004_v30, %v7171_v34  ;;  %10005 = vst [vmem:[#allocation43_spill] sm:$0xff] %v7707_v39  ;;  %v1002_v30 = vrot.slane %v648_v27, %v7171_v34  ;;  %v7732_v5 = vrot.slane %v2600_v53, %v7171_v34  ;;  %v7735_v52 = vrot.slane %v2601_v38, %v7171_v34 }
 0x156   : > { %10006 = vst [vmem:[#allocation44_spill] sm:$0xff] %v7712_v45  ;;  %v7718_v60 = vrot.slane %v10007_v10, %v7171_v34  ;;  %v7729_v3 = vrot.slane %v10009_v15, %v7171_v34  ;;  %v7738_v10 = vrot.slane %v6264_v50, %v7171_v34  ;;  %v7742_v25 = vcombine.high %v7683_v13, %v7683_v13 }
 0x157   : > { %10011 = vst [vmem:[#allocation47_spill] sm:$0xff] %v7732_v5  ;;  %10012 = vst [vmem:[#allocation48_spill] sm:$0xff] %v7735_v52  ;;  %v1775_v27 = vrot.slane %v1767_v16, %v7171_v34  ;;  %v1782_v48 = vrot.slane %v1768_v29, %v7171_v34  ;;  %v1010_v63 = vcombine.high %v1002_v30, %v1002_v30  ;;  %v1316_v23 = vshll.u32 %v7335_v8, 16 }
 0x158   : > { %10008 = vst [vmem:[#allocation45_spill] sm:$0xff] %v7718_v60  ;;  %10010 = vst [vmem:[#allocation46_spill] sm:$0xff] %v7729_v3  ;;  %v7748_v15 = vcombine.high %v7707_v39, %v7707_v39  ;;  %v2631_v53 = vcombine.low %v7712_v45, %v7732_v5  ;;  %v2632_v38 = vcombine.low %v7735_v52, %v7738_v10 }
 0x159   : > { %10013 = vst [vmem:[#allocation49_spill] sm:$0xff] %v7738_v10  ;;  %v7756_v50 = vcombine.high %v7346_v22, %v7346_v22  ;;  %v1783_v16 = vcombine.low %v1775_v27, %v1782_v48  ;;  %v7760_v29 = vrot.slane %v1002_v30, %v7171_v34  ;;  %v898_v62 = vcombine.high %v7446_v12, %v7446_v12 }
 0x15a   : > { %10014 = vst [vmem:[#allocation50_spill] sm:$0xff] %v7748_v15  ;;  %v7765_v14 = vrot.slane %v1010_v63, %v7171_v34  ;;  %v2639_v5 = vrot.slane %v2631_v53, %v7171_v34  ;;  %v2646_v52 = vrot.slane %v2632_v38, %v7171_v34  ;;  %v1311_v10 = vshrl.u32 %v7588_v6, 16 }
 0x15b   : > { %10015 = vst [vmem:[#allocation51_spill] sm:$0xff] %v7756_v50  ;;  %6548 = vmatmul.mubr.msk.bf16.gmra.mrb[4].mxu1 %vm1957_vm1, %v1783_v16  ;;  %v1319_v48 = vshrl.u32 %v7335_v8, 16  ;;  %v1324_v30 = vshll.u32 %v7346_v22, 16  ;;  %v1327_v27 = vshrl.u32 %v7346_v22, 16  ;;  %v1332_v63 = vshll.u32 %v7430_v54, 16 }
 0x15c   : > { %10016 = vst [vmem:[#allocation52_spill] sm:$0xff] %v7765_v14  ;;  %v2647_v45 = vcombine.low %v2639_v5, %v2646_v52  ;;  %6551 = vmatprep.mubr.msk.bf16.mxu1 %vm6997_vm0, %v9983_v33  ;;  %v1335_v53 = vshrl.u32 %v7430_v54, 16  ;;  %v1340_v38 = vshll.u32 %v7756_v50, 16  ;;  %v7782_v16 = vsel %vm7200_vm15, %v1311_v10, %v1316_v23 }
 0x15d   : > { %v7786_v6 = vsel %vm7200_vm15, %v1319_v48, %v1324_v30  ;;  %v1352_v5 = vshrl.u32 %v7446_v12, 16  ;;  %v7793_v52 = vsel %vm7200_vm15, %v1327_v27, %v1332_v63  ;;  %v1357_v23 = vshll.u32 %v7514_v46, 16 }
 0x15e   : > { %10017 = vst [vmem:[#allocation53_spill] sm:$0xff] %v7786_v6  ;;  %6612 = vmatmul.mubr.msk.bf16.gmra.mrb[48].mxu0 %vm1957_vm1, %v2647_v45  ;;  %v7797_v50 = vsel %vm7200_vm15, %v1335_v53, %v1340_v38  ;;  %v1360_v10 = vshrl.u32 %v7514_v46, 16  ;;  %v10019_v48 = vshrl.u32 %v7434_v1, 16  ;;  %v1365_v54 = vshll.u32 %v898_v62, 16 }
 0x15f   : > { %10018 = vst [vmem:[#allocation54_spill] sm:$0xff] %v7797_v50  ;;  %v1368_v45 = vshrl.u32 %v898_v62, 16  ;;  %6615 = vmatprep.mubr.msk.bf16.mxu0 %vm6997_vm0, %v9983_v33  ;;  %v7812_v27 = vsel %vm7200_vm15, %v1352_v5, %v1357_v23  ;;  %v1784_v63 = vcombine.low %v7782_v16, %v7786_v6  ;;  %v1785_v53 = vcombine.low %v7793_v52, %v7797_v50 }
 0x160   : > { %v7805_v30 = vsel %vm7200_vm15, %v10019_v48, %v1349_v61  ;;  %10021 = vst [vmem:[#allocation56_spill] sm:$0xff] %v7812_v27  ;;  %v2648_v61 = vcombine.low %v7335_v8, %v7346_v22  ;;  %v7822_v38 = vsel %vm7200_vm15, %v1360_v10, %v1365_v54  ;;  %v6265_v23 = vcombine.high %v7335_v8, %v7346_v22 }
 0x161   : > { %10020 = vst [vmem:[#allocation55_spill] sm:$0xff] %v7805_v30  ;;  %v7826_v48 = vsel %vm7200_vm15, %v1368_v45, %v1373_v7  ;;  %v1786_v5 = vcombine.low %v7805_v30, %v7812_v27  ;;  %v7835_v1 = vrot.slane %v1784_v63, %v7171_v34  ;;  %v7838_v6 = vrot.slane %v1785_v53, %v7171_v34 }
 0x162   : > { %10022 = vst [vmem:[#allocation57_spill] sm:$0xff] %v7826_v48  ;;  %v1787_v50 = vcombine.low %v7822_v38, %v7826_v48  ;;  %v2650_v54 = vcombine.low %v7446_v12, %v7514_v46  ;;  %v2651_v10 = vcombine.low %v898_v62, %v7437_v4  ;;  %v7847_v45 = vrot.slane %v2648_v61, %v7171_v34 }
 0x163   : > { %10023 = vst [vmem:[#allocation58_spill] sm:$0xff] %v7835_v1  ;;  %10024 = vst [vmem:[#allocation59_spill] sm:$0xff] %v7838_v6  ;;  %v7843_v7 = vrot.slane %v1786_v5, %v7171_v34  ;;  %v7850_v22 = vrot.slane %v6265_v23, %v7171_v34  ;;  %v1816_v53 = vcombine.low %v7835_v1, %v7838_v6  ;;  %v1376_v5 = vshrl.u32 %v7437_v4, 16 }
 0x164   : > { %10026 = vst [vmem:[#allocation61_spill] sm:$0xff] %v7847_v45  ;;  %v7853_v63 = vrot.slane %v1787_v50, %v7171_v34  ;;  %v7858_v30 = vrot.slane %v2650_v54, %v7171_v34  ;;  %v7862_v46 = vcombine.high %v7545_v37, %v7545_v37  ;;  %v7865_v62 = vrot.slane %v2651_v10, %v7171_v34 }
 0x165   : > { %10025 = vst [vmem:[#allocation60_spill] sm:$0xff] %v7843_v7  ;;  %10027 = vst [vmem:[#allocation62_spill] sm:$0xff] %v7850_v22  ;;  %v2680_v61 = vcombine.low %v7847_v45, %v7850_v22  ;;  %v1095_v50 = vcombine.high %v7449_v55, %v7449_v55  ;;  %v1824_v54 = vrot.slane %v1816_v53, %v7171_v34  ;;  %v1381_v1 = vshll.u32 %v7449_v55, 16 }
 0x166   : > { %10028 = vst [vmem:[#allocation63_spill] sm:$0xff] %v7853_v63  ;;  %10029 = vst [vmem:[#allocation64_spill] sm:$0xff] %v7858_v30  ;;  %v1817_v23 = vcombine.low %v7843_v7, %v7853_v63  ;;  %v1384_v6 = vshrl.u32 %v7449_v55, 16  ;;  %v2681_v10 = vcombine.low %v7858_v30, %v7865_v62  ;;  %v1389_v22 = vshll.u32 %v7530_v41, 16 }
 0x167   : > { %10030 = vst [vmem:[#allocation65_spill] sm:$0xff] %v7862_v46  ;;  %10031 = vst [vmem:[#allocation66_spill] sm:$0xff] %v7865_v62  ;;  %v2688_v48 = vrot.slane %v2680_v61, %v7171_v34  ;;  %v1392_v45 = vshrl.u32 %v7530_v41, 16  ;;  %v7885_v63 = vsel %vm7200_vm15, %v1376_v5, %v1381_v1  ;;  %v1397_v53 = vshll.u32 %v1095_v50, 16 }
 0x168   : > { %v1831_v4 = vrot.slane %v1817_v23, %v7171_v34  ;;  %v1406_v7 = vshll.u32 %v7545_v37, 16  ;;  %v2695_v12 = vrot.slane %v2681_v10, %v7171_v34  ;;  %v7891_v62 = vsel %vm7200_vm15, %v1384_v6, %v1389_v22 }
 0x169   : > { %v1409_v61 = vshrl.u32 %v7545_v37, 16  ;;  %v1414_v30 = vshll.u32 %v7557_v21, 16  ;;  %v7897_v23 = vsel %vm7200_vm15, %v1392_v45, %v1397_v53  ;;  %v10032_v1 = vshrl.u32 %v7491_v28, 16 }
 0x16a   : > { %v1832_v8 = vcombine.low %v1824_v54, %v1831_v4  ;;  %v1417_v10 = vshrl.u32 %v7557_v21, 16  ;;  %v2696_v27 = vcombine.low %v2688_v48, %v2695_v12  ;;  %v1422_v6 = vshll.u32 %v7862_v46, 16 }
 0x16b   : > { %v7903_v5 = vsel %vm7200_vm15, %v10032_v1, %v1406_v7  ;;  %v7908_v22 = vsel %vm7200_vm15, %v1409_v61, %v1414_v30  ;;  %v1425_v4 = vshrl.u32 %v7862_v46, 16  ;;  %v1430_v45 = vshll.u32 %v7518_v47, 16 }
 0x16c   : > { %6552 = vmatmul.mubr.msk.bf16.gmra.mrb[8].mxu1 %vm1957_vm1, %v1832_v8  ;;  %v1433_v54 = vshrl.u32 %v7518_v47, 16  ;;  %v1438_v7 = vshll.u32 %v7548_v49, 16  ;;  %v1833_v53 = vcombine.low %v7885_v63, %v7891_v62  ;;  %6616 = vmatmul.mubr.msk.bf16.gmra.mrb[52].mxu0 %vm1957_vm1, %v2696_v27  ;;  %v7923_v12 = vsel %vm7200_vm15, %v1417_v10, %v1422_v6 }
 0x16d   : > { %6555 = vmatprep.mubr.msk.bf16.mxu1 %vm6997_vm0, %v9983_v33  ;;  %v1834_v8 = vcombine.low %v7897_v23, %v7903_v5  ;;  %v2697_v30 = vcombine.low %v7449_v55, %v7530_v41  ;;  %v1441_v48 = vshrl.u32 %v7548_v49, 16  ;;  %v7932_v61 = vsel %vm7200_vm15, %v1425_v4, %v1430_v45  ;;  %6619 = vmatprep.mubr.msk.bf16.mxu0 %vm6997_vm0, %v9983_v33 }
 0x16e   : > { %v7936_v27 = vsel %vm7200_vm15, %v1433_v54, %v1438_v7  ;;  %v1835_v1 = vcombine.low %v7908_v22, %v7923_v12  ;;  %v7941_v10 = vrot.slane %v1833_v53, %v7171_v34  ;;  %v2698_v4 = vcombine.low %v1095_v50, %v7545_v37 }
 0x16f   : > { %10033 = vst [vmem:[#allocation67_spill] sm:$0xff] %v7936_v27  ;;  %v1836_v6 = vcombine.low %v7932_v61, %v7936_v27  ;;  %v7948_v46 = vrot.slane %v1834_v8, %v7171_v34  ;;  %v6266_v45 = vcombine.high %v7491_v28, %v7545_v37  ;;  %v2700_v7 = vcombine.low %v7518_v47, %v7548_v49 }
 0x170   : > { %10034 = vst [vmem:[#allocation68_spill] sm:$0xff] %v7941_v10  ;;  %v7954_v54 = vrot.slane %v1835_v1, %v7171_v34  ;;  %v7959_v53 = vrot.slane %v2697_v30, %v7171_v34  ;;  %v994_v27 = vcombine.high %v7718_v60, %v7718_v60  ;;  %v7969_v37 = vrot.slane %v2698_v4, %v7171_v34 }
 0x171   : > { %10035 = vst [vmem:[#allocation69_spill] sm:$0xff] %v7948_v46  ;;  %v7964_v8 = vrot.slane %v1836_v6, %v7171_v34  ;;  %v1865_v50 = vcombine.low %v7941_v10, %v7948_v46  ;;  %v7972_v1 = vrot.slane %v6266_v45, %v7171_v34  ;;  %v7975_v21 = vrot.slane %v2700_v7, %v7171_v34 }
 0x172   : > { %10036 = vst [vmem:[#allocation70_spill] sm:$0xff] %v7954_v54  ;;  %10037 = vst [vmem:[#allocation71_spill] sm:$0xff] %v7959_v53  ;;  %v7979_v30 = vcombine.high %v7548_v49, %v7548_v49  ;;  %v1446_v41 = vshll.u32 %v7567_v26, 16  ;;  %v1449_v6 = vshrl.u32 %v7567_v26, 16  ;;  %v2729_v45 = vcombine.low %v7959_v53, %v7969_v37 }
 0x173   : > { %10038 = vst [vmem:[#allocation72_spill] sm:$0xff] %v7964_v8  ;;  %10039 = vst [vmem:[#allocation73_spill] sm:$0xff] %v7969_v37  ;;  %v1866_v10 = vcombine.low %v7954_v54, %v7964_v8  ;;  %v1873_v4 = vrot.slane %v1865_v50, %v7171_v34  ;;  %v1463_v46 = vshll.u32 %v7718_v60, 16  ;;  %v2730_v7 = vcombine.low %v7972_v1, %v7975_v21 }
 0x174   : > { %10040 = vst [vmem:[#allocation74_spill] sm:$0xff] %v7972_v1  ;;  %10041 = vst [vmem:[#allocation75_spill] sm:$0xff] %v7975_v21  ;;  %v7993_v28 = vsel %vm7200_vm15, %v1441_v48, %v1446_v41  ;;  %v1454_v55 = vshll.u32 %v7979_v30, 16  ;;  %v1466_v26 = vshrl.u32 %v7718_v60, 16  ;;  %v2737_v50 = vrot.slane %v2729_v45, %v7171_v34 }
 0x175   : > { %10042 = vst [vmem:[#allocation76_spill] sm:$0xff] %v7979_v30  ;;  %v1880_v8 = vrot.slane %v1866_v10, %v7171_v34  ;;  %v10043_v54 = vshrl.u32 %v7683_v13, 16  ;;  %v1471_v21 = vshll.u32 %v7742_v25, 16  ;;  %v2744_v53 = vrot.slane %v2730_v7, %v7171_v34 }
 0x176   : > { %v8009_v41 = vsel %vm7200_vm15, %v1449_v6, %v1454_v55  ;;  %v1474_v48 = vshrl.u32 %v7742_v25, 16  ;;  %v1479_v1 = vshll.u32 %v994_v27, 16  ;;  %v1482_v30 = vshrl.u32 %v994_v27, 16 }
 0x177   : > { %v8003_v37 = vsel %vm7200_vm15, %v10043_v54, %v1463_v46  ;;  %v1881_v10 = vcombine.low %v1873_v4, %v1880_v8  ;;  %v8014_v45 = vsel %vm7200_vm15, %v1466_v26, %v1471_v21  ;;  %v1487_v46 = vshll.u32 %v7707_v39, 16 }
 0x178   : > { %v2745_v54 = vcombine.low %v2737_v50, %v2744_v53  ;;  %v8019_v13 = vsel %vm7200_vm15, %v1474_v48, %v1479_v1  ;;  %v1490_v7 = vshrl.u32 %v7707_v39, 16  ;;  %v1495_v55 = vshll.u32 %v7729_v3, 16 }
 0x179   : > { %6556 = vmatmul.mubr.msk.bf16.gmra.mrb[12].mxu1 %vm1957_vm1, %v1881_v10  ;;  %v8026_v8 = vsel %vm7200_vm15, %v1482_v30, %v1487_v46  ;;  %v1498_v21 = vshrl.u32 %v7729_v3, 16  ;;  %v1503_v26 = vshll.u32 %v7748_v15, 16  ;;  %v1882_v53 = vcombine.low %v7993_v28, %v8009_v41 }
 0x17a   : > { %6620 = vmatmul.mubr.msk.bf16.gmra.mrb[56].mxu0 %vm1957_vm1, %v2745_v54  ;;  %6559 = vmatprep.mubr.msk.bf16.mxu1 %vm6997_vm0, %v9983_v33  ;;  %v8037_v1 = vsel %vm7200_vm15, %v1490_v7, %v1495_v55  ;;  %v1883_v30 = vcombine.low %v8003_v37, %v8014_v45  ;;  %v1884_v6 = vcombine.low %v8019_v13, %v8026_v8  ;;  %v1506_v4 = vshrl.u32 %v7748_v15, 16 }
 0x17b   : > { %v8046_v50 = vsel %vm7200_vm15, %v1498_v21, %v1503_v26  ;;  %v8049_v48 = vrot.slane %v1882_v53, %v7171_v34  ;;  %6623 = vmatprep.mubr.msk.bf16.mxu0 %vm6997_vm0, %v9983_v33  ;;  %v6267_v10 = vcombine.high %v7518_v47, %v7548_v49  ;;  %v2747_v46 = vcombine.low %v7718_v60, %v7742_v25 }
 0x17c   : > { %v1885_v54 = vcombine.low %v8037_v1, %v8046_v50  ;;  %v8060_v7 = vrot.slane %v1883_v30, %v7171_v34  ;;  %v8063_v55 = vrot.slane %v1884_v6, %v7171_v34  ;;  %v2748_v21 = vcombine.low %v994_v27, %v7707_v39 }
 0x17d   : > { %10044 = vst [vmem:[#allocation77_spill] sm:$0xff] %v8049_v48  ;;  %v2749_v26 = vcombine.low %v7729_v3, %v7748_v15  ;;  %v8069_v53 = vrot.slane %v6267_v10, %v7171_v34  ;;  %v8072_v49 = vrot.slane %v2747_v46, %v7171_v34  ;;  %v8076_v25 = vcombine.high %v7729_v3, %v7729_v3 }
 0x17e   : > { %10045 = vst [vmem:[#allocation78_spill] sm:$0xff] %v8060_v7  ;;  %10046 = vst [vmem:[#allocation79_spill] sm:$0xff] %v8063_v55  ;;  %v8079_v30 = vrot.slane %v1885_v54, %v7171_v34  ;;  %v1914_v6 = vcombine.low %v8049_v48, %v8060_v7  ;;  %v8084_v27 = vrot.slane %v2748_v21, %v7171_v34  ;;  %v1515_v15 = vshrl.u32 %v7760_v29, 16 }
 0x17f   : > { %10047 = vst [vmem:[#allocation80_spill] sm:$0xff] %v8069_v53  ;;  %10048 = vst [vmem:[#allocation81_spill] sm:$0xff] %v8072_v49  ;;  %v8088_v10 = vrot.slane %v2749_v26, %v7171_v34  ;;  %v2778_v46 = vcombine.low %v8069_v53, %v8072_v49  ;;  %v1511_v39 = vshll.u32 %v8076_v25, 16  ;;  %v1520_v3 = vshll.u32 %v7765_v14, 16 }
 0x180   : > { %10049 = vst [vmem:[#allocation82_spill] sm:$0xff] %v8076_v25  ;;  %10050 = vst [vmem:[#allocation83_spill] sm:$0xff] %v8079_v30  ;;  %v10052_v54 = vcombine.low %v7388_v17, %v7398_v31  ;;  %v10053_v21 = vcombine.low %v7304_v43, %v7289_v35  ;;  %v1915_v26 = vcombine.low %v8063_v55, %v8079_v30 }
 0x181   : > { %10051 = vst [vmem:[#allocation84_spill] sm:$0xff] %v8088_v10  ;;  %v2100_v53 = vcombine.low %v7271_v11, %v7307_v44  ;;  %v6167_v49 = vpack.c.bf16 %v7677_v2, %v7677_v2  ;;  %v2779_v60 = vcombine.low %v8084_v27, %v8088_v10  ;;  %v8114_v17 = vsel %vm7200_vm15, %v1506_v4, %v1511_v39 }
 0x182   : > { %v3306_v48 = vrot.slane %v10052_v54, %v7171_v34  ;;  %v8102_v7 = vrot.slane %v10053_v21, %v7171_v34  ;;  %10054 = vst [vmem:[#allocation85_spill] sm:$0xff] %v8114_v17  ;;  %v8118_v31 = vsel %vm7200_vm15, %v1515_v15, %v1520_v3  ;;  %v1922_v54 = vrot.slane %v1914_v6, %v7171_v34 }
 0x183   : > { %10055 = vst [vmem:[#allocation86_spill] sm:$0xff] %v8118_v31  ;;  %v1929_v21 = vrot.slane %v1915_v26, %v7171_v34  ;;  %v2801_v44 = vrot.slane %v8076_v25, %v7171_v34  ;;  %v2786_v2 = vrot.slane %v2778_v46, %v7171_v34  ;;  %v2793_v55 = vrot.slane %v2779_v60, %v7171_v34 }
 0x184   : > { %v10056_v39 = vcombine.low %v7227_v19, %v7230_v20  ;;  %v8135_v15 = vrot.slane %v2100_v53, %v7171_v34  ;;  %v1937_v6 = vrot.slane %v8114_v17, %v7171_v34  ;;  %v3307_v26 = vcombine.low %v7573_v40, %v7579_v32  ;;  %v10057_v20 = vld [vmem:[#allocation3_spill] sm:$0xff] }
 0x185   : > { %v1930_v4 = vcombine.low %v1922_v54, %v1929_v21  ;;  %v3308_v46 = vcombine.low %v7703_v18, %v3306_v48  ;;  %v2794_v11 = vcombine.low %v2786_v2, %v2793_v55  ;;  %v2116_v19 = vcombine.low %v7256_v56, %v7300_v42  ;;  %v10059_v18 = vld [vmem:[#allocation4_spill] sm:$0xff]  ;;  %v10060_v32 = vld [vmem:[#allocation7_spill] sm:$0xff] }
 0x186   : > { %v8132_v3 = vrot.slane %v10056_v39, %v7171_v34  ;;  %v10058_v39 = vld [vmem:[#allocation6_spill] sm:$0xff]  ;;  %v8150_v54 = vrot.slane %v3307_v26, %v7171_v34  ;;  %v2118_v40 = vcombine.low %v10059_v18, %v7304_v43  ;;  %v2119_v48 = vcombine.low %v7289_v35, %v10060_v32  ;;  %v10061_v55 = vld [vmem:[#allocation11_spill] sm:$0xff] }
 0x187   : > { %v2117_v53 = vcombine.low %v10058_v39, %v10057_v20  ;;  %6560 = vmatmul.mubr.msk.bf16.gmra.mrb[16].mxu1 %vm1957_vm1, %v1930_v4  ;;  %v8153_v21 = vrot.slane %v3308_v46, %v7171_v34  ;;  %6624 = vmatmul.mubr.msk.bf16.gmra.mrb[60].mxu0 %vm1957_vm1, %v2794_v11  ;;  %v2126_v56 = vrot.slane %v2116_v19, %v7171_v34  ;;  %v10062_v26 = vld [vmem:[#allocation14_spill] sm:$0xff] }
 0x188   : > { %v2115_v60 = vcombine.low %v8132_v3, %v8135_v15  ;;  %6563 = vmatprep.mubr.msk.bf16.mxu1 %vm6997_vm0, %v9983_v33  ;;  %v3722_v2 = vcombine.low %v10061_v55, %v10060_v32  ;;  %v1009_v4 = vrot.slane %v6167_v49, %v7171_v34  ;;  %6627 = vmatprep.mubr.msk.bf16.mxu0 %vm6997_vm0, %v9983_v33  ;;  %v10064_v55 = vld [vmem:[#allocation34_spill] sm:$0xff] }
 0x189   : > { %v2133_v42 = vrot.slane %v2117_v53, %v7171_v34  ;;  %v3323_v43 = vcombine.low %v8150_v54, %v8153_v21  ;;  %v2140_v11 = vrot.slane %v2118_v40, %v7171_v34  ;;  %v3324_v46 = vcombine.low %v10062_v26, %v7608_v0  ;;  %v10063_v53 = vld [vmem:[#allocation33_spill] sm:$0xff]  ;;  %v10069_v26 = vld [vmem:[#allocation15_spill] sm:$0xff] }
 0x18a   : > { %v3729_v19 = vrot.slane %v3722_v2, %v7171_v34  ;;  %v3325_v39 = vcombine.low %v7615_v51, %v7619_v57  ;;  %v3326_v49 = vcombine.low %v10063_v53, %v7630_v24  ;;  %v8180_v18 = vrot.slane %v2119_v48, %v7171_v34 }
 0x18b   : > { %v2148_v20 = vcombine.low %v2126_v56, %v2133_v42  ;;  %v3327_v54 = vcombine.low %v10064_v55, %v7650_v9  ;;  %v3334_v21 = vrot.slane %v3324_v46, %v7171_v34  ;;  %v6246_v0 = vcombine.high %v7289_v35, %v10060_v32  ;;  %v10068_v32 = vld [vmem:[#allocation8_spill] sm:$0xff] }
 0x18c   : > { %v1944_v40 = vrot.slane %v1937_v6, %v7171_v34  ;;  %v2808_v56 = vrot.slane %v2801_v44, %v7171_v34  ;;  %v3730_v42 = vcombine.low %v2140_v11, %v3729_v19  ;;  %v3341_v57 = vrot.slane %v3325_v39, %v7171_v34  ;;  %v10067_v6 = vld [vmem:[#allocation9_spill] sm:$0xff]  ;;  %v10070_v46 = vld [vmem:[#allocation12_spill] sm:$0xff] }
 0x18d   : > { %v8191_v51 = vrot.slane %v2148_v20, %v7171_v34  ;;  %v3348_v24 = vrot.slane %v3326_v49, %v7171_v34  ;;  %v3355_v48 = vrot.slane %v3327_v54, %v7171_v34  ;;  %v2166_v9 = vcombine.low %v7292_v36, %v7315_v59  ;;  %v10081_v49 = vld [vmem:[#allocation17_spill] sm:$0xff] }
 0x18e   : > { %v8198_v2 = vrot.slane %v3730_v42, %v7171_v34  ;;  %v3356_v35 = vcombine.low %v3334_v21, %v3341_v57  ;;  %v2167_v44 = vcombine.low %v10068_v32, %v10067_v6  ;;  %v2168_v19 = vcombine.low %v10070_v46, %v10069_v26  ;;  %v10072_v57 = vld [vmem:[#allocation36_spill] sm:$0xff] }
 0x18f   : > { %10065 = vst [vmem:[#allocation3_spill] sm:$0xff] %v8191_v51  ;;  %6564 = vmatmul.mubr.msk.bf16.gmra.mrb[20].mxu1 %vm1957_vm1, %v1944_v40  ;;  %v2149_v20 = vcombine.low %v2140_v11, %v8180_v18  ;;  %v3357_v39 = vcombine.low %v3348_v24, %v3355_v48  ;;  %v8207_v53 = vrot.slane %v6246_v0, %v7171_v34  ;;  %v10071_v11 = vld [vmem:[#allocation24_spill] sm:$0xff]  ;;  %v10073_v48 = vld [vmem:[#allocation53_spill] sm:$0xff] }
 0x190   : > { %10066 = vst [vmem:[#allocation6_spill] sm:$0xff] %v8198_v2  ;;  %6628 = vmatmul.mubr.msk.bf16.gmra.mrb[64].mxu0 %vm1957_vm1, %v2808_v56  ;;  %6571 = vmatprep.mubr.msk.bf16.mxu1 %vm6997_vm0, %v9983_v33  ;;  %v8215_v55 = vrot.slane %v2166_v9, %v7171_v34  ;;  %v8218_v54 = vrot.slane %v2168_v19, %v7171_v34  ;;  %v10074_v19 = vld [vmem:[#allocation27_spill] sm:$0xff] }
 0x191   : > { %v2965_v21 = vcombine.low %v10071_v11, %v8102_v7  ;;  %v1011_v40 = vcombine.high %v1009_v4, %v1009_v4  ;;  %6667 = vmatprep.mubr.msk.bf16.mxu0 %vm6997_vm0, %v9983_v33  ;;  %v8225_v0 = vrot.slane %v3356_v35, %v7171_v34  ;;  %v8228_v56 = vrot.slane %v3357_v39, %v7171_v34  ;;  %v6928_v35 = vld [vmem:[%s9826_s4 + $0x30] sm:$0xff]  }
 0x192   : > { %v8231_v42 = vrot.slane %v2167_v44, %v7171_v34  ;;  %v3373_v24 = vcombine.low %v10072_v57, %v7782_v16  ;;  %v3374_v9 = vcombine.low %v10073_v48, %v7793_v52  ;;  %v2163_v7 = vrot.slane %v2149_v20, %v7171_v34  ;;  %v10075_v20 = vld [vmem:[#allocation23_spill] sm:$0xff]  ;;  %v10077_v48 = vld [vmem:[#allocation56_spill] sm:$0xff] }
 0x193   : > { %v3372_v32 = vcombine.low %v8225_v0, %v8228_v56  ;;  %v2197_v26 = vcombine.low %v8207_v53, %v8215_v55  ;;  %v10076_v39 = vcombine.low %v10074_v19, %v10075_v20  ;;  %v8260_v0 = vrot.slane %v2965_v21, %v7171_v34  ;;  %v10078_v20 = vld [vmem:[#allocation10_spill] sm:$0xff] }
 0x194   : > { %v2198_v44 = vcombine.low %v8231_v42, %v8218_v54  ;;  %v8248_v16 = vrot.slane %v3373_v24, %v7171_v34  ;;  %v8251_v52 = vrot.slane %v3374_v9, %v7171_v34  ;;  %v8263_v56 = vrot.slane %v1009_v4, %v7171_v34 }
 0x195   : > { %v8257_v11 = vrot.slane %v10076_v39, %v7171_v34  ;;  %v8266_v57 = vrot.slane %v1011_v40, %v7171_v34  ;;  %v8270_v24 = vcombine.high %v7760_v29, %v7760_v29  ;;  %v3376_v9 = vcombine.low %v10077_v48, %v7822_v38  ;;  %v10079_v39 = vld [vmem:[#allocation32_spill] sm:$0xff]  ;;  %v10082_v38 = vld [vmem:[#allocation57_spill] sm:$0xff] }
 0x196   : > { %v3405_v19 = vcombine.low %v8248_v16, %v8251_v52  ;;  %v2214_v21 = vcombine.low %v10079_v39, %v10078_v20  ;;  %v2164_v4 = vcombine.low %v8191_v51, %v2163_v7  ;;  %v10080_v40 = vld [vmem:[#allocation20_spill] sm:$0xff]  ;;  %v3422_v48 = vcombine.low %v10082_v38, %v7885_v63  ;;  %v6931_v16 = vld [vmem:[%s9826_s4 + $0x60] sm:$0xff]   ;;  %v6930_v63 = vld [vmem:[%s9826_s4 + $0x38] sm:$0xff]  }
 0x197   : > { %6572 = vmatmul.mubr.msk.bf16.vlgmr.msra.gmra.mrb[24].mxu1 %vm1957_vm1, %v2115_v60  ;;  %v2216_v25 = vcombine.low %v10081_v49, %v10080_v40  ;;  %v6247_v2 = vcombine.high %v10081_v49, %v10080_v40  ;;  %v8294_v3 = vrot.slane %v2197_v26, %v7171_v34  ;;  %v8297_v15 = vrot.slane %v2198_v44, %v7171_v34  ;;  %v10084_v60 = vld [vmem:[#allocation55_spill] sm:$0xff]  ;;  %v10085_v7 = vld [vmem:[#allocation54_spill] sm:$0xff] }
 0x198   : > { %6632 = vmatpush3.bf16.msra.mxu1 %v6928_v35  ;;  %6668 = vmatmul.mubr.msk.bf16.vlgmr.msra.gmra.mrb[68].mxu0 %vm1957_vm1, %v3323_v43  ;;  %v3375_v52 = vcombine.low %v10085_v7, %v10084_v60  ;;  %v10086_v43 = vld [vmem:[#allocation16_spill] sm:$0xff]  ;;  %v10087_v35 = vld [vmem:[#allocation13_spill] sm:$0xff]  ;;  %v3423_v44 = vcombine.low %v7891_v62, %v7897_v23  ;;  %v3424_v20 = vcombine.low %v7903_v5, %v7908_v22  ;;  %v10089_v22 = vld [vmem:[#allocation18_spill] sm:$0xff] }
 0x199   : > { %10083 = vst [vmem:[#allocation4_spill] sm:$0xff] %v8294_v3  ;;  %6575 = vmatprep.mubr.msk.bf16.mxu1 %vm6997_vm0, %v9983_v33  ;;  %6671 = vmatprep.mubr.msk.bf16.mxu0 %vm6997_vm0, %v9983_v33  ;;  %v2215_v26 = vcombine.low %v10087_v35, %v10086_v43  ;;  %v3404_v39 = vrot.slane %v3376_v9, %v7171_v34  ;;  %v10088_v5 = vld [vmem:[#allocation21_spill] sm:$0xff]  ;;  %v10092_v40 = vld [vmem:[#allocation30_spill] sm:$0xff] }
 0x19a   : > { %v8316_v38 = vrot.slane %v2214_v21, %v7171_v34  ;;  %6633 = vmatprep.subr.bf16.mxu1 %v9983_v33  ;;  %v3425_v60 = vcombine.low %v7923_v12, %v7932_v61  ;;  %v3432_v7 = vrot.slane %v3422_v48, %v7171_v34  ;;  %v8323_v35 = vrot.slane %v2216_v25, %v7171_v34  ;;  %v10090_v61 = vld [vmem:[#allocation22_spill] sm:$0xff] }
 0x19b   : > { %v8326_v62 = vrot.slane %v6247_v2, %v7171_v34  ;;  %v3439_v23 = vrot.slane %v3423_v44, %v7171_v34  ;;  %v2263_v9 = vcombine.low %v10089_v22, %v10088_v5  ;;  %6728 = vmatpush3.bf16.msra.mxu0 %v6931_v16  ;;  %v3397_v21 = vrot.slane %v3375_v52, %v7171_v34  ;;  %v10091_v48 = vld [vmem:[#allocation26_spill] sm:$0xff]  ;;  %v10093_v44 = vld [vmem:[#allocation28_spill] sm:$0xff]  ;;  %v10094_v22 = vld [vmem:[#allocation65_spill] sm:$0xff] }
 0x19c   : > { %6634 = vmatpush3.bf16.msra.mxu1 %v6930_v63  ;;  %v3446_v51 = vrot.slane %v3424_v20, %v7171_v34  ;;  %v3453_v12 = vrot.slane %v3425_v60, %v7171_v34  ;;  %v2264_v25 = vcombine.low %v10091_v48, %v10090_v61  ;;  %v8337_v30 = vrot.slane %v2215_v26, %v7171_v34  ;;  %v6933_v26 = vld [vmem:[%s9826_s4 + $0x68] sm:$0xff]  }
 0x19d   : > { %v3454_v2 = vcombine.low %v3432_v7, %v3439_v23  ;;  %v2265_v36 = vcombine.low %v10093_v44, %v10092_v40  ;;  %v2266_v16 = vcombine.low %v10094_v22, %v7518_v47  ;;  %6695 = vmatprep.subr.bf16.mxu1 %v9983_v33  ;;  %v3406_v52 = vcombine.low %v3397_v21, %v3404_v39 }
 0x19e   : > { %v3455_v63 = vcombine.low %v3446_v51, %v3453_v12  ;;  %v8345_v20 = vrot.slane %v2263_v9, %v7171_v34  ;;  %v8348_v60 = vrot.slane %v2264_v25, %v7171_v34  ;;  %6729 = vmatprep.subr.bf16.mxu0 %v9983_v33  ;;  %v2246_v47 = vcombine.low %v8316_v38, %v8337_v30 }
 0x19f   : > { %6576 = vmatmul.mubr.msk.bf16.gmra.mrb[28].mxu1 %vm1957_vm1, %v2164_v4  ;;  %v2247_v51 = vcombine.low %v8323_v35, %v8326_v62  ;;  %v8360_v40 = vrot.slane %v2265_v36, %v7171_v34  ;;  %v8363_v39 = vrot.slane %v2266_v16, %v7171_v34  ;;  %v8369_v7 = vrot.slane %v3454_v2, %v7171_v34 }
 0x1a0   : > { %6672 = vmatmul.mubr.msk.bf16.gmra.mrb[72].mxu0 %vm1957_vm1, %v3372_v32  ;;  %6579 = vmatprep.mubr.msk.bf16.mxu1 %vm6997_vm0, %v9983_v33  ;;  %v8372_v4 = vrot.slane %v3455_v63, %v7171_v34  ;;  %v2295_v23 = vcombine.low %v8345_v20, %v8348_v60  ;;  %v8378_v36 = vcombine.high %v8263_v56, %v8263_v56  ;;  %v1523_v22 = vshrl.u32 %v7765_v14, 16 }
 0x1a1   : > { %6675 = vmatprep.mubr.msk.bf16.mxu0 %vm6997_vm0, %v9983_v33  ;;  %v2296_v32 = vcombine.low %v8360_v40, %v8363_v39  ;;  %v1528_v9 = vshll.u32 %v8270_v24, 16  ;;  %v2213_v21 = vcombine.low %v8294_v3, %v8297_v15  ;;  %v3413_v12 = vrot.slane %v3405_v19, %v7171_v34  ;;  %6730 = vmatpush3.bf16.msra.mxu0 %v6933_v26  ;;  %v10098_v15 = vld [vmem:[#allocation67_spill] sm:$0xff] }
 0x1a2   : > { %10095 = vst [vmem:[#allocation7_spill] sm:$0xff] %v8378_v36  ;;  %v3420_v48 = vrot.slane %v3406_v52, %v7171_v34  ;;  %v3470_v25 = vcombine.low %v8369_v7, %v8372_v4  ;;  %v2261_v2 = vrot.slane %v2247_v51, %v7171_v34  ;;  %v8394_v16 = vrot.slane %v2295_v23, %v7171_v34 }
 0x1a3   : > { %v8397_v63 = vrot.slane %v2296_v32, %v7171_v34  ;;  %v1531_v61 = vshrl.u32 %v8270_v24, 16  ;;  %6791 = vmatprep.subr.bf16.mxu0 %v9983_v33  ;;  %v8402_v19 = vrot.slane %v2246_v47, %v7171_v34  ;;  %v3471_v52 = vcombine.low %v10098_v15, %v7993_v28 }
 0x1a4   : > { %v8408_v26 = vcombine.high %v7765_v14, %v7765_v14  ;;  %v1544_v51 = vshll.u32 %v8263_v56, 16  ;;  %v3472_v4 = vcombine.low %v8009_v41, %v8003_v37  ;;  %v3473_v23 = vcombine.low %v8014_v45, %v8019_v13 }
 0x1a5   : > { %10096 = vst [vmem:[#allocation11_spill] sm:$0xff] %v8397_v63  ;;  %10097 = vst [vmem:[#allocation14_spill] sm:$0xff] %v8402_v19  ;;  %v1547_v47 = vshrl.u32 %v8263_v56, 16  ;;  %v3520_v28 = vcombine.low %v8046_v50, %v8114_v17  ;;  %v3421_v32 = vcombine.low %v3413_v12, %v3420_v48  ;;  %v3474_v15 = vcombine.low %v8026_v8, %v8037_v1 }
 0x1a6   : > { %v1536_v3 = vshll.u32 %v8408_v26, 16  ;;  %v2262_v7 = vcombine.low %v8402_v19, %v2261_v2  ;;  %v8427_v37 = vsel %vm7200_vm15, %v1523_v22, %v1528_v9  ;;  %v1539_v13 = vshrl.u32 %v8408_v26, 16  ;;  %v10109_v19 = vld [vmem:[#allocation40_spill] sm:$0xff] }
 0x1a7   : > { %6580 = vmatmul.mubr.msk.bf16.gmra.mrb[32].mxu1 %vm1957_vm1, %v2213_v21  ;;  %10099 = vst [vmem:[#allocation33_spill] sm:$0xff] %v8427_v37  ;;  %v1552_v41 = vshll.u32 %v8266_v57, 16  ;;  %v3481_v45 = vrot.slane %v3471_v52, %v7171_v34  ;;  %v1555_v1 = vshrl.u32 %v8266_v57, 16  ;;  %v1560_v50 = vshll.u32 %v8378_v36, 16  ;;  %v10103_v52 = vld [vmem:[#allocation45_spill] sm:$0xff] }
 0x1a8   : > { %6676 = vmatmul.mubr.msk.bf16.gmra.mrb[76].mxu0 %vm1957_vm1, %v3421_v32  ;;  %6583 = vmatprep.mubr.msk.bf16.mxu1 %vm6997_vm0, %v9983_v33  ;;  %v8437_v8 = vsel %vm7200_vm15, %v1531_v61, %v1536_v3  ;;  %v3488_v22 = vrot.slane %v3472_v4, %v7171_v34  ;;  %v3495_v9 = vrot.slane %v3473_v23, %v7171_v34  ;;  %v10104_v4 = vld [vmem:[#allocation41_spill] sm:$0xff] }
 0x1a9   : > { %10100 = vst [vmem:[#allocation34_spill] sm:$0xff] %v8437_v8  ;;  %6679 = vmatprep.mubr.msk.bf16.mxu0 %vm6997_vm0, %v9983_v33  ;;  %v8447_v21 = vsel %vm7200_vm15, %v1539_v13, %v1544_v51  ;;  %v8451_v12 = vsel %vm7200_vm15, %v1547_v47, %v1552_v41  ;;  %v3502_v3 = vrot.slane %v3474_v15, %v7171_v34 }
 0x1aa   : > { %10101 = vst [vmem:[#allocation9_spill] sm:$0xff] %v8447_v21  ;;  %10102 = vst [vmem:[#allocation8_spill] sm:$0xff] %v8451_v12  ;;  %v8456_v61 = vsel %vm7200_vm15, %v1555_v1, %v1560_v50  ;;  %v3521_v48 = vcombine.low %v8118_v31, %v8427_v37  ;;  %v3522_v2 = vcombine.low %v8437_v8, %v8447_v21  ;;  %v1563_v1 = vshrl.u32 %v8378_v36, 16  ;;  %v10106_v50 = vld [vmem:[#allocation46_spill] sm:$0xff]  ;;  %v10107_v31 = vld [vmem:[#allocation43_spill] sm:$0xff] }
 0x1ab   : > { %v2313_v51 = vcombine.low %v10104_v4, %v10103_v52  ;;  %v6248_v23 = vcombine.high %v10104_v4, %v10103_v52  ;;  %v3523_v47 = vcombine.low %v8451_v12, %v8456_v61  ;;  %v8470_v32 = vcombine.high %v8266_v57, %v8266_v57 }
 0x1ac   : > { %v3530_v15 = vrot.slane %v3520_v28, %v7171_v34  ;;  %v3537_v13 = vrot.slane %v3521_v48, %v7171_v34  ;;  %v3544_v41 = vrot.slane %v3522_v2, %v7171_v34  ;;  %v2315_v17 = vcombine.low %v10107_v31, %v10106_v50  ;;  %v6955_v28 = vld [vmem:[%s9825_s3] ss:$0 sm:$0xff]  ;;  %v10108_v48 = vld [vmem:[#allocation35_spill] sm:$0xff] }
 0x1ad   : > { %10105 = vst [vmem:[#allocation15_spill] sm:$0xff] %v8470_v32  ;;  %v3551_v21 = vrot.slane %v3523_v47, %v7171_v34  ;;  %v1568_v37 = vshll.u32 %v8470_v32, 16  ;;  %v3504_v8 = vcombine.low %v3495_v9, %v3502_v3  ;;  %v617_v2 = vadd.f32 %v6955_v28, %v10108_v48  ;;  %v10110_v50 = vld [vmem:[#allocation31_spill] sm:$0xff]  ;;  %v10111_v47 = vld [vmem:[#allocation29_spill] sm:$0xff] }
 0x1ae   : > { %v3552_v4 = vcombine.low %v3530_v15, %v3537_v13  ;;  %v620_v44 = vadd.f32 %v6955_v28, %v10109_v19  ;;  %v3503_v31 = vcombine.low %v3481_v45, %v3488_v22  ;;  %v2312_v52 = vcombine.low %v10111_v47, %v10110_v50 }
 0x1af   : > { %6584 = vmatmul.mubr.msk.bf16.gmra.mrb[36].mxu1 %vm1957_vm1, %v2262_v7  ;;  %v3553_v32 = vcombine.low %v3544_v41, %v3551_v21  ;;  %v8492_v12 = vsel %vm7200_vm15, %v1563_v1, %v1568_v37  ;;  %v8498_v9 = vrot.slane %v2313_v51, %v7171_v34  ;;  %v8501_v19 = vrot.slane %v6248_v23, %v7171_v34 }
 0x1b0   : > { %6680 = vmatmul.mubr.msk.bf16.gmra.mrb[80].mxu0 %vm1957_vm1, %v3470_v25  ;;  %6587 = vmatprep.mubr.msk.bf16.mxu1 %vm6997_vm0, %v9983_v33  ;;  %v639_v45 = vmax.f32 %v617_v2, 0.0  ;;  %v8508_v37 = vrot.slane %v2315_v17, %v7171_v34  ;;  %v3560_v25 = vrot.slane %v3552_v4, %v7171_v34  ;;  %v640_v21 = vmax.f32 %v620_v44, 0.0 }
 0x1b1   : > { %6683 = vmatprep.mubr.msk.bf16.mxu0 %vm6997_vm0, %v9983_v33  ;;  %v3567_v22 = vrot.slane %v3553_v32, %v7171_v34  ;;  %v3518_v3 = vrot.slane %v3504_v8, %v7171_v34  ;;  %v4026_v51 = vcombine.low %v8218_v54, %v8316_v38  ;;  %v4027_v23 = vcombine.low %v8337_v30, %v8323_v35 }
 0x1b2   : > { %v8518_v15 = vrot.slane %v2312_v52, %v7171_v34  ;;  %v649_v41 = vpack.c.bf16 %v640_v21, %v639_v45  ;;  %v3511_v17 = vrot.slane %v3503_v31, %v7171_v34  ;;  %v2345_v38 = vcombine.low %v8501_v19, %v8508_v37 }
 0x1b3   : > { %v3568_v13 = vcombine.low %v3560_v25, %v3567_v22  ;;  %v8522_v4 = vrot.slane %v4026_v51, %v7171_v34  ;;  %v8525_v44 = vrot.slane %v4027_v23, %v7171_v34  ;;  %v10112_v52 = vcombine.low %v8394_v16, %v8397_v63  ;;  %v10121_v25 = vld [vmem:[#allocation47_spill] sm:$0xff]  ;;  %v10147_v63 = vld [vmem:[#allocation41_spill] sm:$0xff] }
 0x1b4   : > { %v2344_v8 = vcombine.low %v8518_v15, %v8498_v9  ;;  %v3519_v30 = vcombine.low %v3511_v17, %v3518_v3  ;;  %v6168_v31 = vpack.c.bf16 %v640_v21, %v640_v21  ;;  %v1050_v32 = vrot.slane %v649_v41, %v7171_v34  ;;  %v10114_v21 = vld [vmem:[#allocation81_spill] sm:$0xff] }
 0x1b5   : > { %v8543_v28 = vrot.slane %v2345_v38, %v7171_v34  ;;  %v2981_v45 = vcombine.low %v10067_v6, %v10070_v46  ;;  %v4010_v22 = vcombine.low %v8215_v55, %v8231_v42  ;;  %v3575_v51 = vrot.slane %v8492_v12, %v7171_v34  ;;  %v10115_v55 = vld [vmem:[#allocation19_spill] sm:$0xff]  ;;  %v10116_v42 = vld [vmem:[#allocation37_spill] sm:$0xff] }
 0x1b6   : > { %v2352_v1 = vrot.slane %v2344_v8, %v7171_v34  ;;  %v1057_v48 = vrot.slane %v6168_v31, %v7171_v34  ;;  %v1058_v2 = vcombine.high %v1050_v32, %v1050_v32  ;;  %v8566_v46 = vrot.slane %v1050_v32, %v7171_v34  ;;  %v10120_v3 = vld [vmem:[#allocation25_spill] sm:$0xff] }
 0x1b7   : > { %6588 = vmatmul.mubr.msk.bf16.gmra.mrb[40].mxu1 %vm1957_vm1, %v10112_v52  ;;  %10113 = vst [vmem:[#allocation12_spill] sm:$0xff] %v8543_v28  ;;  %v10117_v41 = vcombine.low %v10115_v55, %v10116_v42  ;;  %v4009_v8 = vcombine.low %v8180_v18, %v8207_v53  ;;  %v8585_v52 = vrot.slane %v4010_v22, %v7171_v34 }
 0x1b8   : > { %6684 = vmatmul.mubr.msk.bf16.gmra.mrb[84].mxu0 %vm1957_vm1, %v3519_v30  ;;  %6591 = vmatprep.mubr.msk.bf16.mxu1 %vm6997_vm0, %v9983_v33  ;;  %v2360_v47 = vcombine.low %v2352_v1, %v8543_v28  ;;  %v1059_v6 = vcombine.high %v1057_v48, %v1057_v48  ;;  %v8569_v23 = vrot.slane %v1058_v2, %v7171_v34 }
 0x1b9   : > { %6687 = vmatprep.mubr.msk.bf16.mxu0 %vm6997_vm0, %v9983_v33  ;;  %v8575_v17 = vrot.slane %v10117_v41, %v7171_v34  ;;  %v2988_v30 = vrot.slane %v2981_v45, %v7171_v34  ;;  %v3081_v32 = vcombine.low %v7760_v29, %v7765_v14  ;;  %v6281_v18 = vcombine.high %v7760_v29, %v7765_v14  ;;  %v10119_v41 = vld [vmem:[#allocation44_spill] sm:$0xff] }
 0x1ba   : > { %v4102_v31 = vcombine.low %v8566_v46, %v8569_v23  ;;  %v3582_v53 = vrot.slane %v3575_v51, %v7171_v34  ;;  %v6324_v1 = vcombine.high %v8566_v46, %v8569_v23  ;;  %v3083_v2 = vcombine.low %v8263_v56, %v8266_v57 }
 0x1bb   : > { %v8601_v45 = vrot.slane %v1057_v48, %v7171_v34  ;;  %v8604_v22 = vrot.slane %v1059_v6, %v7171_v34  ;;  %v3090_v55 = vrot.slane %v3081_v32, %v7171_v34  ;;  %v3097_v42 = vrot.slane %v6281_v18, %v7171_v34 }
 0x1bc   : > { %v2989_v7 = vcombine.low %v10120_v3, %v10119_v41  ;;  %v2990_v16 = vcombine.low %v10121_v25, %v2988_v30  ;;  %v3104_v35 = vrot.slane %v3083_v2, %v7171_v34  ;;  %v4111_v32 = vrot.slane %v4102_v31, %v7171_v34  ;;  %v10125_v41 = vld [vmem:[#allocation5_spill] sm:$0xff] }
 0x1bd   : > { %v4104_v6 = vcombine.low %v8601_v45, %v8604_v22  ;;  %v4017_v18 = vrot.slane %v4009_v8, %v7171_v34  ;;  %v3006_v3 = vcombine.low %v10086_v43, %v10081_v49  ;;  %v4118_v30 = vrot.slane %v6324_v1, %v7171_v34 }
 0x1bf   : > { %6592 = vmatmul.mubr.msk.bf16.gmra.mrb[44].mxu1 %vm1957_vm1, %v2360_v47  ;;  %v3810_v47 = vcombine.low %v8266_v57, %v8378_v36  ;;  %v3105_v36 = vcombine.low %v8088_v10, %v3090_v55  ;;  %v4125_v31 = vrot.slane %v4104_v6, %v7171_v34  ;;  %v10123_v55 = vld [vmem:[#allocation39_spill] sm:$0xff]  ;;  %v4025_v43 = vcombine.low %v4017_v18, %v8585_v52  ;;  %v10128_v18 = vld [vmem:[#allocation20_spill] sm:$0xff] }
 0x1c0   : > { %6688 = vmatmul.mubr.msk.bf16.gmra.mrb[88].mxu0 %vm1957_vm1, %v3568_v13  ;;  %6595 = vmatprep.mubr.msk.bf16.mxu1 %vm6997_vm0, %v9983_v33  ;;  %v10118_v13 = vld [vmem:[#allocation50_spill] sm:$0xff]  ;;  %v6308_v6 = vcombine.high %v10125_v41, %v7315_v59  ;;  %v10134_v52 = vld [vmem:[#allocation76_spill] sm:$0xff] }
 0x1c1   : > { %v2367_v38 = vrot.slane %v10118_v13, %v7171_v34  ;;  %6691 = vmatprep.mubr.msk.bf16.mxu0 %vm6997_vm0, %v9983_v33  ;;  %v8615_v48 = vrot.slane %v3810_v47, %v7171_v34  ;;  %v8629_v2 = vrot.slane %v3105_v36, %v7171_v34  ;;  %v10122_v47 = vld [vmem:[#allocation38_spill] sm:$0xff]  ;;  %v4127_v1 = vcombine.low %v4118_v30, %v4125_v31  ;;  %v6932_v30 = vld [vmem:[%s9826_s4 + $0x50] sm:$0xff]  }
 0x1c2   : > { %v8668_v31 = vrot.slane %v3006_v3, %v7171_v34 }
 0x1c3   : > { %v2374_v51 = vrot.slane %v2367_v38, %v7171_v34  ;;  %v3106_v38 = vcombine.low %v3097_v42, %v3104_v35  ;;  %v4126_v8 = vcombine.low %v8615_v48, %v4111_v32  ;;  %v8643_v35 = vrot.slane %v2990_v16, %v7171_v34  ;;  %v10126_v32 = vld [vmem:[#allocation61_spill] sm:$0xff] }
 0x1c4   : > { %v3809_v16 = vcombine.low %v8408_v26, %v8263_v56  ;;  %v8671_v59 = vrot.slane %v4127_v1, %v7171_v34  ;;  %v10130_v26 = vld [vmem:[#allocation18_spill] sm:$0xff] }
 0x1c5   : > { %v8646_v36 = vrot.slane %v3106_v38, %v7171_v34  ;;  %v8652_v42 = vrot.slane %v4126_v8, %v7171_v34  ;;  %v10129_v38 = vld [vmem:[#allocation51_spill] sm:$0xff]  ;;  %v3746_v8 = vrot.slane %v6308_v6, %v7171_v34  ;;  %v10133_v6 = vld [vmem:[#allocation45_spill] sm:$0xff] }
 0x1c7   : > { %6596 = vmatmul.mubr.msk.bf16.gmra.mrb[48].mxu1 %vm1957_vm1, %v2374_v51  ;;  %v10124_v51 = vcombine.low %v10122_v47, %v10123_v55  ;;  %v10127_v47 = vld [vmem:[#allocation49_spill] sm:$0xff] }
 0x1c8   : > { %6692 = vmatmul.mubr.msk.bf16.gmra.mrb[92].mxu0 %vm1957_vm1, %v3582_v53  ;;  %6635 = vmatprep.mubr.msk.bf16.mxu1 %vm6997_vm0, %v9983_v33  ;;  %v8649_v53 = vrot.slane %v2989_v7, %v7171_v34  ;;  %v3014_v55 = vcombine.low %v10127_v47, %v10126_v32  ;;  %v3756_v7 = vcombine.low %v10129_v38, %v10128_v18  ;;  %v10131_v18 = vld [vmem:[#allocation64_spill] sm:$0xff] }
 0x1c9   : > { %v8637_v49 = vrot.slane %v10124_v51, %v7171_v34  ;;  %6731 = vmatprep.mubr.msk.bf16.mxu0 %vm6997_vm0, %v9983_v33  ;;  %v6309_v51 = vcombine.high %v10130_v26, %v10088_v5  ;;  %v3808_v47 = vcombine.low %v7765_v14, %v8270_v24  ;;  %v3015_v1 = vcombine.low %v8668_v31, %v10131_v18  ;;  %v6935_v5 = vld [vmem:[%s9826_s4 + $0x80] sm:$0xff]  }
 0x1ca   : > { %v3005_v41 = vcombine.low %v8649_v53, %v8643_v35  ;;  %v3763_v3 = vrot.slane %v3756_v7, %v7171_v34  ;;  %v3747_v35 = vcombine.low %v3746_v8, %v8218_v54  ;;  %v10132_v26 = vcombine.low %v8257_v11, %v8260_v0  ;;  %v10135_v54 = vld [vmem:[#allocation28_spill] sm:$0xff]  ;;  %v10136_v8 = vld [vmem:[#allocation22_spill] sm:$0xff]  ;;  %v6934_v0 = vld [vmem:[%s9826_s4 + $0x58] sm:$0xff]  }
 0x1cb   : > { %v3780_v38 = vrot.slane %v6309_v51, %v7171_v34  ;;  %v8698_v24 = vcombine.high %v8566_v46, %v8566_v46  ;;  %v8701_v7 = vrot.slane %v3809_v16, %v7171_v34  ;;  %v3790_v32 = vcombine.low %v10134_v52, %v10133_v6  ;;  %v6937_v6 = vld [vmem:[%s9826_s4 + $0x88] sm:$0xff]  }
 0x1cc   : > { %v3764_v31 = vcombine.low %v3763_v3, %v8326_v62  ;;  %v3031_v11 = vcombine.low %v10136_v8, %v10135_v54  ;;  %v8713_v51 = vrot.slane %v3747_v35, %v7171_v34  ;;  %v8730_v3 = vcombine.high %v8601_v45, %v8601_v45  ;;  %v10137_v35 = vld [vmem:[#allocation4_spill] sm:$0xff]  ;;  %v10139_v54 = vld [vmem:[#allocation46_spill] sm:$0xff]  ;;  %v10140_v8 = vld [vmem:[#allocation43_spill] sm:$0xff] }
 0x1cd   : > { %v3781_v16 = vcombine.low %v8345_v20, %v3780_v38  ;;  %v3840_v10 = vcombine.low %v8701_v7, %v8615_v48  ;;  %v8749_v14 = vrot.slane %v3014_v55, %v7171_v34 }
 0x1ce   : > { %v8724_v52 = vrot.slane %v3764_v31, %v7171_v34  ;;  %v4149_v58 = vrot.slane %v8730_v3, %v7171_v34 }
 0x1cf   : > { %6636 = vmatmul.mubr.msk.bf16.vlgmr.msra.gmra.mrb[52].mxu1 %vm1957_vm1, %v10132_v26  ;;  %v8738_v38 = vrot.slane %v3781_v16, %v7171_v34  ;;  %v3038_v26 = vrot.slane %v3031_v11, %v7171_v34  ;;  %v10142_v16 = vcombine.low %v8522_v4, %v8525_v44  ;;  %v10144_v44 = vcombine.low %v8348_v60, %v8360_v40  ;;  %v10145_v11 = vld [vmem:[#allocation71_spill] sm:$0xff] }
 0x1d0   : > { %6696 = vmatpush3.bf16.msra.mxu1 %v6932_v30  ;;  %6732 = vmatmul.mubr.msk.bf16.vlgmr.msra.gmra.mrb[96].mxu0 %vm1957_vm1, %v4025_v43  ;;  %v8721_v43 = vrot.slane %v3808_v47, %v7171_v34  ;;  %v3797_v30 = vrot.slane %v3790_v32, %v7171_v34  ;;  %v10138_v32 = vld [vmem:[#allocation14_spill] sm:$0xff]  ;;  %v8755_v47 = vcombine.high %v8569_v23, %v8569_v23  ;;  %v1585_v60 = vshll.u32 %v8698_v24, 16 }
 0x1d1   : > { %6639 = vmatprep.mubr.msk.bf16.mxu1 %vm6997_vm0, %v9983_v33  ;;  %6735 = vmatprep.mubr.msk.bf16.mxu0 %vm6997_vm0, %v9983_v33  ;;  %v1604_v40 = vshrl.u32 %v8601_v45, 16 }
 0x1d2   : > { %6697 = vmatprep.subr.bf16.mxu1 %v9983_v33  ;;  %6792 = vmatpush3.bf16.msra.mxu0 %v6935_v5  ;;  %v3798_v31 = vcombine.low %v8518_v15, %v3797_v30  ;;  %v6310_v5 = vcombine.high %v10140_v8, %v10139_v54  ;;  %v6351_v30 = vcombine.high %v8263_v56, %v8266_v57 }
 0x1d3   : > { %6793 = vmatprep.subr.bf16.mxu0 %v9983_v33  ;;  %v4061_v54 = vcombine.low %v8498_v9, %v8501_v19  ;;  %v4662_v8 = vcombine.low %v8755_v47, %v8601_v45  ;;  %v4663_v56 = vcombine.low %v8604_v22, %v8730_v3  ;;  %v1572_v19 = vshrl.u32 %v8566_v46, 16  ;;  %v10143_v46 = vld [vmem:[#allocation74_spill] sm:$0xff] }
 0x1d4   : > { %6698 = vmatpush3.bf16.msra.mxu1 %v6934_v0  ;;  %v8762_v48 = vrot.slane %v3798_v31, %v7171_v34  ;;  %v3817_v55 = vrot.slane %v6310_v5, %v7171_v34  ;;  %v4661_v0 = vcombine.low %v8569_v23, %v8698_v24  ;;  %v4670_v57 = vrot.slane %v6351_v30, %v7171_v34 }
 0x1d5   : > { %6759 = vmatprep.subr.bf16.mxu1 %v9983_v33  ;;  %v8779_v5 = vrot.slane %v3840_v10, %v7171_v34  ;;  %v4691_v30 = vrot.slane %v4663_v56, %v7171_v34  ;;  %v3029_v10 = vrot.slane %v3015_v1, %v7171_v34  ;;  %v4312_v1 = vcombine.low %v8575_v17, %v8637_v49 }
 0x1d6   : > { %10141 = vst [vmem:[#allocation24_spill] sm:$0xff] %v8762_v48  ;;  %6794 = vmatpush3.bf16.msra.mxu0 %v6937_v6  ;;  %v3839_v31 = vcombine.low %v3817_v55, %v8721_v43  ;;  %v4677_v9 = vrot.slane %v4661_v0, %v7171_v34  ;;  %v1601_v6 = vshll.u32 %v8601_v45, 16  ;;  %v3040_v55 = vcombine.low %v3038_v26, %v10143_v46 }
 0x1d7   : > { %6640 = vmatmul.mubr.msk.bf16.gmra.mrb[56].mxu1 %vm1957_vm1, %v3005_v41  ;;  %v4684_v41 = vrot.slane %v4662_v8, %v7171_v34  ;;  %v10146_v8 = vld [vmem:[#allocation66_spill] sm:$0xff]  ;;  %v4075_v48 = vrot.slane %v4061_v54, %v7171_v34  ;;  %v3056_v26 = vcombine.low %v10110_v50, %v10147_v63  ;;  %v3030_v63 = vcombine.low %v8749_v14, %v3029_v10 }
 0x1d8   : > { %6736 = vmatmul.mubr.msk.bf16.gmra.mrb[100].mxu0 %vm1957_vm1, %v10142_v16  ;;  %6643 = vmatprep.mubr.msk.bf16.mxu1 %vm6997_vm0, %v9983_v33  ;;  %v8797_v0 = vrot.slane %v3839_v31, %v7171_v34  ;;  %v4692_v4 = vcombine.low %v4670_v57, %v4677_v9  ;;  %v4058_v16 = vrot.slane %v10144_v44, %v7171_v34 }
 0x1d9   : > { %6739 = vmatprep.mubr.msk.bf16.mxu0 %vm6997_vm0, %v9983_v33  ;;  %v3039_v28 = vcombine.low %v10146_v8, %v10145_v11  ;;  %v4693_v56 = vcombine.low %v4684_v41, %v4691_v30  ;;  %v10148_v11 = vcombine.low %v8326_v62, %v8345_v20  ;;  %v3054_v50 = vrot.slane %v3040_v55, %v7171_v34  ;;  %v10150_v20 = vld [vmem:[#allocation34_spill] sm:$0xff]  ;;  %v10151_v8 = vld [vmem:[#allocation33_spill] sm:$0xff] }
 0x1da   : > { %v3855_v57 = vcombine.low %v8797_v0, %v8779_v5  ;;  %v8813_v31 = vrot.slane %v4692_v4, %v7171_v34  ;;  %v10149_v41 = vcombine.low %v8363_v39, %v8518_v15  ;;  %v4077_v45 = vcombine.low %v10118_v13, %v7760_v29  ;;  %v10152_v15 = vld [vmem:[#allocation8_spill] sm:$0xff]  ;;  %v10154_v13 = vld [vmem:[#allocation85_spill] sm:$0xff] }
 0x1db   : > { %v4051_v9 = vrot.slane %v10148_v11, %v7171_v34  ;;  %v8822_v54 = vrot.slane %v4693_v56, %v7171_v34  ;;  %v1588_v4 = vshrl.u32 %v8698_v24, 16  ;;  %v4365_v56 = vcombine.low %v10151_v8, %v10150_v20  ;;  %v10153_v11 = vld [vmem:[#allocation9_spill] sm:$0xff]  ;;  %v10155_v24 = vld [vmem:[#allocation86_spill] sm:$0xff]  ;;  %v10157_v20 = vld [vmem:[#allocation83_spill] sm:$0xff] }
 0x1dc   : > { %v4068_v30 = vrot.slane %v10149_v41, %v7171_v34  ;;  %v8839_v10 = vrot.slane %v3039_v28, %v7171_v34  ;;  %v3063_v39 = vrot.slane %v3056_v26, %v7171_v34  ;;  %v4366_v29 = vcombine.low %v10153_v11, %v10152_v15 }
 0x1dd   : > { %v4059_v44 = vcombine.low %v4051_v9, %v4058_v16  ;;  %v4708_v62 = vcombine.low %v8813_v31, %v8822_v54  ;;  %v10156_v16 = vcombine.low %v10154_v13, %v10155_v24  ;;  %v1577_v28 = vshll.u32 %v8569_v23, 16 }
 0x1de   : > { %v4076_v55 = vcombine.low %v4068_v30, %v4075_v48  ;;  %v1580_v48 = vshrl.u32 %v8569_v23, 16  ;;  %v3055_v26 = vcombine.low %v8839_v10, %v3054_v50  ;;  %v4084_v41 = vrot.slane %v4077_v45, %v7171_v34 }
 0x1df   : > { %6644 = vmatmul.mubr.msk.bf16.gmra.mrb[60].mxu1 %vm1957_vm1, %v3030_v63  ;;  %v4373_v9 = vrot.slane %v10156_v16, %v7171_v34  ;;  %v4380_v63 = vrot.slane %v4365_v56, %v7171_v34  ;;  %v4387_v30 = vrot.slane %v4366_v29, %v7171_v34  ;;  %v1579_v56 = vsel %vm7200_vm15, %v1572_v19, %v1577_v28  ;;  %v10159_v28 = vld [vmem:[#allocation75_spill] sm:$0xff] }
 0x1e0   : > { %6740 = vmatmul.mubr.msk.bf16.gmra.mrb[104].mxu0 %vm1957_vm1, %v4059_v44  ;;  %6647 = vmatprep.mubr.msk.bf16.mxu1 %vm6997_vm0, %v9983_v33  ;;  %v1593_v44 = vshll.u32 %v8755_v47, 16  ;;  %v1587_v15 = vsel %vm7200_vm15, %v1580_v48, %v1585_v60  ;;  %v1596_v23 = vshrl.u32 %v8755_v47, 16  ;;  %v1609_v45 = vshll.u32 %v8604_v22, 16 }
 0x1e1   : > { %6743 = vmatprep.mubr.msk.bf16.mxu0 %vm6997_vm0, %v9983_v33  ;;  %v4388_v8 = vcombine.low %v10157_v20, %v4373_v9  ;;  %v4389_v50 = vcombine.low %v4380_v63, %v4387_v30  ;;  %v1612_v29 = vshrl.u32 %v8604_v22, 16  ;;  %v1617_v19 = vshll.u32 %v8730_v3, 16 }
 0x1e2   : > { %v1595_v11 = vsel %vm7200_vm15, %v1588_v4, %v1593_v44  ;;  %v1603_v24 = vsel %vm7200_vm15, %v1596_v23, %v1601_v6  ;;  %v4406_v16 = vcombine.low %v1579_v56, %v1587_v15  ;;  %v1611_v47 = vsel %vm7200_vm15, %v1604_v40, %v1609_v45 }
 0x1e3   : > { %v8871_v13 = vrot.slane %v4388_v8, %v7171_v34  ;;  %v8877_v60 = vrot.slane %v4389_v50, %v7171_v34  ;;  %v4407_v4 = vcombine.low %v1595_v11, %v1603_v24  ;;  %v10158_v9 = vcombine.low %v8456_v61, %v8492_v12 }
 0x1e4   : > { %v3064_v48 = vcombine.low %v10159_v28, %v3063_v39  ;;  %v4086_v6 = vcombine.low %v8721_v43, %v8701_v7  ;;  %v1619_v30 = vsel %vm7200_vm15, %v1612_v29, %v1617_v19  ;;  %v4422_v44 = vrot.slane %v4406_v16, %v7171_v34  ;;  %v10163_v19 = vld [vmem:[#allocation7_spill] sm:$0xff] }
 0x1e5   : > { %v4415_v63 = vrot.slane %v10158_v9, %v7171_v34  ;;  %v8894_v40 = vcombine.high %v8604_v22, %v8604_v22  ;;  %v4404_v12 = vcombine.low %v8871_v13, %v8877_v60  ;;  %v4408_v61 = vcombine.low %v1611_v47, %v1619_v30  ;;  %v10165_v30 = vld [vmem:[#allocation62_spill] sm:$0xff] }
 0x1e6   : > { %v4429_v39 = vrot.slane %v4407_v4, %v7171_v34  ;;  %v4085_v7 = vcombine.low %v8508_v37, %v4084_v41  ;;  %v4100_v8 = vrot.slane %v4086_v6, %v7171_v34  ;;  %v1620_v23 = vshrl.u32 %v8730_v3, 16  ;;  %v10164_v4 = vld [vmem:[#allocation48_spill] sm:$0xff] }
 0x1e7   : > { %6648 = vmatmul.mubr.msk.bf16.gmra.mrb[64].mxu1 %vm1957_vm1, %v3055_v26  ;;  %v4437_v43 = vcombine.low %v4415_v63, %v4422_v44  ;;  %v10160_v26 = vcombine.low %v10114_v21, %v8084_v27  ;;  %v4436_v20 = vrot.slane %v4408_v61, %v7171_v34  ;;  %v1625_v56 = vshll.u32 %v8894_v40, 16  ;;  %v10166_v61 = vld [vmem:[#allocation3_spill] sm:$0xff] }
 0x1e8   : > { %6744 = vmatmul.mubr.msk.bf16.gmra.mrb[108].mxu0 %vm1957_vm1, %v4076_v55  ;;  %6651 = vmatprep.mubr.msk.bf16.mxu1 %vm6997_vm0, %v9983_v33  ;;  %v3072_v55 = vrot.slane %v3064_v48, %v7171_v34  ;;  %v4093_v41 = vrot.slane %v4085_v7, %v7171_v34  ;;  %v10161_v29 = vcombine.low %v8629_v2, %v8646_v36 }
 0x1e9   : > { %v8907_v22 = vrot.slane %v10160_v26, %v7171_v34  ;;  %6747 = vmatprep.mubr.msk.bf16.mxu0 %vm6997_vm0, %v9983_v33  ;;  %v4438_v15 = vcombine.low %v4429_v39, %v4436_v20  ;;  %v8916_v37 = vrot.slane %v4437_v43, %v7171_v34  ;;  %v8929_v45 = vsel %vm7200_vm15, %v1620_v23, %v1625_v56  ;;  %v10167_v39 = vld [vmem:[#allocation6_spill] sm:$0xff]  ;;  %v6938_v43 = vld [vmem:[%s9826_s4 + $0x78] sm:$0xff]   ;;  %v10174_v23 = vld [vmem:[#allocation80_spill] sm:$0xff] }
 0x1ea   : > { %v4101_v50 = vcombine.low %v4093_v41, %v4100_v8  ;;  %v10162_v24 = vcombine.low %v8652_v42, %v8671_v59  ;;  %v3128_v16 = vrot.slane %v10163_v19, %v7171_v34  ;;  %v4156_v2 = vrot.slane %v4149_v58, %v7171_v34  ;;  %v10169_v26 = vld [vmem:[#allocation73_spill] sm:$0xff] }
 0x1eb   : > { %v3080_v27 = vcombine.low %v3072_v55, %v8907_v22  ;;  %v8921_v21 = vrot.slane %v4438_v15, %v7171_v34  ;;  %v4607_v42 = vcombine.low %v10121_v25, %v10164_v4  ;;  %v6936_v25 = vld [vmem:[%s9826_s4 + $0x70] sm:$0xff]   ;;  %v4616_v44 = vcombine.low %v10165_v30, %v10131_v18  ;;  %v10172_v15 = vld [vmem:[#allocation82_spill] sm:$0xff] }
 0x1ec   : > { %v3135_v47 = vrot.slane %v3128_v16, %v7171_v34  ;;  %v10168_v7 = vcombine.low %v10166_v61, %v10167_v39  ;;  %v4625_v20 = vcombine.low %v10169_v26, %v10143_v46  ;;  %v10170_v8 = vcombine.low %v10137_v35, %v8713_v51  ;;  %v10171_v46 = vld [vmem:[#allocation52_spill] sm:$0xff]  ;;  %v10181_v61 = vld [vmem:[#allocation15_spill] sm:$0xff] }
 0x1ed   : > { %v4453_v11 = vcombine.low %v8916_v37, %v8921_v21  ;;  %v4614_v3 = vrot.slane %v4607_v42, %v7171_v34  ;;  %v4643_v41 = vcombine.low %v10172_v15, %v10171_v46  ;;  %v10173_v35 = vcombine.low %v10138_v32, %v8724_v52 }
 0x1ee   : > { %v4632_v55 = vrot.slane %v4625_v20, %v7171_v34  ;;  %v3862_v39 = vrot.slane %v10181_v61, %v7171_v34  ;;  %v4715_v0 = vrot.slane %v8894_v40, %v7171_v34  ;;  %v10183_v40 = vld [vmem:[#allocation59_spill] sm:$0xff]  ;;  %v10184_v20 = vld [vmem:[#allocation58_spill] sm:$0xff]  ;;  %v4460_v13 = vrot.slane %v8929_v45, %v7171_v34 }
 0x1ef   : > { %6652 = vmatmul.mubr.msk.bf16.gmra.mrb[68].mxu1 %vm1957_vm1, %v3080_v27  ;;  %v4615_v6 = vcombine.low %v8649_v53, %v4614_v3  ;;  %v4623_v53 = vrot.slane %v4616_v44, %v7171_v34  ;;  %v4650_v52 = vrot.slane %v4643_v41, %v7171_v34 }
 0x1f0   : > { %6748 = vmatmul.mubr.msk.bf16.gmra.mrb[112].mxu0 %vm1957_vm1, %v4101_v50  ;;  %6655 = vmatprep.mubr.msk.bf16.mxu1 %vm6997_vm0, %v9983_v33  ;;  %v4634_v50 = vcombine.low %v10159_v28, %v10174_v23  ;;  %v10176_v28 = vld [vmem:[#allocation11_spill] sm:$0xff] }
 0x1f1   : > { %6751 = vmatprep.mubr.msk.bf16.mxu0 %vm6997_vm0, %v9983_v33  ;;  %v4624_v18 = vcombine.low %v8749_v14, %v4623_v53  ;;  %v4633_v14 = vcombine.low %v8839_v10, %v4632_v55  ;;  %v10177_v4 = vcombine.low %v8738_v38, %v10176_v28  ;;  %v4722_v53 = vrot.slane %v4715_v0, %v7171_v34 }
 0x1f2   : > { %v4641_v58 = vrot.slane %v4634_v50, %v7171_v34 }
 0x1f4   : > { %v4642_v16 = vcombine.low %v4641_v58, %v8907_v22  ;;  %v10188_v58 = vld [vmem:[#allocation68_spill] sm:$0xff] }
 0x1f7   : > { %6656 = vmatmul.mubr.msk.bf16.gmra.mrb[72].mxu1 %vm1957_vm1, %v10161_v29 }
 0x1f8   : > { %6752 = vmatmul.mubr.msk.bf16.gmra.mrb[116].mxu0 %vm1957_vm1, %v10162_v24  ;;  %6659 = vmatprep.mubr.msk.bf16.mxu1 %vm6997_vm0, %v9983_v33 }
 0x1f9   : > { %6755 = vmatprep.mubr.msk.bf16.mxu0 %vm6997_vm0, %v9983_v33 }
 0x1ff   : > { %6660 = vmatmul.mubr.msk.bf16.gmra.mrb[76].mxu1 %vm1957_vm1, %v3135_v47  ;;  %v8962_v59 = vpop.f32.mrb[36].mxu0 }
 0x200   : > { %6756 = vmatmul.mubr.msk.bf16.gmra.mrb[120].mxu0 %vm1957_vm1, %v4156_v2  ;;  %6699 = vmatprep.mubr.msk.bf16.mxu1 %vm6997_vm0, %v9983_v33  ;;  %v6541_v9 = vpop.f32.mrb[37].mxu0  ;;  %v10175_v2 = vld [vmem:[#allocation84_spill] sm:$0xff] }
 0x201   : > { %6795 = vmatprep.mubr.msk.bf16.mxu0 %vm6997_vm0, %v9983_v33  ;;  %v8965_v63 = vpop.f32.mrb[38].mxu0  ;;  %v4651_v47 = vcombine.low %v10175_v2, %v4650_v52  ;;  %v10187_v52 = vld [vmem:[#allocation69_spill] sm:$0xff] }
 0x202   : > { %v6542_v48 = vpop.f32.mrb[39].mxu0 }
 0x203   : > { %v4658_v3 = vrot.slane %v4651_v47, %v7171_v34  ;;  %v10178_v48 = vld [vmem:[#allocation24_spill] sm:$0xff] }
 0x205   : > { %v4659_v38 = vcombine.low %v4658_v3, %v8646_v36  ;;  %v10190_v3 = vld [vmem:[#allocation79_spill] sm:$0xff] }
 0x207   : > { %6700 = vmatmul.mubr.msk.bf16.vlgmr.msra.gmra.mrb[80].mxu1 %vm1957_vm1, %v10168_v7 }
 0x208   : > { %6760 = vmatpush3.bf16.msra.mxu1 %v6936_v25  ;;  %6796 = vmatmul.mubr.msk.bf16.vlgmr.msra.gmra.mrb[124].mxu0 %vm1957_vm1, %v4615_v6  ;;  %v10179_v6 = vld [vmem:[#allocation12_spill] sm:$0xff] }
 0x209   : > { %6703 = vmatprep.mubr.msk.bf16.mxu1 %vm6997_vm0, %v9983_v33  ;;  %6799 = vmatprep.mubr.msk.bf16.mxu0 %vm6997_vm0, %v9983_v33  ;;  %v10180_v30 = vcombine.low %v10178_v48, %v10179_v6 }
 0x20a   : > { %6761 = vmatprep.subr.bf16.mxu1 %v9983_v33 }
 0x20c   : > { %6762 = vmatpush3.bf16.msra.mxu1 %v6938_v43 }
 0x20d   : > { %6823 = vmatprep.subr.bf16.mxu1 %v9983_v33 }
 0x20f   : > { %6704 = vmatmul.mubr.msk.bf16.gmra.mrb[84].mxu1 %vm1957_vm1, %v10170_v8  ;;  %v10185_v8 = vld [vmem:[#allocation42_spill] sm:$0xff] }
 0x210   : > { %6800 = vmatmul.mubr.msk.bf16.gmra.mrb[128].mxu0 %vm1957_vm1, %v4624_v18  ;;  %6707 = vmatprep.mubr.msk.bf16.mxu1 %vm6997_vm0, %v9983_v33  ;;  %v10182_v18 = vld [vmem:[#allocation60_spill] sm:$0xff]  ;;  %v4313_v55 = vcombine.low %v10185_v8, %v10184_v20 }
 0x211   : > { %6803 = vmatprep.mubr.msk.bf16.mxu0 %vm6997_vm0, %v9983_v33  ;;  %v4314_v26 = vcombine.low %v10183_v40, %v10182_v18 }
 0x212   : > { %v9001_v56 = vpop.f32.mrb[0].mxu1  ;;  %v4321_v17 = vrot.slane %v4313_v55, %v7171_v34 }
 0x213   : > { %v6545_v51 = vpop.f32.mrb[1].mxu1  ;;  %v4328_v46 = vrot.slane %v4314_v26, %v7171_v34 }
 0x214   : > { %v9010_v27 = vpop.f32.mrb[2].mxu1 }
 0x215   : > { %v6546_v10 = vpop.f32.mrb[3].mxu1  ;;  %v4329_v50 = vcombine.low %v4321_v17, %v4328_v46 }
 0x216   : > { %v10186_v10 = vld [vmem:[#allocation70_spill] sm:$0xff] }
 0x217   : > { %6708 = vmatmul.mubr.msk.bf16.gmra.mrb[88].mxu1 %vm1957_vm1, %v10173_v35  ;;  %v9019_v29 = vpop.f32.mrb[40].mxu0 }
 0x218   : > { %6804 = vmatmul.mubr.msk.bf16.gmra.mrb[132].mxu0 %vm1957_vm1, %v4633_v14  ;;  %6711 = vmatprep.mubr.msk.bf16.mxu1 %vm6997_vm0, %v9983_v33  ;;  %v6605_v32 = vpop.f32.mrb[41].mxu0 }
 0x219   : > { %6807 = vmatprep.mubr.msk.bf16.mxu0 %vm6997_vm0, %v9983_v33  ;;  %v9022_v24 = vpop.f32.mrb[42].mxu0  ;;  %v4331_v32 = vcombine.low %v10187_v52, %v10186_v10 }
 0x21a   : > { %v6606_v19 = vpop.f32.mrb[43].mxu0 }
 0x21b   : > { %v10189_v19 = vld [vmem:[#allocation63_spill] sm:$0xff]  ;;  %v4345_v2 = vrot.slane %v4331_v32, %v7171_v34  ;;  %v6939_v32 = vld [vmem:[%s9828_s6] sm:$0xff]  }
 0x21f   : > { %6712 = vmatmul.mubr.msk.bf16.gmra.mrb[92].mxu1 %vm1957_vm1, %v10177_v4  ;;  %v9036_v42 = vpop.f32.mrb[44].mxu0 }
 0x220   : > { %6808 = vmatmul.mubr.msk.bf16.gmra.mrb[136].mxu0 %vm1957_vm1, %v4642_v16  ;;  %6715 = vmatprep.mubr.msk.bf16.mxu1 %vm6997_vm0, %v9983_v33  ;;  %v6609_v22 = vpop.f32.mrb[45].mxu0  ;;  %v4330_v16 = vcombine.low %v10189_v19, %v10188_v58 }
 0x221   : > { %6811 = vmatprep.mubr.msk.bf16.mxu0 %vm6997_vm0, %v9983_v33  ;;  %v9039_v9 = vpop.f32.mrb[46].mxu0  ;;  %v10191_v22 = vld [vmem:[#allocation78_spill] sm:$0xff] }
 0x222   : > { %v6610_v25 = vpop.f32.mrb[47].mxu0  ;;  %v4338_v47 = vrot.slane %v4330_v16, %v7171_v34 }
 0x223   : > { %v4348_v25 = vcombine.low %v10191_v22, %v10190_v3 }
 0x224   : > { %v4346_v28 = vcombine.low %v4338_v47, %v4345_v2 }
 0x227   : > { %6716 = vmatmul.mubr.msk.bf16.gmra.mrb[96].mxu1 %vm1957_vm1, %v10180_v30  ;;  %v10192_v30 = vld [vmem:[#allocation77_spill] sm:$0xff] }
 0x228   : > { %6812 = vmatmul.mubr.msk.bf16.gmra.mrb[140].mxu0 %vm1957_vm1, %v4659_v38  ;;  %6719 = vmatprep.mubr.msk.bf16.mxu1 %vm6997_vm0, %v9983_v33 }
 0x229   : > { %6815 = vmatprep.mubr.msk.bf16.mxu0 %vm6997_vm0, %v9983_v33 }
 0x22e   : > { %v9055_v44 = vpop.f32.mrb[4].mxu1 }
 0x22f   : > { %6720 = vmatmul.mubr.msk.bf16.gmra.mrb[100].mxu1 %vm1957_vm1, %v3855_v57  ;;  %v6549_v36 = vpop.f32.mrb[5].mxu1 }
 0x230   : > { %6816 = vmatmul.mubr.msk.bf16.gmra.mrb[144].mxu0 %vm1957_vm1, %v4708_v62  ;;  %6723 = vmatprep.mubr.msk.bf16.mxu1 %vm6997_vm0, %v9983_v33  ;;  %v9067_v5 = vpop.f32.mrb[6].mxu1  ;;  %v3869_v62 = vrot.slane %v3862_v39, %v7171_v34  ;;  %v10193_v36 = vld [vmem:[#allocation72_spill] sm:$0xff] }
 0x231   : > { %6819 = vmatprep.mubr.msk.bf16.mxu0 %vm6997_vm0, %v9983_v33  ;;  %v6550_v57 = vpop.f32.mrb[7].mxu1  ;;  %v9071_v7 = vpop.f32.mrb[48].mxu0  ;;  %v4347_v61 = vcombine.low %v10193_v36, %v10192_v30 }
 0x232   : > { %v6613_v31 = vpop.f32.mrb[49].mxu0 }
 0x233   : > { %v9073_v54 = vpop.f32.mrb[50].mxu0  ;;  %v4362_v31 = vrot.slane %v4348_v25, %v7171_v34 }
 0x234   : > { %v6614_v43 = vpop.f32.mrb[51].mxu0 }
 0x235   : > { %v4355_v43 = vrot.slane %v4347_v61, %v7171_v34 }
 0x237   : > { %6724 = vmatmul.mubr.msk.bf16.gmra.mrb[104].mxu1 %vm1957_vm1, %v3869_v62 }
 0x238   : > { %6820 = vmatmul.mubr.msk.bf16.gmra.mrb[148].mxu0 %vm1957_vm1, %v4722_v53  ;;  %6763 = vmatprep.mubr.msk.bf16.mxu1 %vm6997_vm0, %v9983_v33  ;;  %v4363_v53 = vcombine.low %v4355_v43, %v4362_v31 }
 0x23f   : > { %6764 = vmatmul.mubr.msk.bf16.vlgmr.msra.gmra.mrb[108].mxu1 %vm1957_vm1, %v4312_v1  ;;  %v9091_v14 = vpop.f32.mrb[8].mxu1  ;;  %v9094_v41 = vpop.f32.mrb[52].mxu0 }
 0x240   : > { %6767 = vmatprep.mubr.msk.bf16.mxu1 %vm6997_vm0, %v9983_v33  ;;  %v6553_v15 = vpop.f32.mrb[9].mxu1  ;;  %v6617_v35 = vpop.f32.mrb[53].mxu0  ;;  %6824 = vmatpush3.bf16.msra.mxu1 %v6939_v32 }
 0x241   : > { %v9096_v51 = vpop.f32.mrb[10].mxu1  ;;  %v9099_v1 = vpop.f32.mrb[54].mxu0  ;;  %6825 = vmatprep.subr.bf16.mxu1 %v9983_v33 }
 0x242   : > { %v6554_v49 = vpop.f32.mrb[11].mxu1  ;;  %v6618_v23 = vpop.f32.mrb[55].mxu0 }
 0x247   : > { %6768 = vmatmul.mubr.msk.bf16.gmra.mrb[112].mxu1 %vm1957_vm1, %v4329_v50 }
 0x248   : > { %6771 = vmatprep.mubr.msk.bf16.mxu1 %vm6997_vm0, %v9983_v33 }
 0x24c   : > { %v9110_v4 = vpop.f32.mrb[12].mxu1 }
 0x24d   : > { %v6557_v38 = vpop.f32.mrb[13].mxu1  ;;  %v9114_v48 = vpop.f32.mrb[56].mxu0 }
 0x24e   : > { %v9117_v6 = vpop.f32.mrb[14].mxu1  ;;  %v6621_v39 = vpop.f32.mrb[57].mxu0 }
 0x24f   : > { %6772 = vmatmul.mubr.msk.bf16.gmra.mrb[116].mxu1 %vm1957_vm1, %v4346_v28  ;;  %v6558_v0 = vpop.f32.mrb[15].mxu1  ;;  %v9123_v57 = vpop.f32.mrb[58].mxu0 }
 0x250   : > { %6775 = vmatprep.mubr.msk.bf16.mxu1 %vm6997_vm0, %v9983_v33  ;;  %v6622_v62 = vpop.f32.mrb[59].mxu0 }
 0x257   : > { %6776 = vmatmul.mubr.msk.bf16.gmra.mrb[120].mxu1 %vm1957_vm1, %v4363_v53 }
 0x258   : > { %6779 = vmatprep.mubr.msk.bf16.mxu1 %vm6997_vm0, %v9983_v33 }
 0x25a   : > { %v9130_v18 = vpop.f32.mrb[16].mxu1  ;;  %v9132_v26 = vpop.f32.mrb[60].mxu0 }
 0x25b   : > { %v6561_v40 = vpop.f32.mrb[17].mxu1  ;;  %v6625_v8 = vpop.f32.mrb[61].mxu0 }
 0x25c   : > { %v9134_v20 = vpop.f32.mrb[18].mxu1  ;;  %v9136_v46 = vpop.f32.mrb[62].mxu0 }
 0x25d   : > { %v6562_v55 = vpop.f32.mrb[19].mxu1  ;;  %v6626_v15 = vpop.f32.mrb[63].mxu0 }
 0x25f   : > { %6780 = vmatmul.mubr.msk.bf16.gmra.mrb[124].mxu1 %vm1957_vm1, %v4404_v12 }
 0x260   : > { %6783 = vmatprep.mubr.msk.bf16.mxu1 %vm6997_vm0, %v9983_v33 }
 0x262   : > { %v9144_v35 = vpop.f32.mrb[20].mxu1 }
 0x263   : > { %v6565_v17 = vpop.f32.mrb[21].mxu1  ;;  %v9146_v49 = vpop.f32.mrb[64].mxu0 }
 0x264   : > { %v2064_v23 = vpop.f32.mrb[22].mxu1  ;;  %v6629_v50 = vpop.f32.mrb[65].mxu0 }
 0x265   : > { %v6566_v10 = vpop.f32.mrb[23].mxu1  ;;  %v2927_v52 = vpop.f32.mrb[66].mxu0 }
 0x266   : > { %v6630_v58 = vpop.f32.mrb[67].mxu0 }
 0x267   : > { %6784 = vmatmul.mubr.msk.bf16.gmra.mrb[128].mxu1 %vm1957_vm1, %v4453_v11  ;;  %v4467_v11 = vrot.slane %v4460_v13, %v7171_v34 }
 0x268   : > { %6787 = vmatprep.mubr.msk.bf16.mxu1 %vm6997_vm0, %v9983_v33 }
 0x26a   : > { %v2442_v60 = vpop.f32.mrb[24].mxu1 }
 0x26b   : > { %v2443_v12 = vadd.f32 %v2442_v60, %v8962_v59  ;;  %v6573_v19 = vpop.f32.mrb[25].mxu1  ;;  %v9161_v16 = vpop.f32.mrb[68].mxu0 }
 0x26c   : > { %v2445_v2 = vpop.f32.mrb[26].mxu1  ;;  %v6669_v47 = vpop.f32.mrb[69].mxu0 }
 0x26d   : > { %v2446_v37 = vadd.f32 %v2445_v2, %v8965_v63  ;;  %v6574_v21 = vpop.f32.mrb[27].mxu1  ;;  %v9165_v28 = vpop.f32.mrb[70].mxu0  ;;  %v9168_v3 = vadd.f32 %v9019_v29, %v2443_v12 }
 0x26e   : > { %v6670_v45 = vpop.f32.mrb[71].mxu0 }
 0x26f   : > { %6788 = vmatmul.mubr.msk.bf16.gmra.mrb[132].mxu1 %vm1957_vm1, %v4467_v11  ;;  %v9172_v59 = vadd.f32 %v9022_v24, %v2446_v37 }
 0x270   : > { %6827 = vmatprep.mubr.msk.bf16.mxu1 %vm6997_vm0, %v9983_v33 }
 0x272   : > { %v2450_v22 = vpop.f32.mrb[28].mxu1 }
 0x273   : > { %v2451_v63 = vadd.f32 %v2450_v22, %v9001_v56  ;;  %v6577_v25 = vpop.f32.mrb[29].mxu1  ;;  %v9177_v38 = vpop.f32.mrb[72].mxu0 }
 0x274   : > { %v2453_v34 = vpop.f32.mrb[30].mxu1  ;;  %v6673_v30 = vpop.f32.mrb[73].mxu0 }
 0x275   : > { %v2454_v29 = vadd.f32 %v2453_v34, %v9010_v27  ;;  %v6578_v36 = vpop.f32.mrb[31].mxu1  ;;  %v9180_v61 = vpop.f32.mrb[74].mxu0  ;;  %v9183_v39 = vadd.f32 %v9036_v42, %v2451_v63 }
 0x276   : > { %v6674_v24 = vpop.f32.mrb[75].mxu0 }
 0x277   : > { %v9186_v0 = vadd.f32 %v9039_v9, %v2454_v29 }
 0x27a   : > { %v2458_v31 = vpop.f32.mrb[32].mxu1 }
 0x27b   : > { %v2459_v56 = vadd.f32 %v2458_v31, %v9055_v44  ;;  %v6581_v62 = vpop.f32.mrb[33].mxu1  ;;  %v9189_v43 = vpop.f32.mrb[76].mxu0 }
 0x27c   : > { %v2461_v53 = vpop.f32.mrb[34].mxu1  ;;  %v6677_v40 = vpop.f32.mrb[77].mxu0 }
 0x27d   : > { %v2462_v27 = vadd.f32 %v2461_v53, %v9067_v5  ;;  %v6582_v8 = vpop.f32.mrb[35].mxu1  ;;  %v9192_v55 = vpop.f32.mrb[78].mxu0  ;;  %v9195_v42 = vadd.f32 %v9071_v7, %v2459_v56  ;;  %v6940_v5 = vld [vmem:[%s9828_s6 + $0x8] sm:$0xff]  }
 0x27e   : > { %v6678_v15 = vpop.f32.mrb[79].mxu0  ;;  %6826 = vmatpush3.bf16.msra.mxu1 %v6940_v5 }
 0x27f   : > { %v9198_v9 = vadd.f32 %v9073_v54, %v2462_v27 }
 0x282   : > { %v2466_v17 = vpop.f32.mrb[36].mxu1 }
 0x283   : > { %v2467_v44 = vadd.f32 %v2466_v17, %v9091_v14  ;;  %v6585_v23 = vpop.f32.mrb[37].mxu1  ;;  %v9201_v50 = vpop.f32.mrb[80].mxu0 }
 0x284   : > { %v2469_v10 = vpop.f32.mrb[38].mxu1  ;;  %v6681_v52 = vpop.f32.mrb[81].mxu0 }
 0x285   : > { %v2470_v32 = vadd.f32 %v2469_v10, %v9096_v51  ;;  %v6586_v7 = vpop.f32.mrb[39].mxu1  ;;  %v9207_v58 = vpop.f32.mrb[82].mxu0  ;;  %v9210_v54 = vadd.f32 %v9094_v41, %v2467_v44 }
 0x286   : > { %v6682_v13 = vpop.f32.mrb[83].mxu0 }
 0x287   : > { %v9213_v14 = vadd.f32 %v9099_v1, %v2470_v32 }
 0x28a   : > { %v2474_v60 = vpop.f32.mrb[40].mxu1 }
 0x28b   : > { %v2475_v12 = vadd.f32 %v2474_v60, %v9110_v4  ;;  %v6589_v19 = vpop.f32.mrb[41].mxu1  ;;  %v9216_v2 = vpop.f32.mrb[84].mxu0 }
 0x28c   : > { %v2477_v47 = vpop.f32.mrb[42].mxu1  ;;  %v6685_v37 = vpop.f32.mrb[85].mxu0 }
 0x28d   : > { %v2478_v51 = vadd.f32 %v2477_v47, %v9117_v6  ;;  %v6590_v21 = vpop.f32.mrb[43].mxu1  ;;  %v9219_v11 = vpop.f32.mrb[86].mxu0  ;;  %v9222_v41 = vadd.f32 %v9114_v48, %v2475_v12 }
 0x28e   : > { %v6686_v45 = vpop.f32.mrb[87].mxu0 }
 0x28f   : > { %v9225_v1 = vadd.f32 %v9123_v57, %v2478_v51 }
 0x292   : > { %v2482_v22 = vpop.f32.mrb[44].mxu1 }
 0x293   : > { %v2483_v4 = vadd.f32 %v2482_v22, %v9130_v18  ;;  %v6593_v63 = vpop.f32.mrb[45].mxu1  ;;  %v9228_v25 = vpop.f32.mrb[88].mxu0 }
 0x294   : > { %v2485_v34 = vpop.f32.mrb[46].mxu1  ;;  %v6689_v30 = vpop.f32.mrb[89].mxu0 }
 0x295   : > { %v2486_v6 = vadd.f32 %v2485_v34, %v9134_v20  ;;  %v6594_v29 = vpop.f32.mrb[47].mxu1  ;;  %v9231_v36 = vpop.f32.mrb[90].mxu0  ;;  %v9234_v48 = vadd.f32 %v9132_v26, %v2483_v4 }
 0x296   : > { %v6690_v24 = vpop.f32.mrb[91].mxu0 }
 0x297   : > { %v9237_v57 = vadd.f32 %v9136_v46, %v2486_v6 }
 0x29a   : > { %v2490_v31 = vpop.f32.mrb[48].mxu1 }
 0x29b   : > { %v2491_v18 = vadd.f32 %v2490_v31, %v9144_v35  ;;  %v6597_v56 = vpop.f32.mrb[49].mxu1  ;;  %v9240_v62 = vpop.f32.mrb[92].mxu0 }
 0x29c   : > { %v2493_v53 = vpop.f32.mrb[50].mxu1  ;;  %v6693_v40 = vpop.f32.mrb[93].mxu0 }
 0x29d   : > { %v6598_v27 = vpop.f32.mrb[51].mxu1  ;;  %v3701_v20 = vpop.f32.mrb[94].mxu0  ;;  %v9243_v8 = vadd.f32 %v9146_v49, %v2491_v18 }
 0x29e   : > { %v6694_v15 = vpop.f32.mrb[95].mxu0 }
 0x2a2   : > { %v3203_v26 = vpop.f32.mrb[52].mxu1 }
 0x2a3   : > { %v3257_v17 = vadd.f32 %v3203_v26, %v9168_v3  ;;  %v6637_v44 = vpop.f32.mrb[53].mxu1  ;;  %v9246_v46 = vpop.f32.mrb[96].mxu0 }
 0x2a4   : > { %v3206_v23 = vpop.f32.mrb[54].mxu1  ;;  %v6733_v5 = vpop.f32.mrb[97].mxu0 }
 0x2a5   : > { %v3258_v35 = vadd.f32 %v3206_v23, %v9172_v59  ;;  %v6638_v10 = vpop.f32.mrb[55].mxu1  ;;  %v9249_v52 = vpop.f32.mrb[98].mxu0  ;;  %v9252_v32 = vadd.f32 %v9161_v16, %v3257_v17 }
 0x2a6   : > { %v6734_v7 = vpop.f32.mrb[99].mxu0 }
 0x2a7   : > { %v9255_v49 = vadd.f32 %v9165_v28, %v3258_v35 }
 0x2aa   : > { %v3211_v13 = vpop.f32.mrb[56].mxu1 }
 0x2ab   : > { %v3259_v3 = vadd.f32 %v3211_v13, %v9183_v39  ;;  %v6641_v60 = vpop.f32.mrb[57].mxu1  ;;  %v9258_v12 = vpop.f32.mrb[100].mxu0 }
 0x2ac   : > { %v3214_v19 = vpop.f32.mrb[58].mxu1  ;;  %v6737_v47 = vpop.f32.mrb[101].mxu0 }
 0x2ad   : > { %v3260_v59 = vadd.f32 %v3214_v19, %v9186_v0  ;;  %v6642_v37 = vpop.f32.mrb[59].mxu1  ;;  %v9261_v51 = vpop.f32.mrb[102].mxu0  ;;  %v9264_v16 = vadd.f32 %v9177_v38, %v3259_v3 }
 0x2ae   : > { %v6738_v21 = vpop.f32.mrb[103].mxu0 }
 0x2af   : > { %v9267_v28 = vadd.f32 %v9180_v61, %v3260_v59 }
 0x2b2   : > { %v3219_v45 = vpop.f32.mrb[60].mxu1 }
 0x2b3   : > { %v3261_v39 = vadd.f32 %v3219_v45, %v9195_v42  ;;  %v6645_v22 = vpop.f32.mrb[61].mxu1  ;;  %v9270_v4 = vpop.f32.mrb[104].mxu0 }
 0x2b4   : > { %v3222_v63 = vpop.f32.mrb[62].mxu1  ;;  %v6741_v34 = vpop.f32.mrb[105].mxu0 }
 0x2b5   : > { %v3262_v0 = vadd.f32 %v3222_v63, %v9198_v9  ;;  %v6646_v30 = vpop.f32.mrb[63].mxu1  ;;  %v9273_v6 = vpop.f32.mrb[106].mxu0  ;;  %v9276_v38 = vadd.f32 %v9189_v43, %v3261_v39 }
 0x2b6   : > { %v6742_v29 = vpop.f32.mrb[107].mxu0 }
 0x2b7   : > { %v9279_v61 = vadd.f32 %v9192_v55, %v3262_v0 }
 0x2ba   : > { %v3227_v24 = vpop.f32.mrb[64].mxu1 }
 0x2bb   : > { %v3263_v42 = vadd.f32 %v3227_v24, %v9210_v54  ;;  %v6649_v31 = vpop.f32.mrb[65].mxu1  ;;  %v9282_v18 = vpop.f32.mrb[108].mxu0 }
 0x2bc   : > { %v3230_v56 = vpop.f32.mrb[66].mxu1  ;;  %v6745_v53 = vpop.f32.mrb[109].mxu0 }
 0x2bd   : > { %v3264_v9 = vadd.f32 %v3230_v56, %v9213_v14  ;;  %v6650_v40 = vpop.f32.mrb[67].mxu1  ;;  %v9285_v27 = vpop.f32.mrb[110].mxu0  ;;  %v9288_v43 = vadd.f32 %v9201_v50, %v3263_v42 }
 0x2be   : > { %v6746_v20 = vpop.f32.mrb[111].mxu0 }
 0x2bf   : > { %v9291_v55 = vadd.f32 %v9207_v58, %v3264_v9 }
 0x2c2   : > { %v3235_v15 = vpop.f32.mrb[68].mxu1 }
 0x2c3   : > { %v3265_v54 = vadd.f32 %v3235_v15, %v9222_v41  ;;  %v6653_v26 = vpop.f32.mrb[69].mxu1  ;;  %v9294_v17 = vpop.f32.mrb[112].mxu0 }
 0x2c4   : > { %v3238_v44 = vpop.f32.mrb[70].mxu1  ;;  %v6749_v23 = vpop.f32.mrb[113].mxu0 }
 0x2c5   : > { %v3266_v14 = vadd.f32 %v3238_v44, %v9225_v1  ;;  %v6654_v5 = vpop.f32.mrb[71].mxu1  ;;  %v9297_v35 = vpop.f32.mrb[114].mxu0  ;;  %v9300_v50 = vadd.f32 %v9216_v2, %v3265_v54 }
 0x2c6   : > { %v6750_v10 = vpop.f32.mrb[115].mxu0 }
 0x2c7   : > { %v9303_v58 = vadd.f32 %v9219_v11, %v3266_v14 }
 0x2ca   : > { %v3243_v7 = vpop.f32.mrb[72].mxu1 }
 0x2cb   : > { %v3267_v41 = vadd.f32 %v3243_v7, %v9234_v48  ;;  %v6657_v13 = vpop.f32.mrb[73].mxu1  ;;  %v9306_v3 = vpop.f32.mrb[116].mxu0 }
 0x2cc   : > { %v3246_v60 = vpop.f32.mrb[74].mxu1  ;;  %v6753_v19 = vpop.f32.mrb[117].mxu0 }
 0x2cd   : > { %v3268_v1 = vadd.f32 %v3246_v60, %v9237_v57  ;;  %v6658_v47 = vpop.f32.mrb[75].mxu1  ;;  %v9309_v59 = vpop.f32.mrb[118].mxu0  ;;  %v9312_v2 = vadd.f32 %v9228_v25, %v3267_v41 }
 0x2ce   : > { %v6754_v37 = vpop.f32.mrb[119].mxu0 }
 0x2cf   : > { %v9315_v11 = vadd.f32 %v9231_v36, %v3268_v1 }
 0x2d2   : > { %v3251_v21 = vpop.f32.mrb[76].mxu1 }
 0x2d3   : > { %v3269_v48 = vadd.f32 %v3251_v21, %v9243_v8  ;;  %v6661_v45 = vpop.f32.mrb[77].mxu1  ;;  %v9318_v39 = vpop.f32.mrb[120].mxu0 }
 0x2d4   : > { %v3254_v22 = vpop.f32.mrb[78].mxu1  ;;  %v6757_v63 = vpop.f32.mrb[121].mxu0 }
 0x2d5   : > { %v6662_v34 = vpop.f32.mrb[79].mxu1  ;;  %v4275_v57 = vpop.f32.mrb[122].mxu0  ;;  %v9321_v0 = vadd.f32 %v9240_v62, %v3269_v48 }
 0x2d6   : > { %v6758_v30 = vpop.f32.mrb[123].mxu0 }
 0x2da   : > { %v3937_v25 = vpop.f32.mrb[80].mxu1 }
 0x2db   : > { %v3991_v29 = vadd.f32 %v3937_v25, %v9252_v32  ;;  %v6701_v24 = vpop.f32.mrb[81].mxu1  ;;  %v9324_v36 = vpop.f32.mrb[124].mxu0 }
 0x2dc   : > { %v3940_v42 = vpop.f32.mrb[82].mxu1  ;;  %v6797_v31 = vpop.f32.mrb[125].mxu0 }
 0x2dd   : > { %v3992_v8 = vadd.f32 %v3940_v42, %v9255_v49  ;;  %v6702_v56 = vpop.f32.mrb[83].mxu1  ;;  %v9327_v53 = vpop.f32.mrb[126].mxu0  ;;  %v9330_v9 = vadd.f32 %v9246_v46, %v3991_v29 }
 0x2de   : > { %v6798_v40 = vpop.f32.mrb[127].mxu0 }
 0x2df   : > { %v9333_v62 = vadd.f32 %v9249_v52, %v3992_v8 }
 0x2e2   : > { %v3945_v20 = vpop.f32.mrb[84].mxu1 }
 0x2e3   : > { %v3993_v32 = vadd.f32 %v3945_v20, %v9264_v16  ;;  %v6705_v15 = vpop.f32.mrb[85].mxu1  ;;  %v9336_v54 = vpop.f32.mrb[128].mxu0 }
 0x2e4   : > { %v3948_v26 = vpop.f32.mrb[86].mxu1  ;;  %v6801_v44 = vpop.f32.mrb[129].mxu0 }
 0x2e5   : > { %v3994_v49 = vadd.f32 %v3948_v26, %v9267_v28  ;;  %v6706_v23 = vpop.f32.mrb[87].mxu1  ;;  %v9339_v14 = vpop.f32.mrb[130].mxu0  ;;  %v9342_v46 = vadd.f32 %v9258_v12, %v3993_v32 }
 0x2e6   : > { %v6802_v5 = vpop.f32.mrb[131].mxu0 }
 0x2e7   : > { %v9345_v52 = vadd.f32 %v9261_v51, %v3994_v49 }
 0x2ea   : > { %v3953_v10 = vpop.f32.mrb[88].mxu1 }
 0x2eb   : > { %v3995_v16 = vadd.f32 %v3953_v10, %v9276_v38  ;;  %v6709_v7 = vpop.f32.mrb[89].mxu1  ;;  %v9348_v41 = vpop.f32.mrb[132].mxu0 }
 0x2ec   : > { %v3956_v13 = vpop.f32.mrb[90].mxu1  ;;  %v6805_v60 = vpop.f32.mrb[133].mxu0 }
 0x2ed   : > { %v3996_v28 = vadd.f32 %v3956_v13, %v9279_v61  ;;  %v6710_v19 = vpop.f32.mrb[91].mxu1  ;;  %v9351_v1 = vpop.f32.mrb[134].mxu0  ;;  %v9354_v12 = vadd.f32 %v9270_v4, %v3995_v16 }
 0x2ee   : > { %v6806_v47 = vpop.f32.mrb[135].mxu0 }
 0x2ef   : > { %v9357_v51 = vadd.f32 %v9273_v6, %v3996_v28 }
 0x2f2   : > { %v3961_v37 = vpop.f32.mrb[92].mxu1 }
 0x2f3   : > { %v3997_v38 = vadd.f32 %v3961_v37, %v9288_v43  ;;  %v6713_v21 = vpop.f32.mrb[93].mxu1  ;;  %v9360_v48 = vpop.f32.mrb[136].mxu0 }
 0x2f4   : > { %v3964_v45 = vpop.f32.mrb[94].mxu1  ;;  %v6809_v22 = vpop.f32.mrb[137].mxu0 }
 0x2f5   : > { %v3998_v61 = vadd.f32 %v3964_v45, %v9291_v55  ;;  %v6714_v63 = vpop.f32.mrb[95].mxu1  ;;  %v9363_v34 = vpop.f32.mrb[138].mxu0  ;;  %v9366_v4 = vadd.f32 %v9282_v18, %v3997_v38 }
 0x2f6   : > { %v6810_v57 = vpop.f32.mrb[139].mxu0 }
 0x2f7   : > { %v9369_v6 = vadd.f32 %v9285_v27, %v3998_v61 }
 0x2fa   : > { %v3969_v30 = vpop.f32.mrb[96].mxu1 }
 0x2fb   : > { %v3999_v43 = vadd.f32 %v3969_v30, %v9300_v50  ;;  %v6717_v25 = vpop.f32.mrb[97].mxu1  ;;  %v9372_v29 = vpop.f32.mrb[140].mxu0 }
 0x2fc   : > { %v3972_v24 = vpop.f32.mrb[98].mxu1  ;;  %v6813_v42 = vpop.f32.mrb[141].mxu0 }
 0x2fd   : > { %v4000_v55 = vadd.f32 %v3972_v24, %v9303_v58  ;;  %v6718_v31 = vpop.f32.mrb[99].mxu1  ;;  %v9375_v8 = vpop.f32.mrb[142].mxu0  ;;  %v9378_v18 = vadd.f32 %v9294_v17, %v3999_v43 }
 0x2fe   : > { %v6814_v56 = vpop.f32.mrb[143].mxu0 }
 0x2ff   : > { %v9381_v27 = vadd.f32 %v9297_v35, %v4000_v55 }
 0x302   : > { %v3977_v40 = vpop.f32.mrb[100].mxu1 }
 0x303   : > { %v4001_v50 = vadd.f32 %v3977_v40, %v9312_v2  ;;  %v6721_v20 = vpop.f32.mrb[101].mxu1  ;;  %v9384_v32 = vpop.f32.mrb[144].mxu0 }
 0x304   : > { %v3980_v15 = vpop.f32.mrb[102].mxu1  ;;  %v6817_v26 = vpop.f32.mrb[145].mxu0 }
 0x305   : > { %v4002_v58 = vadd.f32 %v3980_v15, %v9315_v11  ;;  %v6722_v44 = vpop.f32.mrb[103].mxu1  ;;  %v9387_v49 = vpop.f32.mrb[146].mxu0  ;;  %v9390_v17 = vadd.f32 %v9306_v3, %v4001_v50 }
 0x306   : > { %v6818_v23 = vpop.f32.mrb[147].mxu0 }
 0x307   : > { %v9393_v35 = vadd.f32 %v9309_v59, %v4002_v58  ;;  %v9405_v59 = vld [vmem:[%s9827_s5] ss:$0 sm:$0xff] }
 0x30a   : > { %v3985_v5 = vpop.f32.mrb[104].mxu1 }
 0x30b   : > { %v4003_v2 = vadd.f32 %v3985_v5, %v9321_v0  ;;  %v6725_v10 = vpop.f32.mrb[105].mxu1  ;;  %v9396_v16 = vpop.f32.mrb[148].mxu0 }
 0x30c   : > { %v3988_v7 = vpop.f32.mrb[106].mxu1  ;;  %v6821_v13 = vpop.f32.mrb[149].mxu0 }
 0x30d   : > { %v6726_v60 = vpop.f32.mrb[107].mxu1  ;;  %v4841_v11 = vpop.f32.mrb[150].mxu0  ;;  %v9399_v28 = vadd.f32 %v9318_v39, %v4003_v2 }
 0x30e   : > { %v6822_v19 = vpop.f32.mrb[151].mxu0 }
 0x312   : > { %v4535_v3 = vpop.f32.mrb[108].mxu1 }
 0x313   : > { %v4589_v47 = vadd.f32 %v4535_v3, %v9330_v9  ;;  %v6765_v37 = vpop.f32.mrb[109].mxu1 }
 0x314   : > { %v4538_v0 = vpop.f32.mrb[110].mxu1 }
 0x315   : > { %v4844_v38 = vadd.f32 %v9324_v36, %v4589_v47  ;;  %v4590_v21 = vadd.f32 %v4538_v0, %v9333_v62  ;;  %v6766_v45 = vpop.f32.mrb[111].mxu1 }
 0x317   : > { %v4864_v22 = vadd.f32 %v9405_v59, %v4844_v38  ;;  %v4845_v39 = vadd.f32 %v9327_v53, %v4590_v21 }
 0x319   : > { %v4865_v61 = vadd.f32 %v9405_v59, %v4845_v39  ;;  %v4877_v9 = vmax.f32 %v4864_v22, 0.0 }
 0x31a   : > { %v4543_v63 = vpop.f32.mrb[112].mxu1 }
 0x31b   : > { %v4878_v57 = vmax.f32 %v4865_v61, 0.0  ;;  %v4591_v30 = vadd.f32 %v4543_v63, %v9342_v46  ;;  %v6769_v43 = vpop.f32.mrb[113].mxu1 }
 0x31c   : > { %v4546_v25 = vpop.f32.mrb[114].mxu1 }
 0x31d   : > { %v4890_v24 = vpack.c.bf16 %v4878_v57, %v4877_v9  ;;  %v4846_v42 = vadd.f32 %v9336_v54, %v4591_v30  ;;  %v4592_v36 = vadd.f32 %v4546_v25, %v9345_v52  ;;  %v6770_v62 = vpop.f32.mrb[115].mxu1 }
 0x31f   : > { %v4866_v55 = vadd.f32 %v9405_v59, %v4846_v42  ;;  %v4847_v31 = vadd.f32 %v9339_v14, %v4592_v36  ;;  %6828 = vmatmul.mubr.msk.bf16.vlgmr.msra.gmra.mrb[136].mxu1 %vm1957_vm1, %v4890_v24 }
 0x320   : > { %6831 = vmatprep.mubr.msk.bf16.mxu1 %vm6997_vm0, %v9983_v33 }
 0x321   : > { %v4867_v53 = vadd.f32 %v9405_v59, %v4847_v31  ;;  %v4879_v56 = vmax.f32 %v4866_v55, 0.0 }
 0x322   : > { %v4551_v46 = vpop.f32.mrb[116].mxu1 }
 0x323   : > { %v4880_v40 = vmax.f32 %v4867_v53, 0.0  ;;  %v4593_v50 = vadd.f32 %v4551_v46, %v9354_v12  ;;  %v6773_v54 = vpop.f32.mrb[117].mxu1 }
 0x324   : > { %v4554_v20 = vpop.f32.mrb[118].mxu1  ;;  %v10194_v54 = vld [vmem:[#allocation2_spill] sm:$0xff] }
 0x325   : > { %v4891_v52 = vpack.c.bf16 %v4880_v40, %v4879_v56  ;;  %v4848_v15 = vadd.f32 %v9348_v41, %v4593_v50  ;;  %v4594_v26 = vadd.f32 %v4554_v20, %v9357_v51  ;;  %v6774_v14 = vpop.f32.mrb[119].mxu1 }
 0x327   : > { %v4868_v58 = vadd.f32 %v9405_v59, %v4848_v15  ;;  %v4849_v44 = vadd.f32 %v9351_v1, %v4594_v26  ;;  %6832 = vmatmul.mubr.msk.bf16.gmra.mrb[140].mxu1 %vm1957_vm1, %v4891_v52  ;;  %v5304_v52 = vld [vmem:[%s9474_s12 + $0x10] sm:$0xff]  ;;  %v5303_v26 = vld [vmem:[%s9474_s12 + $0x8] sm:$0x3f] }
 0x328   : > { %6835 = vmatprep.mubr.msk.bf16.mxu1 %vm6997_vm0, %v9983_v33  ;;  %v5363_v14 = vcombine.high %v5304_v52, %v5304_v52 }
 0x329   : > { %v4869_v23 = vadd.f32 %v9405_v59, %v4849_v44  ;;  %v4881_v5 = vmax.f32 %v4868_v58, 0.0 }
 0x32a   : > { %v4559_v12 = vpop.f32.mrb[120].mxu1 }
 0x32b   : > { %v4882_v2 = vmax.f32 %v4869_v23, 0.0  ;;  %v4595_v10 = vadd.f32 %v4559_v12, %v9366_v4  ;;  %v6777_v41 = vpop.f32.mrb[121].mxu1  ;;  %v5347_v23 = vcombine.high %v5303_v26, %v5303_v26  ;;  %v5305_v12 = vld [vmem:[%s9474_s12 + $0x18] sm:$0x3f] }
 0x32c   : > { %v4562_v7 = vpop.f32.mrb[122].mxu1 }
 0x32d   : > { %v4892_v51 = vpack.c.bf16 %v4882_v2, %v4881_v5  ;;  %v4850_v13 = vadd.f32 %v9360_v48, %v4595_v10  ;;  %v4596_v60 = vadd.f32 %v4562_v7, %v9369_v6  ;;  %v6778_v1 = vpop.f32.mrb[123].mxu1  ;;  %v5306_v5 = vld [vmem:[%s9474_s12 + $0x20] sm:$0xff]  ;;  %v5308_v7 = vld [vmem:[%s9474_s12 + $0x30] sm:$0xff] }
 0x32e   : > { %v5396_v41 = vcombine.high %v5306_v5, %v5306_v5  ;;  %v5429_v1 = vcombine.high %v5308_v7, %v5308_v7 }
 0x32f   : > { %v4870_v11 = vadd.f32 %v9405_v59, %v4850_v13  ;;  %v4851_v19 = vadd.f32 %v9363_v34, %v4596_v60  ;;  %6836 = vmatmul.mubr.msk.bf16.gmra.mrb[144].mxu1 %vm1957_vm1, %v4892_v51  ;;  %v5310_v51 = vld [vmem:[%s9474_s12 + $0x40] sm:$0xff]  ;;  %v5307_v60 = vld [vmem:[%s9474_s12 + $0x28] sm:$0x3f] }
 0x330   : > { %6839 = vmatprep.mubr.msk.bf16.mxu1 %vm6997_vm0, %v9983_v33 }
 0x331   : > { %v4871_v3 = vadd.f32 %v9405_v59, %v4851_v19  ;;  %v4883_v47 = vmax.f32 %v4870_v11, 0.0 }
 0x332   : > { %v4567_v4 = vpop.f32.mrb[124].mxu1 }
 0x333   : > { %v4884_v37 = vmax.f32 %v4871_v3, 0.0  ;;  %v4597_v0 = vadd.f32 %v4567_v4, %v9378_v18  ;;  %v6781_v48 = vpop.f32.mrb[125].mxu1  ;;  %v5380_v3 = vcombine.high %v5305_v12, %v5305_v12 }
 0x334   : > { %v4570_v38 = vpop.f32.mrb[126].mxu1  ;;  %v5462_v48 = vcombine.high %v5310_v51, %v5310_v51 }
 0x335   : > { %v4893_v6 = vpack.c.bf16 %v4884_v37, %v4883_v47  ;;  %v4852_v21 = vadd.f32 %v9372_v29, %v4597_v0  ;;  %v4598_v45 = vadd.f32 %v4570_v38, %v9381_v27  ;;  %v6782_v34 = vpop.f32.mrb[127].mxu1  ;;  %v5312_v38 = vld [vmem:[%s9474_s12 + $0x50] sm:$0xff] }
 0x336   : > { %v5413_v34 = vcombine.high %v5307_v60, %v5307_v60 }
 0x337   : > { %v4872_v22 = vadd.f32 %v9405_v59, %v4852_v21  ;;  %v4853_v39 = vadd.f32 %v9375_v8, %v4598_v45  ;;  %6840 = vmatmul.mubr.msk.bf16.gmra.mrb[148].mxu1 %vm1957_vm1, %v4893_v6 }
 0x338   : > { %6843 = vmatprep.mubr.msk.bf16.mxu1 %vm6997_vm0, %v9983_v33 }
 0x339   : > { %v4873_v61 = vadd.f32 %v9405_v59, %v4853_v39  ;;  %v4885_v63 = vmax.f32 %v4872_v22, 0.0  ;;  %v5309_v22 = vld [vmem:[%s9474_s12 + $0x38] sm:$0x3f] }
 0x33a   : > { %v4575_v18 = vpop.f32.mrb[128].mxu1 }
 0x33b   : > { %v4886_v9 = vmax.f32 %v4873_v61, 0.0  ;;  %v4599_v57 = vadd.f32 %v4575_v18, %v9390_v17  ;;  %v6785_v29 = vpop.f32.mrb[129].mxu1 }
 0x33c   : > { %v4578_v30 = vpop.f32.mrb[130].mxu1 }
 0x33d   : > { %v4894_v27 = vpack.c.bf16 %v4886_v9, %v4885_v63  ;;  %v4854_v43 = vadd.f32 %v9384_v32, %v4599_v57  ;;  %v4600_v25 = vadd.f32 %v4578_v30, %v9393_v35  ;;  %v6786_v8 = vpop.f32.mrb[131].mxu1  ;;  %v5446_v63 = vcombine.high %v5309_v22, %v5309_v22  ;;  %v5311_v9 = vld [vmem:[%s9474_s12 + $0x48] sm:$0x3f] }
 0x33f   : > { %v4874_v24 = vadd.f32 %v9405_v59, %v4854_v43  ;;  %v4855_v42 = vadd.f32 %v9387_v49, %v4600_v25  ;;  %6844 = vmatmul.mubr.msk.bf16.gmra.mrb[152].mxu1 %vm1957_vm1, %v4894_v27  ;;  %v5495_v27 = vcombine.high %v5312_v38, %v5312_v38  ;;  %v5314_v43 = vld [vmem:[%s9474_s12 + $0x60] sm:$0xff] }
 0x340   : > { %6847 = vmatprep.mubr.msk.bf16.mxu1 %vm6997_vm0, %v9983_v33 }
 0x341   : > { %v4875_v36 = vadd.f32 %v9405_v59, %v4855_v42  ;;  %v4887_v62 = vmax.f32 %v4874_v24, 0.0 }
 0x342   : > { %v4583_v17 = vpop.f32.mrb[132].mxu1 }
 0x343   : > { %v4888_v55 = vmax.f32 %v4875_v36, 0.0  ;;  %v4601_v32 = vadd.f32 %v4583_v17, %v9399_v28  ;;  %v6789_v35 = vpop.f32.mrb[133].mxu1  ;;  %v5313_v36 = vld [vmem:[%s9474_s12 + $0x58] sm:$0x3f]  ;;  %v9559_v17 = vld [vmem:[%s9829_s7] ss:$0 sm:$0xff] }
 0x344   : > { %v4586_v31 = vpop.f32.mrb[134].mxu1 }
 0x345   : > { %v4895_v53 = vpack.c.bf16 %v4888_v55, %v4887_v62  ;;  %v4856_v46 = vadd.f32 %v9396_v16, %v4601_v32  ;;  %v6790_v49 = vpop.f32.mrb[135].mxu1  ;;  %v6999_v16 = vmov 1983009808   ;;  %v5479_v32 = vcombine.high %v5311_v9, %v5311_v9 }
 0x346   : > { %v5044_v28 = vunpack.c.l.s4 %v6999_v16  ;;  %v9577_v49 = vld [vmem:[%s9474_s12 + $0x68] sm:$0x3f] }
 0x347   : > { %v4876_v56 = vadd.f32 %v9405_v59, %v4856_v46  ;;  %6848 = vmatmul.mubr.msk.bf16.gmra.mrb[156].mxu1 %vm1957_vm1, %v4895_v53  ;;  %v5302_v59 = vld [vmem:[%s9474_s12] sm:$0xff] }
 0x348   : > { %6851 = vmatprep.mubr.msk.bf16.mxu1 %vm6997_vm0, %v9983_v33  ;;  %v5045_v33 = vunpack.c.0.s8 %v5044_v28  ;;  %v5330_v15 = vcombine.high %v5302_v59, %v5302_v59 }
 0x349   : > { %v4889_v40 = vmax.f32 %v4876_v56, 0.0  ;;  %v5528_v56 = vcombine.high %v5314_v43, %v5314_v43 }
 0x34a   : > { %v9478_v20 = vsub.s32 %v5045_v33, %v10194_v54  ;;  %v5512_v33 = vcombine.high %v5313_v36, %v5313_v36 }
 0x34b   : > { %v4896_v50 = vpack.c.bf16 %v4889_v40, %v4889_v40 }
 0x34c   : > { %v9483_v58 = vrot.slane %v5302_v59, %v9478_v20  ;;  %v9486_v44 = vrot.slane %v5330_v15, %v9478_v20  ;;  %v9491_v2 = vrot.slane %v5303_v26, %v9478_v20  ;;  %v9494_v10 = vrot.slane %v5304_v52, %v9478_v20 }
 0x34d   : > { %v9499_v13 = vrot.slane %v5363_v14, %v9478_v20  ;;  %v9505_v19 = vrot.slane %v5305_v12, %v9478_v20  ;;  %v9508_v4 = vrot.slane %v5306_v5, %v9478_v20  ;;  %v9513_v37 = vrot.slane %v5347_v23, %v9478_v20 }
 0x34e   : > { %v5345_v11 = vcombine.high %v9483_v58, %v9483_v58  ;;  %v5346_v47 = vcombine.high %v9486_v44, %v9486_v44  ;;  %v9516_v0 = vrot.slane %v5307_v60, %v9478_v20  ;;  %v5362_v6 = vcombine.high %v9491_v2, %v9491_v2 }
 0x34f   : > { %6852 = vmatmul.mubr.msk.bf16.gmra.mrb[160].mxu1 %vm1957_vm1, %v4896_v50  ;;  %v5378_v21 = vcombine.high %v9494_v10, %v9494_v10  ;;  %v9524_v45 = vrot.slane %v5396_v41, %v9478_v20  ;;  %v5379_v39 = vcombine.high %v9499_v13, %v9499_v13  ;;  %v9530_v61 = vrot.slane %v5308_v7, %v9478_v20 }
 0x350   : > { %v9533_v18 = vrot.slane %v5429_v1, %v9478_v20  ;;  %v9537_v57 = vrot.slane %v5380_v3, %v9478_v20  ;;  %v5395_v29 = vcombine.high %v9505_v19, %v9505_v19  ;;  %v5411_v30 = vcombine.high %v9508_v4, %v9508_v4 }
 0x351   : > { %v5428_v25 = vcombine.high %v9516_v0, %v9516_v0  ;;  %v9547_v8 = vrot.slane %v5309_v22, %v9478_v20  ;;  %v9550_v24 = vrot.slane %v5310_v51, %v9478_v20  ;;  %v9553_v42 = vrot.slane %v5462_v48, %v9478_v20 }
 0x352   : > { %v5412_v62 = vcombine.high %v9524_v45, %v9524_v45  ;;  %v9564_v55 = vrot.slane %v5413_v34, %v9478_v20  ;;  %v9567_v35 = vrot.slane %v5311_v9, %v9478_v20  ;;  %v5444_v31 = vcombine.high %v9530_v61, %v9530_v61 }
 0x353   : > { %v5445_v53 = vcombine.high %v9533_v18, %v9533_v18  ;;  %v9574_v46 = vrot.slane %v5446_v63, %v9478_v20  ;;  %v9580_v50 = vrot.slane %v5312_v38, %v9478_v20  ;;  %v9583_v16 = vrot.slane %v5495_v27, %v9478_v20 }
 0x354   : > { %v9586_v28 = vrot.slane %v5313_v36, %v9478_v20  ;;  %v5461_v52 = vcombine.high %v9547_v8, %v9547_v8  ;;  %v5477_v15 = vcombine.high %v9550_v24, %v9550_v24  ;;  %v5478_v26 = vcombine.high %v9553_v42, %v9553_v42 }
 0x355   : > { %v9596_v23 = vrot.slane %v5479_v32, %v9478_v20  ;;  %v5494_v12 = vcombine.high %v9567_v35, %v9567_v35  ;;  %v9601_v5 = vrot.slane %v5314_v43, %v9478_v20  ;;  %v9605_v41 = vrot.slane %v9577_v49, %v9478_v20 }
 0x356   : > { %v9610_v3 = vrot.slane %v5528_v56, %v9478_v20  ;;  %v9617_v34 = vrot.slane %v5512_v33, %v9478_v20 }
 0x3f2   : > { %v4975_v40 = vpop.f32.mrb[136].mxu1 }
 0x3f3   : > { %v4976_v59 = vadd.f32 %v9559_v17, %v4975_v40  ;;  %v6829_v54 = vpop.f32.mrb[137].mxu1 }
 0x3f4   : > { %v4978_v14 = vpop.f32.mrb[138].mxu1 }
 0x3f5   : > { %v5042_v7 = vcombine.high %v4976_v59, %v4976_v59  ;;  %v5049_v51 = vrot.slane %v4976_v59, %v9478_v20  ;;  %v4979_v60 = vadd.f32 %v9559_v17, %v4978_v14  ;;  %v6830_v1 = vpop.f32.mrb[139].mxu1 }
 0x3f7   : > { %v5056_v63 = vrot.slane %v5042_v7, %v9478_v20  ;;  %v5057_v9 = vcombine.high %v5049_v51, %v5049_v51  ;;  %v5610_v27 = vadd.f32 %v9483_v58, %v5049_v51  ;;  %v5059_v43 = vcombine.high %v4979_v60, %v4979_v60 }
 0x3f8   : > { %v5066_v36 = vrot.slane %v4979_v60, %v9478_v20 }
 0x3f9   : > { %v5058_v33 = vcombine.high %v5056_v63, %v5056_v63  ;;  %v5611_v59 = vadd.f32 %v5345_v11, %v5057_v9  ;;  %v5612_v54 = vadd.f32 %v9486_v44, %v5056_v63  ;;  %v5659_v7 = vmax.f32 %v5610_v27, 0.0 }
 0x3fa   : > { %v5073_v51 = vrot.slane %v5059_v43, %v9478_v20  ;;  %v5074_v60 = vcombine.high %v5066_v36, %v5066_v36  ;;  %v5614_v1 = vadd.f32 %v9491_v2, %v5066_v36  ;;  %v4983_v56 = vpop.f32.mrb[140].mxu1 }
 0x3fb   : > { %v5613_v40 = vadd.f32 %v5346_v47, %v5058_v33  ;;  %v5660_v32 = vmax.f32 %v5611_v59, 0.0  ;;  %v5661_v22 = vmax.f32 %v5612_v54, 0.0  ;;  %v4984_v58 = vadd.f32 %v9559_v17, %v4983_v56  ;;  %v6833_v11 = vpop.f32.mrb[141].mxu1 }
 0x3fc   : > { %v5075_v63 = vcombine.high %v5073_v51, %v5073_v51  ;;  %v5615_v9 = vadd.f32 %v5362_v6, %v5074_v60  ;;  %v5616_v27 = vadd.f32 %v9513_v37, %v5073_v51  ;;  %v5663_v43 = vmax.f32 %v5614_v1, 0.0  ;;  %v4986_v14 = vpop.f32.mrb[142].mxu1 }
 0x3fd   : > { %v5662_v36 = vmax.f32 %v5613_v40, 0.0  ;;  %v5757_v38 = vcombine.low %v5659_v7, %v5660_v32  ;;  %v5076_v48 = vcombine.high %v4984_v58, %v4984_v58  ;;  %v5083_v44 = vrot.slane %v4984_v58, %v9478_v20  ;;  %v6834_v47 = vpop.f32.mrb[143].mxu1 }
 0x3fe   : > { %v5617_v33 = vadd.f32 %v9494_v10, %v5075_v63  ;;  %v5664_v56 = vmax.f32 %v5615_v9, 0.0  ;;  %v5665_v59 = vmax.f32 %v5616_v27, 0.0  ;;  %v4987_v54 = vadd.f32 %v9559_v17, %v4986_v14 }
 0x3ff   : > { %v5758_v11 = vcombine.low %v5661_v22, %v5662_v36  ;;  %v5765_v2 = vrot.slane %v5757_v38, %v9478_v20  ;;  %v5090_v37 = vrot.slane %v5076_v48, %v9478_v20  ;;  %v5091_v6 = vcombine.high %v5083_v44, %v5083_v44 }
 0x400   : > { %v5774_v51 = vcombine.low %v5663_v43, %v5664_v56  ;;  %v5788_v32 = vrot.slane %v5665_v59, %v9478_v20  ;;  %v5618_v40 = vadd.f32 %v5378_v21, %v5083_v44  ;;  %v5666_v7 = vmax.f32 %v5617_v33, 0.0 }
 0x401   : > { %v5772_v60 = vrot.slane %v5758_v11, %v9478_v20  ;;  %v5092_v1 = vcombine.high %v5090_v37, %v5090_v37  ;;  %v5619_v58 = vadd.f32 %v9499_v13, %v5091_v6  ;;  %v5620_v38 = vadd.f32 %v5379_v39, %v5090_v37 }
 0x402   : > { %v5781_v10 = vrot.slane %v5774_v51, %v9478_v20  ;;  %v5667_v21 = vmax.f32 %v5618_v40, 0.0  ;;  %v5093_v48 = vcombine.high %v4987_v54, %v4987_v54  ;;  %v5100_v22 = vrot.slane %v4987_v54, %v9478_v20  ;;  %v4991_v14 = vpop.f32.mrb[144].mxu1 }
 0x403   : > { %v5773_v63 = vcombine.low %v5765_v2, %v5772_v60  ;;  %v5621_v9 = vadd.f32 %v9505_v19, %v5092_v1  ;;  %v5668_v13 = vmax.f32 %v5619_v58, 0.0  ;;  %v5669_v39 = vmax.f32 %v5620_v38, 0.0  ;;  %v6837_v27 = vpop.f32.mrb[145].mxu1 }
 0x404   : > { %v5789_v43 = vcombine.low %v5781_v10, %v5788_v32  ;;  %v5790_v36 = vcombine.low %v5666_v7, %v5667_v21  ;;  %v5107_v44 = vrot.slane %v5093_v48, %v9478_v20  ;;  %v5108_v47 = vcombine.high %v5100_v22, %v5100_v22  ;;  %v4994_v33 = vpop.f32.mrb[146].mxu1 }
 0x405   : > { %6002 = vst [vmem:[%s9665_s15] sm:$0xff] %v5773_v63  ;;  %v5791_v56 = vcombine.low %v5668_v13, %v5669_v39  ;;  %v5622_v59 = vadd.f32 %v5395_v29, %v5100_v22  ;;  %v5670_v54 = vmax.f32 %v5621_v9, 0.0  ;;  %v4992_v11 = vadd.f32 %v9559_v17, %v4991_v14  ;;  %v6838_v2 = vpop.f32.mrb[147].mxu1 }
 0x406   : > { %6003 = vst [vmem:[%s9665_s15 + $0x8] sm:$0x3f] %v5789_v43  ;;  %v5798_v37 = vrot.slane %v5790_v36, %v9478_v20  ;;  %v5109_v6 = vcombine.high %v5107_v44, %v5107_v44  ;;  %v5623_v51 = vadd.f32 %v9537_v57, %v5108_v47  ;;  %v5624_v32 = vadd.f32 %v9508_v4, %v5107_v44 }
 0x407   : > { %v5805_v40 = vrot.slane %v5791_v56, %v9478_v20  ;;  %v5671_v7 = vmax.f32 %v5622_v59, 0.0  ;;  %v5110_v60 = vcombine.high %v4992_v11, %v4992_v11  ;;  %v5117_v19 = vrot.slane %v4992_v11, %v9478_v20 }
 0x408   : > { %v5625_v29 = vadd.f32 %v5411_v30, %v5109_v6  ;;  %v5672_v1 = vmax.f32 %v5623_v51, 0.0  ;;  %v5673_v58 = vmax.f32 %v5624_v32, 0.0  ;;  %v4995_v38 = vadd.f32 %v9559_v17, %v4994_v33 }
 0x409   : > { %v5806_v10 = vcombine.low %v5798_v37, %v5805_v40  ;;  %v5807_v21 = vcombine.low %v5670_v54, %v5671_v7  ;;  %v5124_v57 = vrot.slane %v5110_v60, %v9478_v20  ;;  %v5125_v48 = vcombine.high %v5117_v19, %v5117_v19 }
 0x40a   : > { %v5674_v22 = vmax.f32 %v5625_v29, 0.0  ;;  %v5821_v14 = vrot.slane %v5672_v1, %v9478_v20  ;;  %v5626_v63 = vadd.f32 %v9524_v45, %v5117_v19  ;;  %v5127_v9 = vcombine.high %v4995_v38, %v4995_v38  ;;  %v4999_v13 = vpop.f32.mrb[148].mxu1 }
 0x40b   : > { %6004 = vst [vmem:[%s9665_s15 + $0x10] sm:$0xff] %v5806_v10  ;;  %v5814_v4 = vrot.slane %v5807_v21, %v9478_v20  ;;  %v5126_v30 = vcombine.high %v5124_v57, %v5124_v57  ;;  %v5627_v39 = vadd.f32 %v5412_v62, %v5125_v48  ;;  %v5628_v27 = vadd.f32 %v9516_v0, %v5124_v57  ;;  %v6841_v43 = vpop.f32.mrb[149].mxu1 }
 0x40c   : > { %v5823_v36 = vcombine.low %v5673_v58, %v5674_v22  ;;  %v5675_v44 = vmax.f32 %v5626_v63, 0.0  ;;  %v5134_v47 = vrot.slane %v4995_v38, %v9478_v20  ;;  %v5141_v33 = vrot.slane %v5127_v9, %v9478_v20  ;;  %v5002_v56 = vpop.f32.mrb[150].mxu1 }
 0x40d   : > { %v5822_v59 = vcombine.low %v5814_v4, %v5821_v14  ;;  %v5629_v54 = vadd.f32 %v5428_v25, %v5126_v30  ;;  %v5676_v11 = vmax.f32 %v5627_v39, 0.0  ;;  %v5677_v2 = vmax.f32 %v5628_v27, 0.0  ;;  %v6842_v45 = vpop.f32.mrb[151].mxu1 }
 0x40e   : > { %v5831_v62 = vrot.slane %v5823_v36, %v9478_v20  ;;  %v5142_v37 = vcombine.high %v5134_v47, %v5134_v47  ;;  %v5143_v6 = vcombine.high %v5141_v33, %v5141_v33  ;;  %v5630_v51 = vadd.f32 %v9564_v55, %v5134_v47 }
 0x40f   : > { %6005 = vst [vmem:[%s9665_s15 + $0x18] sm:$0x3f] %v5822_v59  ;;  %v5678_v32 = vmax.f32 %v5629_v54, 0.0  ;;  %v5824_v40 = vcombine.low %v5675_v44, %v5676_v11  ;;  %v5632_v7 = vadd.f32 %v5444_v31, %v5141_v33  ;;  %v5000_v60 = vadd.f32 %v9559_v17, %v4999_v13 }
 0x410   : > { %v5631_v0 = vadd.f32 %v9530_v61, %v5142_v37  ;;  %v5633_v25 = vadd.f32 %v9533_v18, %v5143_v6  ;;  %v5679_v19 = vmax.f32 %v5630_v51, 0.0  ;;  %v5003_v29 = vadd.f32 %v9559_v17, %v5002_v56 }
 0x411   : > { %v5838_v1 = vrot.slane %v5824_v40, %v9478_v20  ;;  %v5840_v58 = vcombine.low %v5677_v2, %v5678_v32  ;;  %v5681_v55 = vmax.f32 %v5632_v7, 0.0  ;;  %v5144_v38 = vcombine.high %v5000_v60, %v5000_v60 }
 0x412   : > { %v5680_v10 = vmax.f32 %v5631_v0, 0.0  ;;  %v5854_v21 = vrot.slane %v5679_v19, %v9478_v20  ;;  %v5151_v31 = vrot.slane %v5000_v60, %v9478_v20  ;;  %v5682_v57 = vmax.f32 %v5633_v25, 0.0  ;;  %v5007_v48 = vpop.f32.mrb[152].mxu1 }
 0x413   : > { %v5839_v22 = vcombine.low %v5831_v62, %v5838_v1  ;;  %v5847_v61 = vrot.slane %v5840_v58, %v9478_v20  ;;  %v5158_v14 = vrot.slane %v5144_v38, %v9478_v20  ;;  %v5161_v63 = vcombine.high %v5003_v29, %v5003_v29  ;;  %v6845_v9 = vpop.f32.mrb[153].mxu1 }
 0x414   : > { %v5856_v13 = vcombine.low %v5680_v10, %v5681_v55  ;;  %v5159_v4 = vcombine.high %v5151_v31, %v5151_v31  ;;  %v5634_v30 = vadd.f32 %v5445_v53, %v5151_v31  ;;  %v5168_v39 = vrot.slane %v5003_v29, %v9478_v20  ;;  %v5010_v27 = vpop.f32.mrb[154].mxu1 }
 0x415   : > { %6006 = vst [vmem:[%s9665_s15 + $0x20] sm:$0xff] %v5839_v22  ;;  %v5855_v43 = vcombine.low %v5847_v61, %v5854_v21  ;;  %v5160_v36 = vcombine.high %v5158_v14, %v5158_v14  ;;  %v5636_v44 = vadd.f32 %v5461_v52, %v5158_v14  ;;  %v5175_v47 = vrot.slane %v5161_v63, %v9478_v20  ;;  %v6846_v33 = vpop.f32.mrb[155].mxu1 }
 0x416   : > { %v5864_v56 = vrot.slane %v5856_v13, %v9478_v20  ;;  %v5635_v59 = vadd.f32 %v9547_v8, %v5159_v4  ;;  %v5683_v54 = vmax.f32 %v5634_v30, 0.0  ;;  %v5176_v18 = vcombine.high %v5168_v39, %v5168_v39 }
 0x417   : > { %6007 = vst [vmem:[%s9665_s15 + $0x28] sm:$0x3f] %v5855_v43  ;;  %v5637_v53 = vadd.f32 %v9574_v46, %v5160_v36  ;;  %v5685_v11 = vmax.f32 %v5636_v44, 0.0  ;;  %v5177_v2 = vcombine.high %v5175_v47, %v5175_v47  ;;  %v5638_v45 = vadd.f32 %v9550_v24, %v5168_v39 }
 0x418   : > { %v5684_v62 = vmax.f32 %v5635_v59, 0.0  ;;  %v5857_v37 = vcombine.low %v5682_v57, %v5683_v54  ;;  %v5639_v52 = vadd.f32 %v5477_v15, %v5176_v18  ;;  %v5640_v6 = vadd.f32 %v9553_v42, %v5175_v47 }
 0x419   : > { %v5686_v51 = vmax.f32 %v5637_v53, 0.0  ;;  %v5641_v8 = vadd.f32 %v5478_v26, %v5177_v2  ;;  %v5687_v32 = vmax.f32 %v5638_v45, 0.0  ;;  %v5008_v46 = vadd.f32 %v9559_v17, %v5007_v48 }
 0x41a   : > { %v5871_v40 = vrot.slane %v5857_v37, %v9478_v20  ;;  %v5873_v7 = vcombine.low %v5684_v62, %v5685_v11  ;;  %v5688_v60 = vmax.f32 %v5639_v52, 0.0  ;;  %v5689_v0 = vmax.f32 %v5640_v6, 0.0  ;;  %v5015_v25 = vpop.f32.mrb[156].mxu1 }
 0x41b   : > { %v5887_v19 = vrot.slane %v5686_v51, %v9478_v20  ;;  %v5690_v24 = vmax.f32 %v5641_v8, 0.0  ;;  %v5178_v15 = vcombine.high %v5008_v46, %v5008_v46  ;;  %v5185_v29 = vrot.slane %v5008_v46, %v9478_v20  ;;  %v6849_v1 = vpop.f32.mrb[157].mxu1 }
 0x41c   : > { %v5872_v58 = vcombine.low %v5864_v56, %v5871_v40  ;;  %v5880_v42 = vrot.slane %v5873_v7, %v9478_v20  ;;  %v5889_v26 = vcombine.low %v5687_v32, %v5688_v60  ;;  %v5011_v55 = vadd.f32 %v9559_v17, %v5010_v27  ;;  %v5018_v38 = vpop.f32.mrb[158].mxu1 }
 0x41d   : > { %v5890_v10 = vcombine.low %v5689_v0, %v5690_v24  ;;  %v5192_v21 = vrot.slane %v5178_v15, %v9478_v20  ;;  %v5193_v31 = vcombine.high %v5185_v29, %v5185_v29  ;;  %v5642_v57 = vadd.f32 %v9567_v35, %v5185_v29  ;;  %v6850_v48 = vpop.f32.mrb[159].mxu1 }
 0x41e   : > { %v5888_v22 = vcombine.low %v5880_v42, %v5887_v19  ;;  %6008 = vst [vmem:[%s9665_s15 + $0x30] sm:$0xff] %v5872_v58  ;;  %v5897_v61 = vrot.slane %v5889_v26, %v9478_v20  ;;  %v5195_v14 = vcombine.high %v5011_v55, %v5011_v55  ;;  %v5202_v63 = vrot.slane %v5011_v55, %v9478_v20 }
 0x41f   : > { %v5904_v9 = vrot.slane %v5890_v10, %v9478_v20  ;;  %v5194_v13 = vcombine.high %v5192_v21, %v5192_v21  ;;  %v5643_v4 = vadd.f32 %v5494_v12, %v5193_v31  ;;  %v5644_v30 = vadd.f32 %v9596_v23, %v5192_v21 }
 0x420   : > { %6009 = vst [vmem:[%s9665_s15 + $0x38] sm:$0x3f] %v5888_v22  ;;  %v5691_v39 = vmax.f32 %v5642_v57, 0.0  ;;  %v5209_v27 = vrot.slane %v5195_v14, %v9478_v20  ;;  %v5210_v43 = vcombine.high %v5202_v63, %v5202_v63  ;;  %v10195_v36 = vcombine.high %v9580_v50, %v9580_v50 }
 0x421   : > { %v5905_v47 = vcombine.low %v5897_v61, %v5904_v9  ;;  %v5645_v33 = vadd.f32 %v9580_v50, %v5194_v13  ;;  %v5692_v56 = vmax.f32 %v5643_v4, 0.0  ;;  %v5693_v59 = vmax.f32 %v5644_v30, 0.0 }
 0x422   : > { %v5646_v44 = vadd.f32 %v10195_v36, %v5202_v63  ;;  %v5211_v54 = vcombine.high %v5209_v27, %v5209_v27  ;;  %v5647_v35 = vadd.f32 %v9583_v16, %v5210_v43  ;;  %v10196_v23 = vcombine.high %v9583_v16, %v9583_v16  ;;  %v5023_v53 = vpop.f32.mrb[160].mxu1 }
 0x423   : > { %6010 = vst [vmem:[%s9665_s15 + $0x40] sm:$0xff] %v5905_v47  ;;  %v5906_v11 = vcombine.low %v5691_v39, %v5692_v56  ;;  %v5920_v2 = vrot.slane %v5693_v59, %v9478_v20  ;;  %v5694_v45 = vmax.f32 %v5645_v33, 0.0  ;;  %v5016_v62 = vadd.f32 %v9559_v17, %v5015_v25  ;;  %v6853_v37 = vpop.f32.mrb[161].mxu1 }
 0x424   : > { %v5648_v12 = vadd.f32 %v10196_v23, %v5209_v27  ;;  %v5695_v18 = vmax.f32 %v5646_v44, 0.0  ;;  %v5649_v50 = vadd.f32 %v9586_v28, %v5211_v54  ;;  %v5696_v52 = vmax.f32 %v5647_v35, 0.0  ;;  %v5026_v8 = vpop.f32.mrb[162].mxu1 }
 0x425   : > { %v5019_v51 = vadd.f32 %v9559_v17, %v5018_v38  ;;  %v5913_v16 = vrot.slane %v5906_v11, %v9478_v20  ;;  %v5212_v46 = vcombine.high %v5016_v62, %v5016_v62  ;;  %v5219_v40 = vrot.slane %v5016_v62, %v9478_v20  ;;  %v6854_v7 = vpop.f32.mrb[163].mxu1 }
 0x426   : > { %v5697_v6 = vmax.f32 %v5648_v12, 0.0  ;;  %v5922_v32 = vcombine.low %v5694_v45, %v5695_v18  ;;  %v5698_v0 = vmax.f32 %v5649_v50, 0.0  ;;  %v10197_v42 = vcombine.high %v9586_v28, %v9586_v28 }
 0x427   : > { %v5229_v19 = vcombine.high %v5019_v51, %v5019_v51  ;;  %v5236_v25 = vrot.slane %v5019_v51, %v9478_v20  ;;  %v5921_v24 = vcombine.low %v5913_v16, %v5920_v2  ;;  %v5226_v29 = vrot.slane %v5212_v46, %v9478_v20 }
 0x428   : > { %v5923_v60 = vcombine.low %v5696_v52, %v5697_v6  ;;  %v5930_v15 = vrot.slane %v5922_v32, %v9478_v20  ;;  %v5227_v1 = vcombine.high %v5219_v40, %v5219_v40  ;;  %v5650_v26 = vadd.f32 %v10197_v42, %v5219_v40 }
 0x429   : > { %v5243_v55 = vrot.slane %v5229_v19, %v9478_v20  ;;  %v5244_v38 = vcombine.high %v5236_v25, %v5236_v25  ;;  %6011 = vst [vmem:[%s9665_s15 + $0x48] sm:$0x3f] %v5921_v24  ;;  %v5228_v10 = vcombine.high %v5226_v29, %v5226_v29  ;;  %v5652_v31 = vadd.f32 %v9601_v5, %v5226_v29 }
 0x42a   : > { %v5937_v58 = vrot.slane %v5923_v60, %v9478_v20  ;;  %v5651_v21 = vadd.f32 %v9617_v34, %v5227_v1  ;;  %v5654_v57 = vadd.f32 %v9610_v3, %v5236_v25  ;;  %v5699_v22 = vmax.f32 %v5650_v26, 0.0 }
 0x42b   : > { %v5245_v61 = vcombine.high %v5243_v55, %v5243_v55  ;;  %v10198_v14 = vcombine.high %v9610_v3, %v9610_v3  ;;  %v10199_v63 = vcombine.high %v9601_v5, %v9601_v5  ;;  %v5656_v4 = vadd.f32 %v9605_v41, %v5243_v55 }
 0x42c   : > { %v5938_v48 = vcombine.low %v5930_v15, %v5937_v58  ;;  %v5700_v13 = vmax.f32 %v5651_v21, 0.0  ;;  %v10200_v34 = vcombine.high %v9577_v49, %v9577_v49  ;;  %v5939_v39 = vcombine.low %v5698_v0, %v5699_v22 }
 0x42d   : > { %v5655_v28 = vadd.f32 %v10198_v14, %v5244_v38  ;;  %v5653_v9 = vadd.f32 %v10199_v63, %v5228_v10  ;;  %v10201_v27 = vcombine.high %v9605_v41, %v9605_v41  ;;  %v5703_v3 = vmax.f32 %v5654_v57, 0.0 }
 0x42e   : > { %v5559_v30 = vrot.slane %v10200_v34, %v9478_v20  ;;  %6012 = vst [vmem:[%s9665_s15 + $0x50] sm:$0xff] %v5938_v48  ;;  %v5701_v44 = vmax.f32 %v5652_v31, 0.0  ;;  %v5953_v47 = vrot.slane %v5700_v13, %v9478_v20  ;;  %v5024_v33 = vadd.f32 %v9559_v17, %v5023_v53 }
 0x42f   : > { %v5657_v43 = vadd.f32 %v10201_v27, %v5245_v61  ;;  %v5704_v36 = vmax.f32 %v5655_v28, 0.0  ;;  %v5702_v5 = vmax.f32 %v5653_v9, 0.0  ;;  %v5946_v56 = vrot.slane %v5939_v39, %v9478_v20 }
 0x430   : > { %v5705_v49 = vmax.f32 %v5656_v4, 0.0  ;;  %v5252_v41 = vrot.slane %v5024_v33, %v9478_v20 }
 0x431   : > { %v5706_v59 = vmax.f32 %v5657_v43, 0.0  ;;  %v5956_v54 = vcombine.low %v5703_v3, %v5704_v36  ;;  %v5955_v35 = vcombine.low %v5701_v44, %v5702_v5  ;;  %v5954_v23 = vcombine.low %v5946_v56, %v5953_v47 }
 0x432   : > { %v5658_v2 = vadd.f32 %v5559_v30, %v5252_v41 }
 0x433   : > { %v5970_v12 = vrot.slane %v5956_v54, %v9478_v20  ;;  %v5972_v18 = vcombine.low %v5705_v49, %v5706_v59  ;;  %v5963_v11 = vrot.slane %v5955_v35, %v9478_v20  ;;  %6013 = vst [vmem:[%s9665_s15 + $0x58] sm:$0x3f] %v5954_v23 }
 0x434   : > { %v5707_v17 = vmax.f32 %v5658_v2, 0.0 }
 0x435   : > { %v5971_v45 = vcombine.low %v5963_v11, %v5970_v12  ;;  %v5979_v53 = vrot.slane %v5972_v18, %v9478_v20 }
 0x436   : > { %v5986_v62 = vrot.slane %v5707_v17, %v9478_v20 }
 0x437   : > { %6014 = vst [vmem:[%s9665_s15 + $0x60] sm:$0xff] %v5971_v45 }
 0x438   : > { %v5987_v37 = vcombine.low %v5979_v53, %v5986_v62 }
 0x43a   : > { %6015 = vst [vmem:[%s9665_s15 + $0x68] sm:$0x3f] %v5987_v37 }
 0x43b PF: > { %s18_s9 = sadd.s32 1, %s6994_s9   ;;  %s10202_s27 = smov %s6986_s29 }
 0x43c   : > { %p15_p7 = scmp.ge.s32.totalorder %s18_s9, 6   ;;  %s10203_s28 = smov %s6990_s30 }
 0x43d   : > { %s10204_s29 = smov %s10207_s10  ;;  %s10205_s30 = smov %s10211_s11 }
 0x43e   :  { %17 = sbr.rel (!%p15_p7) target bundleno = 3 (0x3), region = 94 }

</bundles_post_ra>
